<compile_context>
chip_gen: v5e
topology: v5e:2x2
jax: 0.10.0
libtpu: 0.0.40
codegen_flags: <defaults>
</compile_context>

<pallas_src>
import math
import numpy as np
import jax
import jax.numpy as jnp
from jax.experimental import pallas as pl
from jax.experimental.pallas import tpu as pltpu

DIM = 16              # EncoderBlock dim
CIN = DIM // 2        # 8 channels inside the residual units
STRIDE = 1            # default stride -> final conv k=2, stride=1, pad=1
EPS = 1e-9
HALO = 128            # left zero halo: lane-aligned live-region start, >= max pad 27
RPAD = 128            # right zero halo: >= max(27, Lout_pad - L)


def _snake(h, a, inv_a):
    # snake(x, alpha) = x + (alpha + 1e-9)^-1 * sin(alpha * x)^2  (inv precomputed)
    s = jnp.sin(a * h)
    return h + inv_a * (s * s)


def encoder_block_kernel(x_ref, a_ref, ia_ref, w7_ref, b7_ref, w1_ref, b1_ref,
                         wf_ref, bf_ref, o_ref, h_ref):
    G, _, L = x_ref.shape
    GC = h_ref.shape[0]              # G * CIN
    DIM_out = o_ref.shape[1]
    Lout_pad = o_ref.shape[2]

    # Zero the conv padding halos.  Left halo is one aligned 128-wide store;
    # live region [HALO, HALO+L) is fully overwritten each unit / step.
    h_ref[:, 0:HALO] = jnp.zeros((GC, HALO), jnp.bfloat16)
    h_ref[:, HALO + L:HALO + L + RPAD] = jnp.zeros((GC, RPAD), jnp.bfloat16)

    # Stack the G batch elements on the sublane axis: (G*CIN, L) f32.
    if G == 1:
        x = x_ref[0]
    else:
        x = jnp.concatenate([x_ref[g] for g in range(G)], axis=0)

    # --- three ResidualUnits, dilations 1, 3, 9 (static Python unroll) ---
    for u, d in enumerate((1, 3, 9)):
        p = 3 * d                                     # (7-1)*d//2
        h = _snake(x, a_ref[2 * u], ia_ref[2 * u])
        h_ref[:, HALO:HALO + L] = h.astype(jnp.bfloat16)
        # 7 accumulating dots reading bf16 taps straight from the scratch
        # (no materialized im2col strip).  Block-diagonal weights handle the
        # G batched sequences in a single (GC,GC)@(GC,L) dot per tap.
        y = jnp.dot(w7_ref[u, 0], h_ref[:, HALO - p:HALO - p + L],
                    preferred_element_type=jnp.float32)
        for k in range(1, 7):
            off = HALO - p + k * d
            y = y + jnp.dot(w7_ref[u, k], h_ref[:, off:off + L],
                            preferred_element_type=jnp.float32)
        y = y + b7_ref[u]
        y = _snake(y, a_ref[2 * u + 1], ia_ref[2 * u + 1])
        # 1x1 conv kept in f32 (better accuracy, MXU has huge slack here).
        y = jnp.dot(w1_ref[u], y, preferred_element_type=jnp.float32) + b1_ref[u]
        # conv output length == input length, so the residual crop is a no-op
        x = x + y

    # --- final Snake1d + WNConv1d(8 -> 16, k=2, stride=1, pad=1), fused ---
    h = _snake(x, a_ref[6], ia_ref[6])
    h_ref[:, HALO:HALO + L] = h.astype(jnp.bfloat16)
    out = (jnp.dot(wf_ref[0], h_ref[:, HALO - 1:HALO - 1 + Lout_pad],
                   preferred_element_type=jnp.float32)
           + jnp.dot(wf_ref[1], h_ref[:, HALO:HALO + Lout_pad],
                     preferred_element_type=jnp.float32)
           + bf_ref[...])                              # (G*DIM, Lout_pad) f32
    # Dense lane-aligned stores, one per batch element in this step.
    for g in range(G):
        o_ref[g] = out[g * DIM_out:(g + 1) * DIM_out]


# ----------------------- host-side parameter packing -------------------------
def _pack_params(raw, G):
    """Fold weight_norm'd weights into kernel-friendly, block-diagonal layouts."""
    eye_g = jnp.eye(G, dtype=jnp.float32)

    def tile_rows(v):                    # (C,) -> (G*C, 1), row g*C+c <- v[c]
        return jnp.tile(v, (G,)).reshape(G * v.shape[0], 1)

    alphas = jnp.stack([tile_rows(a) for a in
                        (raw["alpha1"][0], raw["alpha2"][0],
                         raw["alpha1"][1], raw["alpha2"][1],
                         raw["alpha1"][2], raw["alpha2"][2],
                         raw["alpha_f"])])                       # (7, G*CIN, 1)
    inv_alphas = 1.0 / (alphas + EPS)                            # host reciprocal

    # dilated k=7 convs: one block-diagonal (G*8, G*8) bf16 weight per tap
    w7 = jnp.stack([
        jnp.stack([jnp.kron(eye_g, raw["W7"][u][:, :, k]) for k in range(7)])
        for u in range(3)]).astype(jnp.bfloat16)                 # (3, 7, GC, GC)
    b7 = jnp.stack([tile_rows(raw["b7"][u]) for u in range(3)])  # (3, GC, 1)

    # 1x1 convs stay f32
    w1 = jnp.stack([jnp.kron(eye_g, raw["W1"][u][:, :, 0])
                    for u in range(3)])                          # (3, GC, GC) f32
    b1 = jnp.stack([tile_rows(raw["b1"][u]) for u in range(3)])  # (3, GC, 1)

    # final k=2 conv (8 -> 16): block-diagonal (G*16, G*8) bf16 per tap
    wf = jnp.stack([jnp.kron(eye_g, raw["Wf"][:, :, k])
                    for k in range(2)]).astype(jnp.bfloat16)     # (2, G*DIM, GC)
    bf = tile_rows(raw["bf"])                                    # (G*DIM, 1)
    return (alphas, inv_alphas, w7, b7, w1, b1, wf, bf)


def encoder_block(x, raw):
    """x: (B, 8, L) f32 -> (B, 16, L+1) f32."""
    B, C, L = x.shape
    assert C == CIN
    G = 2 if (B % 2 == 0) else 1          # batch elements per grid step
    Lout = L + 1                          # stride=1: k=2, pad=1
    Lout_pad = ((Lout + 127) // 128) * 128
    # Final-conv taps read scratch up to lane HALO - 1 + Lout_pad - 1.
    assert Lout_pad - L <= RPAD and 27 <= RPAD and 27 <= HALO
    Lpad_scratch = HALO + L + RPAD
    GC = G * CIN

    packed = _pack_params(raw, G)

    def const_spec(p):                    # weights stay resident, no re-DMA
        return pl.BlockSpec(p.shape, lambda i, _nd=p.ndim: (0,) * _nd)

    y = pl.pallas_call(
        encoder_block_kernel,
        out_shape=jax.ShapeDtypeStruct((B, DIM, Lout_pad), jnp.float32),
        grid_spec=pltpu.PrefetchScalarGridSpec(
            num_scalar_prefetch=0,
            grid=(B // G,),
            in_specs=[pl.BlockSpec((G, CIN, L), lambda i: (i, 0, 0))]
                     + [const_spec(p) for p in packed],
            out_specs=pl.BlockSpec((G, DIM, Lout_pad), lambda i: (i, 0, 0)),
            scratch_shapes=[pltpu.VMEM((GC, Lpad_scratch), jnp.bfloat16)]),
        compiler_params=pltpu.CompilerParams(
            dimension_semantics=("parallel",),
            vmem_limit_bytes=32 * 1024 * 1024),
    )(x, *packed)
    # Padded columns >= Lout contain only the broadcast bias; slice them off.
    return y[:, :, :Lout]


# ----------------------- parameter construction (glue) -----------------------
def init_params(key):
    keys = iter(jax.random.split(key, 32))

    def wn_conv(cout, cin, ksz):
        # weight_norm(Conv1d): W = g * v / ||v||  (norm over dims 1,2 per out-ch)
        v = 0.2 * jax.random.normal(next(keys), (cout, cin, ksz), jnp.float32)
        norm = jnp.sqrt(jnp.sum(v * v, axis=(1, 2), keepdims=True))
        g = norm * (0.8 + 0.4 * jax.random.uniform(next(keys), (cout, 1, 1),
                                                   jnp.float32))
        w = g * v / norm
        b = 0.1 * jax.random.normal(next(keys), (cout,), jnp.float32)
        return w, b

    alpha1, alpha2, W7, b7, W1, b1 = [], [], [], [], [], []
    for _d in (1, 3, 9):
        alpha1.append(1.0 + 0.1 * jax.random.normal(next(keys), (CIN,), jnp.float32))
        w, b = wn_conv(CIN, CIN, 7); W7.append(w); b7.append(b)
        alpha2.append(1.0 + 0.1 * jax.random.normal(next(keys), (CIN,), jnp.float32))
        w, b = wn_conv(CIN, CIN, 1); W1.append(w); b1.append(b)
    alpha_f = 1.0 + 0.1 * jax.random.normal(next(keys), (CIN,), jnp.float32)
    Wf, bf = wn_conv(DIM, CIN, 2 * STRIDE)

    return dict(alpha1=alpha1, alpha2=alpha2, W7=W7, b7=b7, W1=W1, b1=b1,
                alpha_f=alpha_f, Wf=Wf, bf=bf)


# ----------------------- pure-JAX reference for checking ---------------------
def _conv1d_ref(x, w, b, stride=1, padding=0, dilation=1):
    y = jax.lax.conv_general_dilated(
        x, w, window_strides=(stride,), padding=[(padding, padding)],
        rhs_dilation=(dilation,), dimension_numbers=("NCH", "OIH", "NCH"))
    return y + b[None, :, None]


def _snake_ref(x, alpha):
    a = alpha[None, :, None]
    return x + (1.0 / (a + EPS)) * jnp.sin(a * x) ** 2


def encoder_block_ref(x, raw):
    for u, d in enumerate((1, 3, 9)):
        h = _snake_ref(x, raw["alpha1"][u])
        h = _conv1d_ref(h, raw["W7"][u], raw["b7"][u], padding=3 * d, dilation=d)
        h = _snake_ref(h, raw["alpha2"][u])
        h = _conv1d_ref(h, raw["W1"][u], raw["b1"][u])
        x = x + h
    h = _snake_ref(x, raw["alpha_f"])
    return _conv1d_ref(h, raw["Wf"], raw["bf"],
                       stride=STRIDE, padding=math.ceil(STRIDE / 2))


if __name__ == "__main__":
    B, L = 2, 32
    key = jax.random.PRNGKey(0)
    kx, kp = jax.random.split(key)
    x = jax.random.normal(kx, (B, CIN, L), jnp.float32)
    raw = init_params(kp)

    y = encoder_block(x, raw)
    y = jax.block_until_ready(y)

    y_ref = encoder_block_ref(x, raw)
    # bf16 MXU operands on the dilated-conv path (f32 accumulation) -> slightly
    # looser tolerance than the pure-f32 reference.
    np.testing.assert_allclose(np.asarray(y), np.asarray(y_ref),
                               rtol=5e-2, atol=5e-2)
    print("KERNEL_OK")
</pallas_src>

<mosaic_0001>
module attributes {stable_mosaic.version = 11 : i64} {
  func.func @encoder_block_kernel(%arg0: i32, %arg1: memref<2x8x32xf32, #tpu.memory_space<vmem>>, %arg2: memref<7x16x1xf32, #tpu.memory_space<vmem>>, %arg3: memref<7x16x1xf32, #tpu.memory_space<vmem>>, %arg4: memref<3x7x16x16xbf16, #tpu.memory_space<vmem>>, %arg5: memref<3x16x1xf32, #tpu.memory_space<vmem>>, %arg6: memref<3x16x16xf32, #tpu.memory_space<vmem>>, %arg7: memref<3x16x1xf32, #tpu.memory_space<vmem>>, %arg8: memref<2x32x16xbf16, #tpu.memory_space<vmem>>, %arg9: memref<32x1xf32, #tpu.memory_space<vmem>>, %arg10: memref<2x16x128xf32, #tpu.memory_space<vmem>>, %arg11: memref<16x288xbf16, #tpu.memory_space<vmem>>) attributes {dimension_semantics = [#tpu.dimension_semantics<parallel>], iteration_bounds = array<i64: 1>, scalar_prefetch = 0 : i64, scratch_operands = 1 : i64, tpu.core_type = #tpu.core_type<tc>, window_params = [{transform_indices = @transform_0, window_bounds = array<i64: 2, 8, 32>}, {pipeline_mode = #tpu.pipeline_mode<synchronous>, transform_indices = @transform_1, window_bounds = array<i64: 7, 16, 1>}, {pipeline_mode = #tpu.pipeline_mode<synchronous>, transform_indices = @transform_2, window_bounds = array<i64: 7, 16, 1>}, {pipeline_mode = #tpu.pipeline_mode<synchronous>, transform_indices = @transform_3, window_bounds = array<i64: 3, 7, 16, 16>}, {pipeline_mode = #tpu.pipeline_mode<synchronous>, transform_indices = @transform_4, window_bounds = array<i64: 3, 16, 1>}, {pipeline_mode = #tpu.pipeline_mode<synchronous>, transform_indices = @transform_5, window_bounds = array<i64: 3, 16, 16>}, {pipeline_mode = #tpu.pipeline_mode<synchronous>, transform_indices = @transform_6, window_bounds = array<i64: 3, 16, 1>}, {pipeline_mode = #tpu.pipeline_mode<synchronous>, transform_indices = @transform_7, window_bounds = array<i64: 2, 32, 16>}, {pipeline_mode = #tpu.pipeline_mode<synchronous>, transform_indices = @transform_8, window_bounds = array<i64: 32, 1>}, {transform_indices = @transform_9, window_bounds = array<i64: 2, 16, 128>}]} {
    %cst = arith.constant 0.000000e+00 : bf16
    %0 = vector.broadcast %cst : bf16 to vector<16x128xbf16>
    %c0 = arith.constant 0 : index
    %c0_0 = arith.constant 0 : index
    %1 = vector.load %arg11[%c0, %c0_0] : memref<16x288xbf16, #tpu.memory_space<vmem>>, vector<16x128xbf16>
    tpu.vector_store %arg11[%c0, %c0_0], %0 {strides = array<i32>} : memref<16x288xbf16, #tpu.memory_space<vmem>>, vector<16x128xbf16>,
    %cst_1 = arith.constant 0.000000e+00 : bf16
    %2 = vector.broadcast %cst_1 : bf16 to vector<16x128xbf16>
    %c0_2 = arith.constant 0 : index
    %c160 = arith.constant 160 : index
    %3 = vector.load %arg11[%c0_2, %c160] : memref<16x288xbf16, #tpu.memory_space<vmem>>, vector<16x128xbf16>
    tpu.vector_store %arg11[%c0_2, %c160], %2 {strides = array<i32>} : memref<16x288xbf16, #tpu.memory_space<vmem>>, vector<16x128xbf16>,
    %c0_3 = arith.constant 0 : index
    %c0_4 = arith.constant 0 : index
    %c0_5 = arith.constant 0 : index
    %4 = vector.load %arg1[%c0_3, %c0_4, %c0_5] : memref<2x8x32xf32, #tpu.memory_space<vmem>>, vector<1x8x32xf32>
    %5 = vector.shape_cast %4 : vector<1x8x32xf32> to vector<8x32xf32>
    %c1 = arith.constant 1 : index
    %c0_6 = arith.constant 0 : index
    %c0_7 = arith.constant 0 : index
    %6 = vector.load %arg1[%c1, %c0_6, %c0_7] : memref<2x8x32xf32, #tpu.memory_space<vmem>>, vector<1x8x32xf32>
    %7 = vector.shape_cast %6 : vector<1x8x32xf32> to vector<8x32xf32>
    %8 = tpu.concatenate %5, %7 in 0 : vector<8x32xf32>, vector<8x32xf32> -> vector<16x32xf32>
    %c0_8 = arith.constant 0 : index
    %c0_9 = arith.constant 0 : index
    %c0_10 = arith.constant 0 : index
    %9 = vector.load %arg2[%c0_8, %c0_9, %c0_10] : memref<7x16x1xf32, #tpu.memory_space<vmem>>, vector<1x16x1xf32>
    %10 = vector.shape_cast %9 : vector<1x16x1xf32> to vector<16x1xf32>
    %c0_11 = arith.constant 0 : index
    %c0_12 = arith.constant 0 : index
    %c0_13 = arith.constant 0 : index
    %11 = vector.load %arg3[%c0_11, %c0_12, %c0_13] : memref<7x16x1xf32, #tpu.memory_space<vmem>>, vector<1x16x1xf32>
    %12 = vector.shape_cast %11 : vector<1x16x1xf32> to vector<16x1xf32>
    %13 = vector.broadcast %10 : vector<16x1xf32> to vector<16x32xf32>
    %14 = arith.mulf %13, %8 : vector<16x32xf32>
    %15 = math.sin %14 : vector<16x32xf32>
    %16 = arith.mulf %15, %15 : vector<16x32xf32>
    %17 = vector.broadcast %12 : vector<16x1xf32> to vector<16x32xf32>
    %18 = arith.mulf %17, %16 : vector<16x32xf32>
    %19 = arith.addf %8, %18 : vector<16x32xf32>
    %20 = arith.truncf %19 : vector<16x32xf32> to vector<16x32xbf16>
    %c0_14 = arith.constant 0 : index
    %c128 = arith.constant 128 : index
    %21 = vector.load %arg11[%c0_14, %c128] : memref<16x288xbf16, #tpu.memory_space<vmem>>, vector<16x32xbf16>
    tpu.vector_store %arg11[%c0_14, %c128], %20 {strides = array<i32>} : memref<16x288xbf16, #tpu.memory_space<vmem>>, vector<16x32xbf16>,
    %c0_15 = arith.constant 0 : index
    %c0_16 = arith.constant 0 : index
    %c0_17 = arith.constant 0 : index
    %c0_18 = arith.constant 0 : index
    %22 = vector.load %arg4[%c0_15, %c0_16, %c0_17, %c0_18] : memref<3x7x16x16xbf16, #tpu.memory_space<vmem>>, vector<1x1x16x16xbf16>
    %23 = vector.shape_cast %22 : vector<1x1x16x16xbf16> to vector<16x16xbf16>
    %c0_19 = arith.constant 0 : index
    %c125 = arith.constant 125 : index
    %24 = vector.load %arg11[%c0_19, %c125] : memref<16x288xbf16, #tpu.memory_space<vmem>>, vector<16x32xbf16>
    %cst_20 = arith.constant dense<0.000000e+00> : vector<16x32xf32>
    %25 = tpu.matmul %23, %24, %cst_20 {dimension_numbers = #tpu.dot_dimension_numbers<[1], [0], [0], [1], [0, 0, 1, 1], [], []>} : vector<16x16xbf16>, vector<16x32xbf16>, vector<16x32xf32> -> vector<16x32xf32>
    %c0_21 = arith.constant 0 : index
    %c1_22 = arith.constant 1 : index
    %c0_23 = arith.constant 0 : index
    %c0_24 = arith.constant 0 : index
    %26 = vector.load %arg4[%c0_21, %c1_22, %c0_23, %c0_24] : memref<3x7x16x16xbf16, #tpu.memory_space<vmem>>, vector<1x1x16x16xbf16>
    %27 = vector.shape_cast %26 : vector<1x1x16x16xbf16> to vector<16x16xbf16>
    %c0_25 = arith.constant 0 : index
    %c126 = arith.constant 126 : index
    %28 = vector.load %arg11[%c0_25, %c126] : memref<16x288xbf16, #tpu.memory_space<vmem>>, vector<16x32xbf16>
    %cst_26 = arith.constant dense<0.000000e+00> : vector<16x32xf32>
    %29 = tpu.matmul %27, %28, %cst_26 {dimension_numbers = #tpu.dot_dimension_numbers<[1], [0], [0], [1], [0, 0, 1, 1], [], []>} : vector<16x16xbf16>, vector<16x32xbf16>, vector<16x32xf32> -> vector<16x32xf32>
    %30 = arith.addf %25, %29 : vector<16x32xf32>
    %c0_27 = arith.constant 0 : index
    %c2 = arith.constant 2 : index
    %c0_28 = arith.constant 0 : index
    %c0_29 = arith.constant 0 : index
    %31 = vector.load %arg4[%c0_27, %c2, %c0_28, %c0_29] : memref<3x7x16x16xbf16, #tpu.memory_space<vmem>>, vector<1x1x16x16xbf16>
    %32 = vector.shape_cast %31 : vector<1x1x16x16xbf16> to vector<16x16xbf16>
    %c0_30 = arith.constant 0 : index
    %c127 = arith.constant 127 : index
    %33 = vector.load %arg11[%c0_30, %c127] : memref<16x288xbf16, #tpu.memory_space<vmem>>, vector<16x32xbf16>
    %cst_31 = arith.constant dense<0.000000e+00> : vector<16x32xf32>
    %34 = tpu.matmul %32, %33, %cst_31 {dimension_numbers = #tpu.dot_dimension_numbers<[1], [0], [0], [1], [0, 0, 1, 1], [], []>} : vector<16x16xbf16>, vector<16x32xbf16>, vector<16x32xf32> -> vector<16x32xf32>
    %35 = arith.addf %30, %34 : vector<16x32xf32>
    %c0_32 = arith.constant 0 : index
    %c3 = arith.constant 3 : index
    %c0_33 = arith.constant 0 : index
    %c0_34 = arith.constant 0 : index
    %36 = vector.load %arg4[%c0_32, %c3, %c0_33, %c0_34] : memref<3x7x16x16xbf16, #tpu.memory_space<vmem>>, vector<1x1x16x16xbf16>
    %37 = vector.shape_cast %36 : vector<1x1x16x16xbf16> to vector<16x16xbf16>
    %c0_35 = arith.constant 0 : index
    %c128_36 = arith.constant 128 : index
    %38 = vector.load %arg11[%c0_35, %c128_36] : memref<16x288xbf16, #tpu.memory_space<vmem>>, vector<16x32xbf16>
    %cst_37 = arith.constant dense<0.000000e+00> : vector<16x32xf32>
    %39 = tpu.matmul %37, %38, %cst_37 {dimension_numbers = #tpu.dot_dimension_numbers<[1], [0], [0], [1], [0, 0, 1, 1], [], []>} : vector<16x16xbf16>, vector<16x32xbf16>, vector<16x32xf32> -> vector<16x32xf32>
    %40 = arith.addf %35, %39 : vector<16x32xf32>
    %c0_38 = arith.constant 0 : index
    %c4 = arith.constant 4 : index
    %c0_39 = arith.constant 0 : index
    %c0_40 = arith.constant 0 : index
    %41 = vector.load %arg4[%c0_38, %c4, %c0_39, %c0_40] : memref<3x7x16x16xbf16, #tpu.memory_space<vmem>>, vector<1x1x16x16xbf16>
    %42 = vector.shape_cast %41 : vector<1x1x16x16xbf16> to vector<16x16xbf16>
    %c0_41 = arith.constant 0 : index
    %c129 = arith.constant 129 : index
    %43 = vector.load %arg11[%c0_41, %c129] : memref<16x288xbf16, #tpu.memory_space<vmem>>, vector<16x32xbf16>
    %cst_42 = arith.constant dense<0.000000e+00> : vector<16x32xf32>
    %44 = tpu.matmul %42, %43, %cst_42 {dimension_numbers = #tpu.dot_dimension_numbers<[1], [0], [0], [1], [0, 0, 1, 1], [], []>} : vector<16x16xbf16>, vector<16x32xbf16>, vector<16x32xf32> -> vector<16x32xf32>
    %45 = arith.addf %40, %44 : vector<16x32xf32>
    %c0_43 = arith.constant 0 : index
    %c5 = arith.constant 5 : index
    %c0_44 = arith.constant 0 : index
    %c0_45 = arith.constant 0 : index
    %46 = vector.load %arg4[%c0_43, %c5, %c0_44, %c0_45] : memref<3x7x16x16xbf16, #tpu.memory_space<vmem>>, vector<1x1x16x16xbf16>
    %47 = vector.shape_cast %46 : vector<1x1x16x16xbf16> to vector<16x16xbf16>
    %c0_46 = arith.constant 0 : index
    %c130 = arith.constant 130 : index
    %48 = vector.load %arg11[%c0_46, %c130] : memref<16x288xbf16, #tpu.memory_space<vmem>>, vector<16x32xbf16>
    %cst_47 = arith.constant dense<0.000000e+00> : vector<16x32xf32>
    %49 = tpu.matmul %47, %48, %cst_47 {dimension_numbers = #tpu.dot_dimension_numbers<[1], [0], [0], [1], [0, 0, 1, 1], [], []>} : vector<16x16xbf16>, vector<16x32xbf16>, vector<16x32xf32> -> vector<16x32xf32>
    %50 = arith.addf %45, %49 : vector<16x32xf32>
    %c0_48 = arith.constant 0 : index
    %c6 = arith.constant 6 : index
    %c0_49 = arith.constant 0 : index
    %c0_50 = arith.constant 0 : index
    %51 = vector.load %arg4[%c0_48, %c6, %c0_49, %c0_50] : memref<3x7x16x16xbf16, #tpu.memory_space<vmem>>, vector<1x1x16x16xbf16>
    %52 = vector.shape_cast %51 : vector<1x1x16x16xbf16> to vector<16x16xbf16>
    %c0_51 = arith.constant 0 : index
    %c131 = arith.constant 131 : index
    %53 = vector.load %arg11[%c0_51, %c131] : memref<16x288xbf16, #tpu.memory_space<vmem>>, vector<16x32xbf16>
    %cst_52 = arith.constant dense<0.000000e+00> : vector<16x32xf32>
    %54 = tpu.matmul %52, %53, %cst_52 {dimension_numbers = #tpu.dot_dimension_numbers<[1], [0], [0], [1], [0, 0, 1, 1], [], []>} : vector<16x16xbf16>, vector<16x32xbf16>, vector<16x32xf32> -> vector<16x32xf32>
    %55 = arith.addf %50, %54 : vector<16x32xf32>
    %c0_53 = arith.constant 0 : index
    %c0_54 = arith.constant 0 : index
    %c0_55 = arith.constant 0 : index
    %56 = vector.load %arg5[%c0_53, %c0_54, %c0_55] : memref<3x16x1xf32, #tpu.memory_space<vmem>>, vector<1x16x1xf32>
    %57 = vector.shape_cast %56 : vector<1x16x1xf32> to vector<16x1xf32>
    %58 = vector.broadcast %57 : vector<16x1xf32> to vector<16x32xf32>
    %59 = arith.addf %55, %58 : vector<16x32xf32>
    %c1_56 = arith.constant 1 : index
    %c0_57 = arith.constant 0 : index
    %c0_58 = arith.constant 0 : index
    %60 = vector.load %arg2[%c1_56, %c0_57, %c0_58] : memref<7x16x1xf32, #tpu.memory_space<vmem>>, vector<1x16x1xf32>
    %61 = vector.shape_cast %60 : vector<1x16x1xf32> to vector<16x1xf32>
    %c1_59 = arith.constant 1 : index
    %c0_60 = arith.constant 0 : index
    %c0_61 = arith.constant 0 : index
    %62 = vector.load %arg3[%c1_59, %c0_60, %c0_61] : memref<7x16x1xf32, #tpu.memory_space<vmem>>, vector<1x16x1xf32>
    %63 = vector.shape_cast %62 : vector<1x16x1xf32> to vector<16x1xf32>
    %64 = vector.broadcast %61 : vector<16x1xf32> to vector<16x32xf32>
    %65 = arith.mulf %64, %59 : vector<16x32xf32>
    %66 = math.sin %65 : vector<16x32xf32>
    %67 = arith.mulf %66, %66 : vector<16x32xf32>
    %68 = vector.broadcast %63 : vector<16x1xf32> to vector<16x32xf32>
    %69 = arith.mulf %68, %67 : vector<16x32xf32>
    %70 = arith.addf %59, %69 : vector<16x32xf32>
    %c0_62 = arith.constant 0 : index
    %c0_63 = arith.constant 0 : index
    %c0_64 = arith.constant 0 : index
    %71 = vector.load %arg6[%c0_62, %c0_63, %c0_64] : memref<3x16x16xf32, #tpu.memory_space<vmem>>, vector<1x16x16xf32>
    %72 = vector.shape_cast %71 : vector<1x16x16xf32> to vector<16x16xf32>
    %cst_65 = arith.constant dense<0.000000e+00> : vector<16x32xf32>
    %73 = tpu.matmul %72, %70, %cst_65 {dimension_numbers = #tpu.dot_dimension_numbers<[1], [0], [0], [1], [0, 0, 1, 1], [], []>} : vector<16x16xf32>, vector<16x32xf32>, vector<16x32xf32> -> vector<16x32xf32>
    %c0_66 = arith.constant 0 : index
    %c0_67 = arith.constant 0 : index
    %c0_68 = arith.constant 0 : index
    %74 = vector.load %arg7[%c0_66, %c0_67, %c0_68] : memref<3x16x1xf32, #tpu.memory_space<vmem>>, vector<1x16x1xf32>
    %75 = vector.shape_cast %74 : vector<1x16x1xf32> to vector<16x1xf32>
    %76 = vector.broadcast %75 : vector<16x1xf32> to vector<16x32xf32>
    %77 = arith.addf %73, %76 : vector<16x32xf32>
    %78 = arith.addf %8, %77 : vector<16x32xf32>
    %c2_69 = arith.constant 2 : index
    %c0_70 = arith.constant 0 : index
    %c0_71 = arith.constant 0 : index
    %79 = vector.load %arg2[%c2_69, %c0_70, %c0_71] : memref<7x16x1xf32, #tpu.memory_space<vmem>>, vector<1x16x1xf32>
    %80 = vector.shape_cast %79 : vector<1x16x1xf32> to vector<16x1xf32>
    %c2_72 = arith.constant 2 : index
    %c0_73 = arith.constant 0 : index
    %c0_74 = arith.constant 0 : index
    %81 = vector.load %arg3[%c2_72, %c0_73, %c0_74] : memref<7x16x1xf32, #tpu.memory_space<vmem>>, vector<1x16x1xf32>
    %82 = vector.shape_cast %81 : vector<1x16x1xf32> to vector<16x1xf32>
    %83 = vector.broadcast %80 : vector<16x1xf32> to vector<16x32xf32>
    %84 = arith.mulf %83, %78 : vector<16x32xf32>
    %85 = math.sin %84 : vector<16x32xf32>
    %86 = arith.mulf %85, %85 : vector<16x32xf32>
    %87 = vector.broadcast %82 : vector<16x1xf32> to vector<16x32xf32>
    %88 = arith.mulf %87, %86 : vector<16x32xf32>
    %89 = arith.addf %78, %88 : vector<16x32xf32>
    %90 = arith.truncf %89 : vector<16x32xf32> to vector<16x32xbf16>
    %c0_75 = arith.constant 0 : index
    %c128_76 = arith.constant 128 : index
    %91 = vector.load %arg11[%c0_75, %c128_76] : memref<16x288xbf16, #tpu.memory_space<vmem>>, vector<16x32xbf16>
    tpu.vector_store %arg11[%c0_75, %c128_76], %90 {strides = array<i32>} : memref<16x288xbf16, #tpu.memory_space<vmem>>, vector<16x32xbf16>,
    %c1_77 = arith.constant 1 : index
    %c0_78 = arith.constant 0 : index
    %c0_79 = arith.constant 0 : index
    %c0_80 = arith.constant 0 : index
    %92 = vector.load %arg4[%c1_77, %c0_78, %c0_79, %c0_80] : memref<3x7x16x16xbf16, #tpu.memory_space<vmem>>, vector<1x1x16x16xbf16>
    %93 = vector.shape_cast %92 : vector<1x1x16x16xbf16> to vector<16x16xbf16>
    %c0_81 = arith.constant 0 : index
    %c119 = arith.constant 119 : index
    %94 = vector.load %arg11[%c0_81, %c119] : memref<16x288xbf16, #tpu.memory_space<vmem>>, vector<16x32xbf16>
    %cst_82 = arith.constant dense<0.000000e+00> : vector<16x32xf32>
    %95 = tpu.matmul %93, %94, %cst_82 {dimension_numbers = #tpu.dot_dimension_numbers<[1], [0], [0], [1], [0, 0, 1, 1], [], []>} : vector<16x16xbf16>, vector<16x32xbf16>, vector<16x32xf32> -> vector<16x32xf32>
    %c1_83 = arith.constant 1 : index
    %c1_84 = arith.constant 1 : index
    %c0_85 = arith.constant 0 : index
    %c0_86 = arith.constant 0 : index
    %96 = vector.load %arg4[%c1_83, %c1_84, %c0_85, %c0_86] : memref<3x7x16x16xbf16, #tpu.memory_space<vmem>>, vector<1x1x16x16xbf16>
    %97 = vector.shape_cast %96 : vector<1x1x16x16xbf16> to vector<16x16xbf16>
    %c0_87 = arith.constant 0 : index
    %c122 = arith.constant 122 : index
    %98 = vector.load %arg11[%c0_87, %c122] : memref<16x288xbf16, #tpu.memory_space<vmem>>, vector<16x32xbf16>
    %cst_88 = arith.constant dense<0.000000e+00> : vector<16x32xf32>
    %99 = tpu.matmul %97, %98, %cst_88 {dimension_numbers = #tpu.dot_dimension_numbers<[1], [0], [0], [1], [0, 0, 1, 1], [], []>} : vector<16x16xbf16>, vector<16x32xbf16>, vector<16x32xf32> -> vector<16x32xf32>
    %100 = arith.addf %95, %99 : vector<16x32xf32>
    %c1_89 = arith.constant 1 : index
    %c2_90 = arith.constant 2 : index
    %c0_91 = arith.constant 0 : index
    %c0_92 = arith.constant 0 : index
    %101 = vector.load %arg4[%c1_89, %c2_90, %c0_91, %c0_92] : memref<3x7x16x16xbf16, #tpu.memory_space<vmem>>, vector<1x1x16x16xbf16>
    %102 = vector.shape_cast %101 : vector<1x1x16x16xbf16> to vector<16x16xbf16>
    %c0_93 = arith.constant 0 : index
    %c125_94 = arith.constant 125 : index
    %103 = vector.load %arg11[%c0_93, %c125_94] : memref<16x288xbf16, #tpu.memory_space<vmem>>, vector<16x32xbf16>
    %cst_95 = arith.constant dense<0.000000e+00> : vector<16x32xf32>
    %104 = tpu.matmul %102, %103, %cst_95 {dimension_numbers = #tpu.dot_dimension_numbers<[1], [0], [0], [1], [0, 0, 1, 1], [], []>} : vector<16x16xbf16>, vector<16x32xbf16>, vector<16x32xf32> -> vector<16x32xf32>
    %105 = arith.addf %100, %104 : vector<16x32xf32>
    %c1_96 = arith.constant 1 : index
    %c3_97 = arith.constant 3 : index
    %c0_98 = arith.constant 0 : index
    %c0_99 = arith.constant 0 : index
    %106 = vector.load %arg4[%c1_96, %c3_97, %c0_98, %c0_99] : memref<3x7x16x16xbf16, #tpu.memory_space<vmem>>, vector<1x1x16x16xbf16>
    %107 = vector.shape_cast %106 : vector<1x1x16x16xbf16> to vector<16x16xbf16>
    %c0_100 = arith.constant 0 : index
    %c128_101 = arith.constant 128 : index
    %108 = vector.load %arg11[%c0_100, %c128_101] : memref<16x288xbf16, #tpu.memory_space<vmem>>, vector<16x32xbf16>
    %cst_102 = arith.constant dense<0.000000e+00> : vector<16x32xf32>
    %109 = tpu.matmul %107, %108, %cst_102 {dimension_numbers = #tpu.dot_dimension_numbers<[1], [0], [0], [1], [0, 0, 1, 1], [], []>} : vector<16x16xbf16>, vector<16x32xbf16>, vector<16x32xf32> -> vector<16x32xf32>
    %110 = arith.addf %105, %109 : vector<16x32xf32>
    %c1_103 = arith.constant 1 : index
    %c4_104 = arith.constant 4 : index
    %c0_105 = arith.constant 0 : index
    %c0_106 = arith.constant 0 : index
    %111 = vector.load %arg4[%c1_103, %c4_104, %c0_105, %c0_106] : memref<3x7x16x16xbf16, #tpu.memory_space<vmem>>, vector<1x1x16x16xbf16>
    %112 = vector.shape_cast %111 : vector<1x1x16x16xbf16> to vector<16x16xbf16>
    %c0_107 = arith.constant 0 : index
    %c131_108 = arith.constant 131 : index
    %113 = vector.load %arg11[%c0_107, %c131_108] : memref<16x288xbf16, #tpu.memory_space<vmem>>, vector<16x32xbf16>
    %cst_109 = arith.constant dense<0.000000e+00> : vector<16x32xf32>
    %114 = tpu.matmul %112, %113, %cst_109 {dimension_numbers = #tpu.dot_dimension_numbers<[1], [0], [0], [1], [0, 0, 1, 1], [], []>} : vector<16x16xbf16>, vector<16x32xbf16>, vector<16x32xf32> -> vector<16x32xf32>
    %115 = arith.addf %110, %114 : vector<16x32xf32>
    %c1_110 = arith.constant 1 : index
    %c5_111 = arith.constant 5 : index
    %c0_112 = arith.constant 0 : index
    %c0_113 = arith.constant 0 : index
    %116 = vector.load %arg4[%c1_110, %c5_111, %c0_112, %c0_113] : memref<3x7x16x16xbf16, #tpu.memory_space<vmem>>, vector<1x1x16x16xbf16>
    %117 = vector.shape_cast %116 : vector<1x1x16x16xbf16> to vector<16x16xbf16>
    %c0_114 = arith.constant 0 : index
    %c134 = arith.constant 134 : index
    %118 = vector.load %arg11[%c0_114, %c134] : memref<16x288xbf16, #tpu.memory_space<vmem>>, vector<16x32xbf16>
    %cst_115 = arith.constant dense<0.000000e+00> : vector<16x32xf32>
    %119 = tpu.matmul %117, %118, %cst_115 {dimension_numbers = #tpu.dot_dimension_numbers<[1], [0], [0], [1], [0, 0, 1, 1], [], []>} : vector<16x16xbf16>, vector<16x32xbf16>, vector<16x32xf32> -> vector<16x32xf32>
    %120 = arith.addf %115, %119 : vector<16x32xf32>
    %c1_116 = arith.constant 1 : index
    %c6_117 = arith.constant 6 : index
    %c0_118 = arith.constant 0 : index
    %c0_119 = arith.constant 0 : index
    %121 = vector.load %arg4[%c1_116, %c6_117, %c0_118, %c0_119] : memref<3x7x16x16xbf16, #tpu.memory_space<vmem>>, vector<1x1x16x16xbf16>
    %122 = vector.shape_cast %121 : vector<1x1x16x16xbf16> to vector<16x16xbf16>
    %c0_120 = arith.constant 0 : index
    %c137 = arith.constant 137 : index
    %123 = vector.load %arg11[%c0_120, %c137] : memref<16x288xbf16, #tpu.memory_space<vmem>>, vector<16x32xbf16>
    %cst_121 = arith.constant dense<0.000000e+00> : vector<16x32xf32>
    %124 = tpu.matmul %122, %123, %cst_121 {dimension_numbers = #tpu.dot_dimension_numbers<[1], [0], [0], [1], [0, 0, 1, 1], [], []>} : vector<16x16xbf16>, vector<16x32xbf16>, vector<16x32xf32> -> vector<16x32xf32>
    %125 = arith.addf %120, %124 : vector<16x32xf32>
    %c1_122 = arith.constant 1 : index
    %c0_123 = arith.constant 0 : index
    %c0_124 = arith.constant 0 : index
    %126 = vector.load %arg5[%c1_122, %c0_123, %c0_124] : memref<3x16x1xf32, #tpu.memory_space<vmem>>, vector<1x16x1xf32>
    %127 = vector.shape_cast %126 : vector<1x16x1xf32> to vector<16x1xf32>
    %128 = vector.broadcast %127 : vector<16x1xf32> to vector<16x32xf32>
    %129 = arith.addf %125, %128 : vector<16x32xf32>
    %c3_125 = arith.constant 3 : index
    %c0_126 = arith.constant 0 : index
    %c0_127 = arith.constant 0 : index
    %130 = vector.load %arg2[%c3_125, %c0_126, %c0_127] : memref<7x16x1xf32, #tpu.memory_space<vmem>>, vector<1x16x1xf32>
    %131 = vector.shape_cast %130 : vector<1x16x1xf32> to vector<16x1xf32>
    %c3_128 = arith.constant 3 : index
    %c0_129 = arith.constant 0 : index
    %c0_130 = arith.constant 0 : index
    %132 = vector.load %arg3[%c3_128, %c0_129, %c0_130] : memref<7x16x1xf32, #tpu.memory_space<vmem>>, vector<1x16x1xf32>
    %133 = vector.shape_cast %132 : vector<1x16x1xf32> to vector<16x1xf32>
    %134 = vector.broadcast %131 : vector<16x1xf32> to vector<16x32xf32>
    %135 = arith.mulf %134, %129 : vector<16x32xf32>
    %136 = math.sin %135 : vector<16x32xf32>
    %137 = arith.mulf %136, %136 : vector<16x32xf32>
    %138 = vector.broadcast %133 : vector<16x1xf32> to vector<16x32xf32>
    %139 = arith.mulf %138, %137 : vector<16x32xf32>
    %140 = arith.addf %129, %139 : vector<16x32xf32>
    %c1_131 = arith.constant 1 : index
    %c0_132 = arith.constant 0 : index
    %c0_133 = arith.constant 0 : index
    %141 = vector.load %arg6[%c1_131, %c0_132, %c0_133] : memref<3x16x16xf32, #tpu.memory_space<vmem>>, vector<1x16x16xf32>
    %142 = vector.shape_cast %141 : vector<1x16x16xf32> to vector<16x16xf32>
    %cst_134 = arith.constant dense<0.000000e+00> : vector<16x32xf32>
    %143 = tpu.matmul %142, %140, %cst_134 {dimension_numbers = #tpu.dot_dimension_numbers<[1], [0], [0], [1], [0, 0, 1, 1], [], []>} : vector<16x16xf32>, vector<16x32xf32>, vector<16x32xf32> -> vector<16x32xf32>
    %c1_135 = arith.constant 1 : index
    %c0_136 = arith.constant 0 : index
    %c0_137 = arith.constant 0 : index
    %144 = vector.load %arg7[%c1_135, %c0_136, %c0_137] : memref<3x16x1xf32, #tpu.memory_space<vmem>>, vector<1x16x1xf32>
    %145 = vector.shape_cast %144 : vector<1x16x1xf32> to vector<16x1xf32>
    %146 = vector.broadcast %145 : vector<16x1xf32> to vector<16x32xf32>
    %147 = arith.addf %143, %146 : vector<16x32xf32>
    %148 = arith.addf %78, %147 : vector<16x32xf32>
    %c4_138 = arith.constant 4 : index
    %c0_139 = arith.constant 0 : index
    %c0_140 = arith.constant 0 : index
    %149 = vector.load %arg2[%c4_138, %c0_139, %c0_140] : memref<7x16x1xf32, #tpu.memory_space<vmem>>, vector<1x16x1xf32>
    %150 = vector.shape_cast %149 : vector<1x16x1xf32> to vector<16x1xf32>
    %c4_141 = arith.constant 4 : index
    %c0_142 = arith.constant 0 : index
    %c0_143 = arith.constant 0 : index
    %151 = vector.load %arg3[%c4_141, %c0_142, %c0_143] : memref<7x16x1xf32, #tpu.memory_space<vmem>>, vector<1x16x1xf32>
    %152 = vector.shape_cast %151 : vector<1x16x1xf32> to vector<16x1xf32>
    %153 = vector.broadcast %150 : vector<16x1xf32> to vector<16x32xf32>
    %154 = arith.mulf %153, %148 : vector<16x32xf32>
    %155 = math.sin %154 : vector<16x32xf32>
    %156 = arith.mulf %155, %155 : vector<16x32xf32>
    %157 = vector.broadcast %152 : vector<16x1xf32> to vector<16x32xf32>
    %158 = arith.mulf %157, %156 : vector<16x32xf32>
    %159 = arith.addf %148, %158 : vector<16x32xf32>
    %160 = arith.truncf %159 : vector<16x32xf32> to vector<16x32xbf16>
    %c0_144 = arith.constant 0 : index
    %c128_145 = arith.constant 128 : index
    %161 = vector.load %arg11[%c0_144, %c128_145] : memref<16x288xbf16, #tpu.memory_space<vmem>>, vector<16x32xbf16>
    tpu.vector_store %arg11[%c0_144, %c128_145], %160 {strides = array<i32>} : memref<16x288xbf16, #tpu.memory_space<vmem>>, vector<16x32xbf16>,
    %c2_146 = arith.constant 2 : index
    %c0_147 = arith.constant 0 : index
    %c0_148 = arith.constant 0 : index
    %c0_149 = arith.constant 0 : index
    %162 = vector.load %arg4[%c2_146, %c0_147, %c0_148, %c0_149] : memref<3x7x16x16xbf16, #tpu.memory_space<vmem>>, vector<1x1x16x16xbf16>
    %163 = vector.shape_cast %162 : vector<1x1x16x16xbf16> to vector<16x16xbf16>
    %c0_150 = arith.constant 0 : index
    %c101 = arith.constant 101 : index
    %164 = vector.load %arg11[%c0_150, %c101] : memref<16x288xbf16, #tpu.memory_space<vmem>>, vector<16x32xbf16>
    %cst_151 = arith.constant dense<0.000000e+00> : vector<16x32xf32>
    %165 = tpu.matmul %163, %164, %cst_151 {dimension_numbers = #tpu.dot_dimension_numbers<[1], [0], [0], [1], [0, 0, 1, 1], [], []>} : vector<16x16xbf16>, vector<16x32xbf16>, vector<16x32xf32> -> vector<16x32xf32>
    %c2_152 = arith.constant 2 : index
    %c1_153 = arith.constant 1 : index
    %c0_154 = arith.constant 0 : index
    %c0_155 = arith.constant 0 : index
    %166 = vector.load %arg4[%c2_152, %c1_153, %c0_154, %c0_155] : memref<3x7x16x16xbf16, #tpu.memory_space<vmem>>, vector<1x1x16x16xbf16>
    %167 = vector.shape_cast %166 : vector<1x1x16x16xbf16> to vector<16x16xbf16>
    %c0_156 = arith.constant 0 : index
    %c110 = arith.constant 110 : index
    %168 = vector.load %arg11[%c0_156, %c110] : memref<16x288xbf16, #tpu.memory_space<vmem>>, vector<16x32xbf16>
    %cst_157 = arith.constant dense<0.000000e+00> : vector<16x32xf32>
    %169 = tpu.matmul %167, %168, %cst_157 {dimension_numbers = #tpu.dot_dimension_numbers<[1], [0], [0], [1], [0, 0, 1, 1], [], []>} : vector<16x16xbf16>, vector<16x32xbf16>, vector<16x32xf32> -> vector<16x32xf32>
    %170 = arith.addf %165, %169 : vector<16x32xf32>
    %c2_158 = arith.constant 2 : index
    %c2_159 = arith.constant 2 : index
    %c0_160 = arith.constant 0 : index
    %c0_161 = arith.constant 0 : index
    %171 = vector.load %arg4[%c2_158, %c2_159, %c0_160, %c0_161] : memref<3x7x16x16xbf16, #tpu.memory_space<vmem>>, vector<1x1x16x16xbf16>
    %172 = vector.shape_cast %171 : vector<1x1x16x16xbf16> to vector<16x16xbf16>
    %c0_162 = arith.constant 0 : index
    %c119_163 = arith.constant 119 : index
    %173 = vector.load %arg11[%c0_162, %c119_163] : memref<16x288xbf16, #tpu.memory_space<vmem>>, vector<16x32xbf16>
    %cst_164 = arith.constant dense<0.000000e+00> : vector<16x32xf32>
    %174 = tpu.matmul %172, %173, %cst_164 {dimension_numbers = #tpu.dot_dimension_numbers<[1], [0], [0], [1], [0, 0, 1, 1], [], []>} : vector<16x16xbf16>, vector<16x32xbf16>, vector<16x32xf32> -> vector<16x32xf32>
    %175 = arith.addf %170, %174 : vector<16x32xf32>
    %c2_165 = arith.constant 2 : index
    %c3_166 = arith.constant 3 : index
    %c0_167 = arith.constant 0 : index
    %c0_168 = arith.constant 0 : index
    %176 = vector.load %arg4[%c2_165, %c3_166, %c0_167, %c0_168] : memref<3x7x16x16xbf16, #tpu.memory_space<vmem>>, vector<1x1x16x16xbf16>
    %177 = vector.shape_cast %176 : vector<1x1x16x16xbf16> to vector<16x16xbf16>
    %c0_169 = arith.constant 0 : index
    %c128_170 = arith.constant 128 : index
    %178 = vector.load %arg11[%c0_169, %c128_170] : memref<16x288xbf16, #tpu.memory_space<vmem>>, vector<16x32xbf16>
    %cst_171 = arith.constant dense<0.000000e+00> : vector<16x32xf32>
    %179 = tpu.matmul %177, %178, %cst_171 {dimension_numbers = #tpu.dot_dimension_numbers<[1], [0], [0], [1], [0, 0, 1, 1], [], []>} : vector<16x16xbf16>, vector<16x32xbf16>, vector<16x32xf32> -> vector<16x32xf32>
    %180 = arith.addf %175, %179 : vector<16x32xf32>
    %c2_172 = arith.constant 2 : index
    %c4_173 = arith.constant 4 : index
    %c0_174 = arith.constant 0 : index
    %c0_175 = arith.constant 0 : index
    %181 = vector.load %arg4[%c2_172, %c4_173, %c0_174, %c0_175] : memref<3x7x16x16xbf16, #tpu.memory_space<vmem>>, vector<1x1x16x16xbf16>
    %182 = vector.shape_cast %181 : vector<1x1x16x16xbf16> to vector<16x16xbf16>
    %c0_176 = arith.constant 0 : index
    %c137_177 = arith.constant 137 : index
    %183 = vector.load %arg11[%c0_176, %c137_177] : memref<16x288xbf16, #tpu.memory_space<vmem>>, vector<16x32xbf16>
    %cst_178 = arith.constant dense<0.000000e+00> : vector<16x32xf32>
    %184 = tpu.matmul %182, %183, %cst_178 {dimension_numbers = #tpu.dot_dimension_numbers<[1], [0], [0], [1], [0, 0, 1, 1], [], []>} : vector<16x16xbf16>, vector<16x32xbf16>, vector<16x32xf32> -> vector<16x32xf32>
    %185 = arith.addf %180, %184 : vector<16x32xf32>
    %c2_179 = arith.constant 2 : index
    %c5_180 = arith.constant 5 : index
    %c0_181 = arith.constant 0 : index
    %c0_182 = arith.constant 0 : index
    %186 = vector.load %arg4[%c2_179, %c5_180, %c0_181, %c0_182] : memref<3x7x16x16xbf16, #tpu.memory_space<vmem>>, vector<1x1x16x16xbf16>
    %187 = vector.shape_cast %186 : vector<1x1x16x16xbf16> to vector<16x16xbf16>
    %c0_183 = arith.constant 0 : index
    %c146 = arith.constant 146 : index
    %188 = vector.load %arg11[%c0_183, %c146] : memref<16x288xbf16, #tpu.memory_space<vmem>>, vector<16x32xbf16>
    %cst_184 = arith.constant dense<0.000000e+00> : vector<16x32xf32>
    %189 = tpu.matmul %187, %188, %cst_184 {dimension_numbers = #tpu.dot_dimension_numbers<[1], [0], [0], [1], [0, 0, 1, 1], [], []>} : vector<16x16xbf16>, vector<16x32xbf16>, vector<16x32xf32> -> vector<16x32xf32>
    %190 = arith.addf %185, %189 : vector<16x32xf32>
    %c2_185 = arith.constant 2 : index
    %c6_186 = arith.constant 6 : index
    %c0_187 = arith.constant 0 : index
    %c0_188 = arith.constant 0 : index
    %191 = vector.load %arg4[%c2_185, %c6_186, %c0_187, %c0_188] : memref<3x7x16x16xbf16, #tpu.memory_space<vmem>>, vector<1x1x16x16xbf16>
    %192 = vector.shape_cast %191 : vector<1x1x16x16xbf16> to vector<16x16xbf16>
    %c0_189 = arith.constant 0 : index
    %c155 = arith.constant 155 : index
    %193 = vector.load %arg11[%c0_189, %c155] : memref<16x288xbf16, #tpu.memory_space<vmem>>, vector<16x32xbf16>
    %cst_190 = arith.constant dense<0.000000e+00> : vector<16x32xf32>
    %194 = tpu.matmul %192, %193, %cst_190 {dimension_numbers = #tpu.dot_dimension_numbers<[1], [0], [0], [1], [0, 0, 1, 1], [], []>} : vector<16x16xbf16>, vector<16x32xbf16>, vector<16x32xf32> -> vector<16x32xf32>
    %195 = arith.addf %190, %194 : vector<16x32xf32>
    %c2_191 = arith.constant 2 : index
    %c0_192 = arith.constant 0 : index
    %c0_193 = arith.constant 0 : index
    %196 = vector.load %arg5[%c2_191, %c0_192, %c0_193] : memref<3x16x1xf32, #tpu.memory_space<vmem>>, vector<1x16x1xf32>
    %197 = vector.shape_cast %196 : vector<1x16x1xf32> to vector<16x1xf32>
    %198 = vector.broadcast %197 : vector<16x1xf32> to vector<16x32xf32>
    %199 = arith.addf %195, %198 : vector<16x32xf32>
    %c5_194 = arith.constant 5 : index
    %c0_195 = arith.constant 0 : index
    %c0_196 = arith.constant 0 : index
    %200 = vector.load %arg2[%c5_194, %c0_195, %c0_196] : memref<7x16x1xf32, #tpu.memory_space<vmem>>, vector<1x16x1xf32>
    %201 = vector.shape_cast %200 : vector<1x16x1xf32> to vector<16x1xf32>
    %c5_197 = arith.constant 5 : index
    %c0_198 = arith.constant 0 : index
    %c0_199 = arith.constant 0 : index
    %202 = vector.load %arg3[%c5_197, %c0_198, %c0_199] : memref<7x16x1xf32, #tpu.memory_space<vmem>>, vector<1x16x1xf32>
    %203 = vector.shape_cast %202 : vector<1x16x1xf32> to vector<16x1xf32>
    %204 = vector.broadcast %201 : vector<16x1xf32> to vector<16x32xf32>
    %205 = arith.mulf %204, %199 : vector<16x32xf32>
    %206 = math.sin %205 : vector<16x32xf32>
    %207 = arith.mulf %206, %206 : vector<16x32xf32>
    %208 = vector.broadcast %203 : vector<16x1xf32> to vector<16x32xf32>
    %209 = arith.mulf %208, %207 : vector<16x32xf32>
    %210 = arith.addf %199, %209 : vector<16x32xf32>
    %c2_200 = arith.constant 2 : index
    %c0_201 = arith.constant 0 : index
    %c0_202 = arith.constant 0 : index
    %211 = vector.load %arg6[%c2_200, %c0_201, %c0_202] : memref<3x16x16xf32, #tpu.memory_space<vmem>>, vector<1x16x16xf32>
    %212 = vector.shape_cast %211 : vector<1x16x16xf32> to vector<16x16xf32>
    %cst_203 = arith.constant dense<0.000000e+00> : vector<16x32xf32>
    %213 = tpu.matmul %212, %210, %cst_203 {dimension_numbers = #tpu.dot_dimension_numbers<[1], [0], [0], [1], [0, 0, 1, 1], [], []>} : vector<16x16xf32>, vector<16x32xf32>, vector<16x32xf32> -> vector<16x32xf32>
    %c2_204 = arith.constant 2 : index
    %c0_205 = arith.constant 0 : index
    %c0_206 = arith.constant 0 : index
    %214 = vector.load %arg7[%c2_204, %c0_205, %c0_206] : memref<3x16x1xf32, #tpu.memory_space<vmem>>, vector<1x16x1xf32>
    %215 = vector.shape_cast %214 : vector<1x16x1xf32> to vector<16x1xf32>
    %216 = vector.broadcast %215 : vector<16x1xf32> to vector<16x32xf32>
    %217 = arith.addf %213, %216 : vector<16x32xf32>
    %218 = arith.addf %148, %217 : vector<16x32xf32>
    %c6_207 = arith.constant 6 : index
    %c0_208 = arith.constant 0 : index
    %c0_209 = arith.constant 0 : index
    %219 = vector.load %arg2[%c6_207, %c0_208, %c0_209] : memref<7x16x1xf32, #tpu.memory_space<vmem>>, vector<1x16x1xf32>
    %220 = vector.shape_cast %219 : vector<1x16x1xf32> to vector<16x1xf32>
    %c6_210 = arith.constant 6 : index
    %c0_211 = arith.constant 0 : index
    %c0_212 = arith.constant 0 : index
    %221 = vector.load %arg3[%c6_210, %c0_211, %c0_212] : memref<7x16x1xf32, #tpu.memory_space<vmem>>, vector<1x16x1xf32>
    %222 = vector.shape_cast %221 : vector<1x16x1xf32> to vector<16x1xf32>
    %223 = vector.broadcast %220 : vector<16x1xf32> to vector<16x32xf32>
    %224 = arith.mulf %223, %218 : vector<16x32xf32>
    %225 = math.sin %224 : vector<16x32xf32>
    %226 = arith.mulf %225, %225 : vector<16x32xf32>
    %227 = vector.broadcast %222 : vector<16x1xf32> to vector<16x32xf32>
    %228 = arith.mulf %227, %226 : vector<16x32xf32>
    %229 = arith.addf %218, %228 : vector<16x32xf32>
    %230 = arith.truncf %229 : vector<16x32xf32> to vector<16x32xbf16>
    %c0_213 = arith.constant 0 : index
    %c128_214 = arith.constant 128 : index
    %231 = vector.load %arg11[%c0_213, %c128_214] : memref<16x288xbf16, #tpu.memory_space<vmem>>, vector<16x32xbf16>
    tpu.vector_store %arg11[%c0_213, %c128_214], %230 {strides = array<i32>} : memref<16x288xbf16, #tpu.memory_space<vmem>>, vector<16x32xbf16>,
    %c0_215 = arith.constant 0 : index
    %c0_216 = arith.constant 0 : index
    %c0_217 = arith.constant 0 : index
    %232 = vector.load %arg8[%c0_215, %c0_216, %c0_217] : memref<2x32x16xbf16, #tpu.memory_space<vmem>>, vector<1x32x16xbf16>
    %233 = vector.shape_cast %232 : vector<1x32x16xbf16> to vector<32x16xbf16>
    %c0_218 = arith.constant 0 : index
    %c127_219 = arith.constant 127 : index
    %234 = vector.load %arg11[%c0_218, %c127_219] : memref<16x288xbf16, #tpu.memory_space<vmem>>, vector<16x128xbf16>
    %cst_220 = arith.constant dense<0.000000e+00> : vector<32x128xf32>
    %235 = tpu.matmul %233, %234, %cst_220 {dimension_numbers = #tpu.dot_dimension_numbers<[1], [0], [0], [1], [0, 0, 1, 1], [], []>} : vector<32x16xbf16>, vector<16x128xbf16>, vector<32x128xf32> -> vector<32x128xf32>
    %c1_221 = arith.constant 1 : index
    %c0_222 = arith.constant 0 : index
    %c0_223 = arith.constant 0 : index
    %236 = vector.load %arg8[%c1_221, %c0_222, %c0_223] : memref<2x32x16xbf16, #tpu.memory_space<vmem>>, vector<1x32x16xbf16>
    %237 = vector.shape_cast %236 : vector<1x32x16xbf16> to vector<32x16xbf16>
    %c0_224 = arith.constant 0 : index
    %c128_225 = arith.constant 128 : index
    %238 = vector.load %arg11[%c0_224, %c128_225] : memref<16x288xbf16, #tpu.memory_space<vmem>>, vector<16x128xbf16>
    %cst_226 = arith.constant dense<0.000000e+00> : vector<32x128xf32>
    %239 = tpu.matmul %237, %238, %cst_226 {dimension_numbers = #tpu.dot_dimension_numbers<[1], [0], [0], [1], [0, 0, 1, 1], [], []>} : vector<32x16xbf16>, vector<16x128xbf16>, vector<32x128xf32> -> vector<32x128xf32>
    %240 = arith.addf %235, %239 : vector<32x128xf32>
    %c0_227 = arith.constant 0 : index
    %c0_228 = arith.constant 0 : index
    %241 = vector.load %arg9[%c0_227, %c0_228] : memref<32x1xf32, #tpu.memory_space<vmem>>, vector<32x1xf32>
    %242 = vector.broadcast %241 : vector<32x1xf32> to vector<32x128xf32>
    %243 = arith.addf %240, %242 : vector<32x128xf32>
    %244 = vector.extract_strided_slice %243 {offsets = [0, 0], sizes = [16, 128], strides = [1, 1]} : vector<32x128xf32> to vector<16x128xf32>
    %c0_229 = arith.constant 0 : index
    %c0_230 = arith.constant 0 : index
    %c0_231 = arith.constant 0 : index
    %245 = vector.load %arg10[%c0_229, %c0_230, %c0_231] : memref<2x16x128xf32, #tpu.memory_space<vmem>>, vector<1x16x128xf32>
    %246 = vector.shape_cast %245 : vector<1x16x128xf32> to vector<16x128xf32>
    %247 = vector.shape_cast %244 : vector<16x128xf32> to vector<1x16x128xf32>
    tpu.vector_store %arg10[%c0_229, %c0_230, %c0_231], %247 {strides = array<i32>} : memref<2x16x128xf32, #tpu.memory_space<vmem>>, vector<1x16x128xf32>,
    %248 = vector.extract_strided_slice %243 {offsets = [16, 0], sizes = [16, 128], strides = [1, 1]} : vector<32x128xf32> to vector<16x128xf32>
    %c1_232 = arith.constant 1 : index
    %c0_233 = arith.constant 0 : index
    %c0_234 = arith.constant 0 : index
    %249 = vector.load %arg10[%c1_232, %c0_233, %c0_234] : memref<2x16x128xf32, #tpu.memory_space<vmem>>, vector<1x16x128xf32>
    %250 = vector.shape_cast %249 : vector<1x16x128xf32> to vector<16x128xf32>
    %251 = vector.shape_cast %248 : vector<16x128xf32> to vector<1x16x128xf32>
    tpu.vector_store %arg10[%c1_232, %c0_233, %c0_234], %251 {strides = array<i32>} : memref<2x16x128xf32, #tpu.memory_space<vmem>>, vector<1x16x128xf32>,
    return
  }
  func.func @transform_0(%arg0: i32) -> (i32, i32, i32) {
    %c0_i32 = arith.constant 0 : i32
    %c0_i32_0 = arith.constant 0 : i32
    %c0_i32_1 = arith.constant 0 : i32
    return %arg0, %c0_i32, %c0_i32_0 : i32, i32, i32
  }
  func.func @transform_1(%arg0: i32) -> (i32, i32, i32) {
    %c0_i32 = arith.constant 0 : i32
    %c0_i32_0 = arith.constant 0 : i32
    %c0_i32_1 = arith.constant 0 : i32
    %c0_i32_2 = arith.constant 0 : i32
    return %c0_i32, %c0_i32_0, %c0_i32_1 : i32, i32, i32
  }
  func.func @transform_2(%arg0: i32) -> (i32, i32, i32) {
    %c0_i32 = arith.constant 0 : i32
    %c0_i32_0 = arith.constant 0 : i32
    %c0_i32_1 = arith.constant 0 : i32
    %c0_i32_2 = arith.constant 0 : i32
    return %c0_i32, %c0_i32_0, %c0_i32_1 : i32, i32, i32
  }
  func.func @transform_3(%arg0: i32) -> (i32, i32, i32, i32) {
    %c0_i32 = arith.constant 0 : i32
    %c0_i32_0 = arith.constant 0 : i32
    %c0_i32_1 = arith.constant 0 : i32
    %c0_i32_2 = arith.constant 0 : i32
    %c0_i32_3 = arith.constant 0 : i32
    return %c0_i32, %c0_i32_0, %c0_i32_1, %c0_i32_2 : i32, i32, i32, i32
  }
  func.func @transform_4(%arg0: i32) -> (i32, i32, i32) {
    %c0_i32 = arith.constant 0 : i32
    %c0_i32_0 = arith.constant 0 : i32
    %c0_i32_1 = arith.constant 0 : i32
    %c0_i32_2 = arith.constant 0 : i32
    return %c0_i32, %c0_i32_0, %c0_i32_1 : i32, i32, i32
  }
  func.func @transform_5(%arg0: i32) -> (i32, i32, i32) {
    %c0_i32 = arith.constant 0 : i32
    %c0_i32_0 = arith.constant 0 : i32
    %c0_i32_1 = arith.constant 0 : i32
    %c0_i32_2 = arith.constant 0 : i32
    return %c0_i32, %c0_i32_0, %c0_i32_1 : i32, i32, i32
  }
  func.func @transform_6(%arg0: i32) -> (i32, i32, i32) {
    %c0_i32 = arith.constant 0 : i32
    %c0_i32_0 = arith.constant 0 : i32
    %c0_i32_1 = arith.constant 0 : i32
    %c0_i32_2 = arith.constant 0 : i32
    return %c0_i32, %c0_i32_0, %c0_i32_1 : i32, i32, i32
  }
  func.func @transform_7(%arg0: i32) -> (i32, i32, i32) {
    %c0_i32 = arith.constant 0 : i32
    %c0_i32_0 = arith.constant 0 : i32
    %c0_i32_1 = arith.constant 0 : i32
    %c0_i32_2 = arith.constant 0 : i32
    return %c0_i32, %c0_i32_0, %c0_i32_1 : i32, i32, i32
  }
  func.func @transform_8(%arg0: i32) -> (i32, i32) {
    %c0_i32 = arith.constant 0 : i32
    %c0_i32_0 = arith.constant 0 : i32
    %c0_i32_1 = arith.constant 0 : i32
    return %c0_i32, %c0_i32_0 : i32, i32
  }
  func.func @transform_9(%arg0: i32) -> (i32, i32, i32) {
    %c0_i32 = arith.constant 0 : i32
    %c0_i32_0 = arith.constant 0 : i32
    %c0_i32_1 = arith.constant 0 : i32
    return %arg0, %c0_i32, %c0_i32_0 : i32, i32, i32
  }
}

</mosaic_0001>

<bundles_post_ra>
// kernel: tpu_custom_call.1
= control target key start
LH: loop header
LB: loop body
LE: loop exit
PB: predicated region body
PF: predicated region fallthrough
CT: control target
= control target key end

     0   :  { %v3895_v2 = vmov 0   ;;  %s5542_s0 = inlined_call_operand.vmem [shape: f32[2,8,32], index: 0, kind: input, shape index: {}]   ;;  %s5543_s1 = inlined_call_operand.vmem [shape: f32[7,16,1], index: 1, kind: input, shape index: {}]   ;;  %s5544_s2 = inlined_call_operand.vmem [shape: f32[7,16,1], index: 2, kind: input, shape index: {}]   ;;  %s5545_s3 = inlined_call_operand.vmem [shape: bf16[3,7,16,16], index: 3, kind: input, shape index: {}]   ;;  %s5546_s4 = inlined_call_operand.vmem [shape: f32[3,16,1], index: 4, kind: input, shape index: {}]   ;;  %s5547_s5 = inlined_call_operand.vmem [shape: f32[3,16,16], index: 5, kind: input, shape index: {}]   ;;  %s5548_s6 = inlined_call_operand.vmem [shape: f32[3,16,1], index: 6, kind: input, shape index: {}]   ;;  %s5549_s7 = inlined_call_operand.vmem [shape: bf16[2,32,16], index: 7, kind: input, shape index: {}]   ;;  %s5550_s8 = inlined_call_operand.vmem [shape: f32[32,1], index: 8, kind: input, shape index: {}]   ;;  %s5551_s9 = inlined_call_operand.hbm [shape: f32[2,16,128], index: 9, kind: output, shape index: {}]  }
   0x1   :  { %v44_v0 = vld [vmem:[%s5543_s1] sm:$0xff]  ;;  %3864 = vset.pattern.permute.xlu0 %v3895_v2  ;;  %34 = vst [vmem:[#allocation2] sm:$0xf] %v3895_v2  ;;  %3865 = vset.pattern.permute.xlu1 %v3895_v2 }
   0x2   :  { %v46_v1 = vld [vmem:[%s5544_s2] sm:$0xff]  ;;  %35 = vst [vmem:[#allocation2 + $0xc] sm:$0xf] %v3895_v2  ;;  %50 = vperm.xlu0 %3864, %v44_v0   ;;  %3866 = vset.pattern.permute.xlu2 %v3895_v2 }
   0x3   :  { %374 = vperm.xlu1 %3865, %v46_v1  }
   0x4   :  { %14 = vsyncpa [#allocation4], 0  ;;  %v45_v3 = vld [vmem:[%s5543_s1 + $0x8] sm:$0xff]  ;;  %v3989_v5 = vld [vmem:[%s5542_s0] sm:$0xff]  ;;  %vm36_vm1 = vcmask 1043712   ;;  %vm37_vm2 = vcmask 261124  }
   0x5   :  { %v47_v4 = vld [vmem:[%s5544_s2 + $0x8] sm:$0xff]  ;;  %vm38_vm3 = vmor %vm37_vm2, %vm36_vm1  ;;  %v3896_v26 = vmov 683565275   ;;  %v3897_v28 = vmov 2475754826   ;;  %s3902_s21 = smov 3  }
   0x6   :  { %v3999_v11 = vld [vmem:[%s5542_s0 + $0x8] sm:$0xff]  ;;  %39 = vst.msk [vmem:[#allocation2 + $0x4] sm:$0xff] %vm38_vm3, %v3895_v2  ;;  %v3898_v32 = vmov 2131351028   ;;  %v3899_v35 = vmov 2102212464  }
   0x7   :  { %40 = vst.msk [vmem:[#allocation2 + $0x10] sm:$0xff] %vm38_vm3, %v3895_v2  ;;  %v3900_v38 = vmov 920167782   ;;  %v3901_v41 = vmov 1326507024   ;;  %s3903_s22 = smov 2  }
   0x8   :  { %s3904_s23 = smov 1   ;;  %s3905_s24 = smov 125  }
   0x9   :  { %s3906_s25 = smov 126   ;;  %s3907_s30 = smov 127  }
   0xa   :  { %55 = vperm.xlu0 %3864, %v45_v3   ;;  %s3909_s16 = smov 9   ;;  %s3910_s17 = smov 122  }
   0xb   :  { %379 = vperm.xlu1 %3865, %v47_v4   ;;  %s3911_s18 = smov 119   ;;  %s3913_s26 = smov 27  }
   0xc   :  { %s3914_s27 = smov 110   ;;  %s3915_s28 = smov 101  }
   0xd   :  { %s3917_s14 = smov 128   ;;  %s3918_s15 = smov 8  }
  0x74   :  { %v51_v6 = vpop.permute.xlu0 %50 }
  0x75   :  { %v3992_v7 = vmul.f32 %v51_v6, %v3989_v5 }
  0x77   :  { %v60_v8 = vand.u32 2147483647, %v3992_v7  ;;  %v63_v9 = vand.u32 2139095040, %v3992_v7 }
  0x79   :  { %v64_v10 = vshrl.u32 %v63_v9, 23  ;;  %v67_v13 = vand.u32 8388607, %v60_v8 }
  0x7b   :  { %v3502_v12 = vadd.s32 4294967169, %v64_v10  ;;  %v68_v17 = vor.u32 8388608, %v67_v13 }
  0x7c   :  { %v56_v14 = vpop.permute.xlu0 %55 }
  0x7d   :  { %v70_v15 = vadd.s32 1, %v3502_v12  ;;  %v4004_v16 = vmul.f32 %v3999_v11, %v56_v14  ;;  %v4008_v23 = vshll.u32 %v68_v17, 8 }
  0x7f   :  { %vm71_vm0 = vcmp.gt.s32.totalorder %v70_v15, 0  ;;  %v215_v19 = vand.u32 2147483647, %v4004_v16  ;;  %v218_v20 = vand.u32 2139095040, %v4004_v16  ;;  %v109_v62 = vand.u32 65535, %v4008_v23 }
  0x80   :  { %v72_v18 = vsel %vm71_vm0, %v70_v15, 0  ;;  %v110_v9 = vshrl.u32 %v4008_v23, 16 }
  0x81   :  { %v74_v21 = vand.u32 31, %v72_v18  ;;  %v219_v24 = vshrl.u32 %v218_v20, 23  ;;  %v73_v25 = vshrl.u32 %v72_v18, 5  ;;  %v222_v30 = vand.u32 8388607, %v215_v19 }
  0x83   :  { %v75_v22 = vsub.s32 32, %v74_v21  ;;  %v77_v27 = vshll.u32 %v3896_v26, %v74_v21  ;;  %v80_v29 = vshll.u32 %v3897_v28, %v74_v21  ;;  %v83_v34 = vshll.u32 %v3898_v32, %v74_v21 }
  0x84   :  { %v86_v37 = vshll.u32 %v3899_v35, %v74_v21  ;;  %v89_v40 = vshll.u32 %v3900_v38, %v74_v21  ;;  %v3505_v46 = vadd.s32 4294967169, %v219_v24  ;;  %vm92_vm4 = vcmp.lt.s32.totalorder %v73_v25, 1 }
  0x85   :  { %v78_v31 = vshrl.u32 %v3897_v28, %v75_v22  ;;  %v81_v33 = vshrl.u32 %v3898_v32, %v75_v22  ;;  %v84_v36 = vshrl.u32 %v3899_v35, %v75_v22  ;;  %v87_v39 = vshrl.u32 %v3900_v38, %v75_v22 }
  0x86   :  { %v90_v42 = vshrl.u32 %v3901_v41, %v75_v22  ;;  %vm95_vm5 = vcmp.lt.s32.totalorder %v73_v25, 4  ;;  %vm93_vm6 = vcmp.lt.s32.totalorder %v73_v25, 2  ;;  %vm94_vm7 = vcmp.lt.s32.totalorder %v73_v25, 3 }
  0x87   :  { %v79_v43 = vor.u32 %v78_v31, %v77_v27  ;;  %v82_v44 = vor.u32 %v81_v33, %v80_v29  ;;  %v85_v45 = vor.u32 %v84_v36, %v83_v34  ;;  %v88_v47 = vor.u32 %v87_v39, %v86_v37 }
  0x88   :  { %v91_v48 = vor.u32 %v90_v42, %v89_v40  ;;  %v223_v53 = vor.u32 8388608, %v222_v30  ;;  %v225_v54 = vadd.s32 1, %v3505_v46  ;;  %v76_v55 = vshrl.u32 %v3896_v26, %v75_v22 }
  0x89   :  { %v97_v49 = vsel %vm95_vm5, %v85_v45, 2102212464  ;;  %v104_v50 = vsel %vm92_vm4, %v82_v44, %v85_v45  ;;  %v101_v51 = vsel %vm95_vm5, %v88_v47, 920167782  ;;  %v100_v56 = vsel %vm92_vm4, %v79_v43, %v82_v44 }
  0x8a   :  { %v105_v52 = vsel %vm95_vm5, %v91_v48, 1326507024  ;;  %v102_v57 = vsel %vm94_vm7, %v85_v45, %v101_v51  ;;  %vm226_vm8 = vcmp.gt.s32.totalorder %v225_v54, 0  ;;  %v96_v60 = vsel %vm92_vm4, %v76_v55, %v79_v43 }
  0x8b   :  { %v106_v58 = vsel %vm94_vm7, %v88_v47, %v105_v52  ;;  %v98_v61 = vsel %vm94_vm7, %v82_v44, %v97_v49  ;;  %v103_v0 = vsel %vm93_vm6, %v100_v56, %v102_v57  ;;  %v227_v3 = vsel %vm226_vm8, %v225_v54, 0 }
  0x8c   :  { %v107_v59 = vsel %vm93_vm6, %v104_v50, %v106_v58  ;;  %v4031_v4 = vshll.u32 %v223_v53, 8  ;;  %v229_v10 = vand.u32 31, %v227_v3  ;;  %v4037_v12 = vsel %vm93_vm6, %v96_v60, %v98_v61 }
  0x8d   :  { %v112_v63 = vshrl.u32 %v107_v59, 16  ;;  %v111_v1 = vand.u32 65535, %v107_v59  ;;  %v133_v13 = vand.u32 65535, %v103_v0  ;;  %v134_v14 = vshrl.u32 %v103_v0, 16 }
  0x8e   :  { %v4039_v18 = vsub.s32 32, %v229_v10  ;;  %v4042_v20 = vand.u32 65535, %v4031_v4  ;;  %v4045_v22 = vshrl.u32 %v227_v3, 5  ;;  %v232_v24 = vshll.u32 %v3896_v26, %v229_v10 }
  0x8f   :  { %v4033_v6 = vmul.u32 %v112_v63, %v109_v62  ;;  %v113_v15 = vmul.u32 %v111_v1, %v109_v62  ;;  %v116_v17 = vmul.u32 %v112_v63, %v110_v9  ;;  %v235_v27 = vshll.u32 %v3897_v28, %v229_v10 }
  0x90   :  { %v233_v25 = vshrl.u32 %v3897_v28, %v4039_v18  ;;  %v236_v29 = vshrl.u32 %v3898_v32, %v4039_v18  ;;  %v238_v30 = vshll.u32 %v3898_v32, %v229_v10  ;;  %v239_v31 = vshrl.u32 %v3899_v35, %v4039_v18 }
  0x91   :  { %v117_v21 = vshll.u32 %v4033_v6, 16  ;;  %v241_v33 = vshll.u32 %v3899_v35, %v229_v10  ;;  %v242_v34 = vshrl.u32 %v3900_v38, %v4039_v18  ;;  %v244_v36 = vshll.u32 %v3900_v38, %v229_v10 }
  0x92   :  { %v245_v37 = vshrl.u32 %v3901_v41, %v4039_v18  ;;  %v4062_v39 = vor.u32 %v233_v25, %v232_v24  ;;  %v4064_v40 = vor.u32 %v236_v29, %v235_v27  ;;  %v4066_v42 = vor.u32 %v239_v31, %v238_v30 }
  0x93   :  { %v115_v43 = vmul.u32 %v111_v1, %v110_v9  ;;  %vm121_vm9 = vc.u32 %v113_v15, %v117_v21  ;;  %v243_v44 = vor.u32 %v242_v34, %v241_v33  ;;  %vm247_vm10 = vcmp.lt.s32.totalorder %v4045_v22, 1 }
  0x94   :  { %v246_v45 = vor.u32 %v245_v37, %v244_v36  ;;  %v136_v46 = vmul.u32 %v134_v14, %v109_v62  ;;  %vm250_vm11 = vcmp.lt.s32.totalorder %v4045_v22, 4  ;;  %v255_v47 = vsel %vm247_vm10, %v4062_v39, %v4064_v40 }
  0x95   :  { %v259_v48 = vsel %vm247_vm10, %v4064_v40, %v4066_v42  ;;  %v123_v49 = vadd.s32 %v117_v21, %v113_v15  ;;  %vm249_vm12 = vcmp.lt.s32.totalorder %v4045_v22, 3  ;;  %v256_v50 = vsel %vm250_vm11, %v243_v44, 920167782 }
  0x96   :  { %v260_v51 = vsel %vm250_vm11, %v246_v45, 1326507024  ;;  %vm248_vm13 = vcmp.lt.s32.totalorder %v4045_v22, 2  ;;  %v257_v52 = vsel %vm249_vm12, %v4066_v42, %v256_v50  ;;  %v122_v54 = vsel %vm121_vm9, 1, %v3895_v2 }
  0x97   :  { %v261_v53 = vsel %vm249_vm12, %v243_v44, %v260_v51  ;;  %v258_v55 = vsel %vm248_vm13, %v255_v47, %v257_v52  ;;  %v119_v57 = vshll.u32 %v115_v43, 16  ;;  %v137_v58 = vmul.u32 %v133_v13, %v110_v9 }
  0x98   :  { %v262_v56 = vsel %vm248_vm13, %v259_v48, %v261_v53  ;;  %v265_v59 = vshrl.u32 %v4031_v4, 16  ;;  %v124_v63 = vadd.s32 %v122_v54, %v116_v17  ;;  %v289_v0 = vshrl.u32 %v258_v55, 16 }
  0x99   :  { %v266_v60 = vand.u32 65535, %v262_v56  ;;  %v267_v61 = vshrl.u32 %v262_v56, 16  ;;  %vm125_vm14 = vc.u32 %v123_v49, %v119_v57  ;;  %v135_v1 = vmul.u32 %v133_v13, %v109_v62 }
  0x9a   :  { %v139_v3 = vshll.u32 %v136_v46, 16  ;;  %v138_v10 = vmul.u32 %v134_v14, %v110_v9  ;;  %v288_v21 = vand.u32 65535, %v258_v55  ;;  %v118_v24 = vshrl.u32 %v4033_v6, 16 }
  0x9b   :  { %v269_v15 = vmul.u32 %v267_v61, %v4042_v20  ;;  %v268_v27 = vmul.u32 %v266_v60, %v4042_v20  ;;  %v126_v25 = vsel %vm125_vm14, 1, %v3895_v2  ;;  %v141_v29 = vshll.u32 %v137_v58, 16 }
  0x9c   :  { %vm143_vm15 = vc.u32 %v135_v1, %v139_v3  ;;  %v128_v31 = vadd.s32 %v126_v25, %v124_v63  ;;  %v145_v33 = vadd.s32 %v139_v3, %v135_v1  ;;  %v291_v62 = vmul.u32 %v289_v0, %v4042_v20 }
  0x9d   :  { %v272_v30 = vshll.u32 %v269_v15, 16  ;;  %v144_v17 = vsel %vm143_vm15, 1, %v3895_v2  ;;  %v120_v13 = vshrl.u32 %v115_v43, 16  ;;  %v270_v14 = vmul.u32 %v266_v60, %v265_v59 }
  0x9e   :  { %v146_v9 = vadd.s32 %v144_v17, %v138_v10  ;;  %v129_v36 = vadd.s32 %v128_v31, %v118_v24  ;;  %vm147_vm1 = vc.u32 %v145_v33, %v141_v29  ;;  %v271_v6 = vmul.u32 %v267_v61, %v265_v59 }
  0x9f   :  { %vm276_vm0 = vc.u32 %v268_v27, %v272_v30  ;;  %v278_v34 = vadd.s32 %v272_v30, %v268_v27  ;;  %v140_v37 = vshrl.u32 %v136_v46, 16  ;;  %v148_v44 = vsel %vm147_vm1, 1, %v3895_v2 }
  0xa0   :  { %v274_v45 = vshll.u32 %v270_v14, 16  ;;  %v150_v47 = vadd.s32 %v148_v44, %v146_v9  ;;  %v277_v48 = vsel %vm276_vm0, 1, %v3895_v2  ;;  %v290_v49 = vmul.u32 %v288_v21, %v4042_v20 }
  0xa1   :  { %v292_v50 = vmul.u32 %v288_v21, %v265_v59  ;;  %v130_v51 = vadd.s32 %v129_v36, %v120_v13  ;;  %v279_v52 = vadd.s32 %v277_v48, %v271_v6  ;;  %v294_v43 = vshll.u32 %v291_v62, 16 }
  0xa2   :  { %vm280_vm2 = vc.u32 %v278_v34, %v274_v45  ;;  %v293_v53 = vmul.u32 %v289_v0, %v265_v59  ;;  %v142_v54 = vshrl.u32 %v137_v58, 16  ;;  %v151_v55 = vadd.s32 %v150_v47, %v140_v37 }
  0xa3   :  { %v281_v56 = vsel %vm280_vm2, 1, %v3895_v2  ;;  %v149_v57 = vadd.s32 %v145_v33, %v141_v29  ;;  %v273_v46 = vshrl.u32 %v269_v15, 16  ;;  %vm298_vm3 = vc.u32 %v290_v49, %v294_v43 }
  0xa4   :  { %v283_v60 = vadd.s32 %v281_v56, %v279_v52  ;;  %v152_v61 = vadd.s32 %v151_v55, %v142_v54  ;;  %v296_v63 = vshll.u32 %v292_v50, 16  ;;  %v299_v1 = vsel %vm298_vm3, 1, %v3895_v2 }
  0xa5   :  { %v300_v3 = vadd.s32 %v294_v43, %v290_v49  ;;  %vm155_vm4 = vc.u32 %v130_v51, %v149_v57  ;;  %v301_v10 = vadd.s32 %v299_v1, %v293_v53  ;;  %v252_v59 = vsel %vm250_vm11, %v4066_v42, 2102212464 }
  0xa6   :  { %v284_v20 = vadd.s32 %v283_v60, %v273_v46  ;;  %v156_v58 = vadd.s32 1, %v152_v61  ;;  %v153_v0 = vmul.u32 %v4008_v23, %v4037_v12  ;;  %v231_v15 = vshrl.u32 %v3896_v26, %v4039_v18 }
  0xa7   :  { %vm302_vm5 = vc.u32 %v300_v3, %v296_v63  ;;  %v275_v21 = vshrl.u32 %v270_v14, 16  ;;  %v295_v25 = vshrl.u32 %v291_v62, 16  ;;  %v253_v42 = vsel %vm249_vm12, %v4064_v40, %v252_v59 }
  0xa8   :  { %v303_v24 = vsel %vm302_vm5, 1, %v3895_v2  ;;  %v157_v27 = vsel %vm155_vm4, %v156_v58, %v152_v61  ;;  %v251_v30 = vsel %vm247_vm10, %v231_v15, %v4062_v39  ;;  %v297_v23 = vshrl.u32 %v292_v50, 16 }
  0xa9   :  { %v305_v29 = vadd.s32 %v303_v24, %v301_v10  ;;  %v158_v31 = vadd.s32 %v157_v27, %v153_v0  ;;  %v285_v17 = vadd.s32 %v284_v20, %v275_v21  ;;  %v304_v18 = vadd.s32 %v300_v3, %v296_v63 }
  0xaa   :  { %v254_v13 = vsel %vm248_vm13, %v251_v30, %v253_v42  ;;  %vm62_vm11 = vcmp.lt.s32.totalorder %v3992_v7, 0  ;;  %vm4129_vm12 = vcmp.le.f32.partialorder %v60_v8, 0.7853982  ;;  %vm4138_vm13 = vcmp.le.f32.partialorder %v215_v19, 0.7853982  ;;  %v375_v42 = vpop.permute.xlu1 %374 }
  0xab   :  { %v306_v12 = vadd.s32 %v305_v29, %v295_v25  ;;  %v159_v33 = vadd.s32 536870912, %v158_v31  ;;  %vm310_vm6 = vc.u32 %v285_v17, %v304_v18  ;;  %v308_v34 = vmul.u32 %v4031_v4, %v254_v13 }
  0xac   :  { %v154_v4 = vadd.s32 %v149_v57, %v130_v51  ;;  %v309_v10 = vadd.s32 %v304_v18, %v285_v17  ;;  %vm217_vm14 = vcmp.lt.s32.totalorder %v4004_v16, 0  ;;  %vm203_vm2 = vweird.f32 %v3992_v7 }
  0xad   :  { %v307_v9 = vadd.s32 %v306_v12, %v297_v23  ;;  %v160_v62 = vshrl.u32 %v159_v33, 30  ;;  %vm388_vm5 = vcmask 257024  }
  0xaf   :  { %v311_v14 = vadd.s32 1, %v307_v9  ;;  %v161_v39 = vshll.u32 %v160_v62, 30  ;;  %v184_v17 = vsub.s32 4, %v160_v62 }
  0xb1   :  { %v312_v36 = vsel %vm310_vm6, %v311_v14, %v307_v9  ;;  %v162_v6 = vsub.s32 %v158_v31, %v161_v39  ;;  %v185_v9 = vsel %vm62_vm11, %v184_v17, %v160_v62  ;;  %v3516_v62 = vld [vmem:[#allocation2] sm:$0xf] }
  0xb2   :  { %v313_v37 = vadd.s32 %v312_v36, %v308_v34 }
  0xb3   :  { %vm163_vm7 = vcmp.lt.s32.totalorder %v162_v6, 0  ;;  %v164_v40 = vsub.s32 0, %v162_v6 }
  0xb4   :  { %v314_v44 = vadd.s32 536870912, %v313_v37 }
  0xb5   :  { %v165_v45 = vsel %vm163_vm7, %v164_v40, %v162_v6  ;;  %v187_v40 = vsel %vm4129_vm12, 0, %v185_v9  ;;  %vm358_vm7 = vweird.f32 %v4004_v16 }
  0xb6   :  { %v4123_v47 = vshrl.u32 %v314_v44, 30  ;;  %v166_v48 = vclz %v165_v45  ;;  %v3805_v45 = vld [vmem:[#allocation2 + $0x8] sm:$0xf0] }
  0xb8   :  { %v316_v22 = vshll.u32 %v4123_v47, 30  ;;  %v3503_v49 = vadd.s32 4294967294, %v166_v48  ;;  %v339_v44 = vsub.s32 4, %v4123_v47 }
  0xba   :  { %v317_v50 = vsub.s32 %v313_v37, %v316_v22  ;;  %vm3504_vm8 = vcmp.lt.s32.totalorder %v3503_v49, 0 }
  0xbb   :  { %v169_v52 = vsel %vm3504_vm8, 0, %v3503_v49  ;;  %v4148_v49 = vor.u32 %v3805_v45, %v3516_v62  ;;  %vm415_vm8 = vcmask 15360  }
  0xbc   :  { %vm318_vm9 = vcmp.lt.s32.totalorder %v317_v50, 0  ;;  %v319_v43 = vsub.s32 0, %v317_v50  ;;  %v170_v53 = vsub.s32 32, %v169_v52  ;;  %v174_v54 = vsub.s32 4294967266, %v169_v52 }
  0xbd   :  { %v171_v56 = vshll.u32 %v162_v6, %v169_v52  ;;  %441 = vrot.lane.b32.xlu0 %v4148_v49, %s3902_s21  ;;  %411 = vrot.lane.b32.xlu2 %v4148_v49, %s3903_s22 }
  0xbe   :  { %v320_v55 = vsel %vm318_vm9, %v319_v43, %v317_v50  ;;  %v172_v46 = vshrl.u32 %v154_v4, %v170_v53  ;;  %v175_v60 = vadd.s32 127, %v174_v54  ;;  %v204_v53 = vadd.s32 3, %v187_v40  ;;  %v380_v40 = vpop.permute.xlu1 %379 }
  0xbf   :  { %v321_v61 = vclz %v320_v55  ;;  %v340_v54 = vsel %vm217_vm14, %v339_v44, %v4123_v47  ;;  %vm418_vm9 = vcmask 130048  }
  0xc0   :  { %v173_v63 = vor.u32 %v172_v46, %v171_v56  ;;  %v176_v1 = vshll.u32 %v175_v60, 23 }
  0xc1   :  { %v3506_v3 = vadd.s32 4294967294, %v321_v61 }
  0xc2   :  { %v177_v20 = vor.u32 4788187, %v176_v1  ;;  %v180_v0 = vcvt.s32.f32 %v173_v63 }
  0xc3   :  { %vm3507_vm10 = vcmp.lt.s32.totalorder %v3506_v3, 0 }
  0xc4   :  { %v324_v59 = vsel %vm3507_vm10, 0, %v3506_v3  ;;  %v178_v58 = vand.u32 2147483647, %v177_v20  ;;  %v205_v20 = vand.u32 3, %v204_v53  ;;  %v3579_v53 = vld [vmem:[%s5543_s1 + $0x20] sm:$0xff]  ;;  %vm445_vm10 = vcmask 23552  }
  0xc5   :  { %v325_v15 = vsub.s32 32, %v324_v59  ;;  %v329_v21 = vsub.s32 4294967266, %v324_v59  ;;  %v326_v51 = vshll.u32 %v317_v50, %v324_v59 }
  0xc6   :  { %v181_v24 = vmul.f32 %v180_v0, %v178_v58  ;;  %vm206_vm15 = vcmp.lt.s32.totalorder %v205_v20, 2  ;;  %vm207_vm0 = vcmp.eq.s32.totalorder %v205_v20, 0  ;;  %vm210_vm1 = vcmp.eq.s32.totalorder %v205_v20, 2  ;;  %v3810_v20 = vld [vmem:[%s5545_s3 + $0x20] sm:$0xff] }
  0xc7   :  { %v327_v57 = vshrl.u32 %v309_v10, %v325_v15  ;;  %v330_v27 = vadd.s32 127, %v329_v21  ;;  %v342_v10 = vsel %vm4138_vm13, 0, %v340_v54  ;;  %v3580_v54 = vld [vmem:[%s5543_s1 + $0x28] sm:$0xff] }
  0xc8   :  { %v182_v25 = vxor.u32 2147483648, %v181_v24  ;;  %v359_v47 = vadd.s32 3, %v342_v10 }
  0xc9   :  { %v328_v29 = vor.u32 %v327_v57, %v326_v51  ;;  %v331_v30 = vshll.u32 %v330_v27, 23 }
  0xca   :  { %v183_v31 = vsel %vm62_vm11, %v182_v25, %v181_v24  ;;  %vm477_vm11 = vcmask 7168  }
  0xcb   :  { %v332_v23 = vor.u32 4788187, %v331_v30  ;;  %v186_v12 = vsel %vm4129_vm12, %v3992_v7, %v183_v31  ;;  %v335_v13 = vcvt.s32.f32 %v328_v29 }
  0xcc   :  { %v188_v33 = vmul.f32 %v186_v12, %v186_v12 }
  0xcd   :  { %v333_v18 = vand.u32 2147483647, %v332_v23 }
  0xce   :  { %v189_v14 = vmul.f32 -0.001358992, %v188_v33  ;;  %v196_v34 = vmul.f32 -0.00019511016, %v188_v33 }
  0xcf   :  { %v336_v39 = vmul.f32 %v335_v13, %v333_v18 }
  0xd0   :  { %v190_v36 = vadd.f32 0.041655596, %v189_v14  ;;  %v197_v6 = vadd.f32 0.008332121, %v196_v34 }
  0xd1   :  { %v337_v37 = vxor.u32 2147483648, %v336_v39 }
  0xd2   :  { %v191_v48 = vmul.f32 %v190_v36, %v188_v33  ;;  %v198_v22 = vmul.f32 %v197_v6, %v188_v33 }
  0xd3   :  { %v338_v19 = vsel %vm217_vm14, %v337_v37, %v336_v39 }
  0xd4   :  { %v341_v50 = vsel %vm4138_vm13, %v4004_v16, %v338_v19  ;;  %v192_v52 = vadd.f32 -0.4999988, %v191_v48  ;;  %v199_v43 = vadd.f32 -0.16666654, %v198_v22 }
  0xd5   :  { %v343_v4 = vmul.f32 %v341_v50, %v341_v50 }
  0xd6   :  { %v193_v55 = vmul.f32 %v192_v52, %v188_v33  ;;  %v200_v56 = vmul.f32 %v199_v43, %v188_v33  ;;  %v360_v33 = vand.u32 3, %v359_v47  ;;  %v3568_v52 = vld [vmem:[%s5543_s1 + $0x18] sm:$0xff]  ;;  %v3567_v43 = vld [vmem:[%s5543_s1 + $0x10] sm:$0xff]  ;;  %v3811_v47 = vld [vmem:[%s5545_s3 + $0x28] sm:$0xff] }
  0xd7   :  { %v344_v46 = vmul.f32 -0.001358992, %v343_v4  ;;  %v351_v60 = vmul.f32 -0.00019511016, %v343_v4 }
  0xd8   :  { %v194_v61 = vadd.f32 1.0, %v193_v55  ;;  %v201_v63 = vadd.f32 1.0, %v200_v56  ;;  %vm362_vm3 = vcmp.eq.s32.totalorder %v360_v33, 0  ;;  %vm365_vm4 = vcmp.eq.s32.totalorder %v360_v33, 2  ;;  %v3582_v55 = vld [vmem:[%s5544_s2 + $0x28] sm:$0xff] }
  0xd9   :  { %v345_v1 = vadd.f32 0.041655596, %v344_v46  ;;  %v352_v3 = vadd.f32 0.008332121, %v351_v60  ;;  %vm361_vm6 = vcmp.lt.s32.totalorder %v360_v33, 2 }
  0xda   :  { %v202_v59 = vmul.f32 %v201_v63, %v186_v12  ;;  %v211_v58 = vxor.u32 2147483648, %v194_v61 }
  0xdb   :  { %v346_v0 = vmul.f32 %v345_v1, %v343_v4  ;;  %v353_v15 = vmul.f32 %v352_v3, %v343_v4 }
  0xdc   :  { %v208_v21 = vxor.u32 2147483648, %v202_v59  ;;  %v212_v27 = vsel %vm210_vm1, %v211_v58, %v202_v59 }
  0xdd   :  { %v347_v24 = vadd.f32 -0.4999988, %v346_v0  ;;  %v354_v51 = vadd.f32 -0.16666654, %v353_v15  ;;  %v3803_v15 = vld [vmem:[%s5545_s3] sm:$0xff] }
  0xde   :  { %v209_v57 = vsel %vm207_vm0, %v194_v61, %v208_v21  ;;  %v3806_v61 = vld [vmem:[%s5545_s3 + $0x8] sm:$0xff]  ;;  %v3807_v21 = vld [vmem:[%s5545_s3 + $0x10] sm:$0xff] }
  0xdf   :  { %v348_v25 = vmul.f32 %v347_v24, %v343_v4  ;;  %v355_v29 = vmul.f32 %v354_v51, %v343_v4  ;;  %v213_v30 = vsel %vm206_vm15, %v209_v57, %v212_v27  ;;  %v984_v4 = vld [vmem:[%s5548_s6] sm:$0xff]  ;;  %v3570_v27 = vld [vmem:[%s5544_s2 + $0x18] sm:$0xff] }
  0xe0   :  { %v214_v31 = vsel %vm203_vm2, nan, %v213_v30  ;;  %v624_v57 = vld [vmem:[%s5546_s4] sm:$0xff]  ;;  %v985_v30 = vld [vmem:[%s5548_s6 + $0x8] sm:$0xff] }
  0xe1   :  { %v349_v17 = vadd.f32 1.0, %v348_v25  ;;  %v356_v23 = vadd.f32 1.0, %v355_v29  ;;  %v370_v12 = vmul.f32 %v214_v31, %v214_v31  ;;  %v3808_v25 = vld [vmem:[%s5545_s3 + $0x18] sm:$0xff]  ;;  %v3812_v29 = vld [vmem:[%s5545_s3 + $0x30] sm:$0xff] }
  0xe3   :  { %v357_v18 = vmul.f32 %v356_v23, %v341_v50  ;;  %v366_v13 = vxor.u32 2147483648, %v349_v17  ;;  %v382_v9 = vmul.f32 %v375_v42, %v370_v12  ;;  %v3581_v42 = vld [vmem:[%s5544_s2 + $0x20] sm:$0xff] }
  0xe5   :  { %v363_v14 = vxor.u32 2147483648, %v357_v18  ;;  %v384_v34 = vadd.f32 %v382_v9, %v3989_v5  ;;  %v367_v8 = vsel %vm365_vm4, %v366_v13, %v357_v18 }
  0xe7   :  { %v364_v39 = vsel %vm362_vm3, %v349_v17, %v363_v14  ;;  %v386_v7 = vpack.c.bf16 %v384_v34, %v384_v34 }
  0xe8   :  { %v368_v36 = vsel %vm361_vm6, %v364_v39, %v367_v8 }
  0xe9   :  { %v369_v6 = vsel %vm358_vm7, nan, %v368_v36  ;;  %389 = vst.msk [vmem:[#allocation2 + $0x4] sm:$0xf] %vm388_vm5, %v386_v7 }
  0xea   :  { %v371_v37 = vmul.f32 %v369_v6, %v369_v6 }
  0xec   :  { %v383_v44 = vmul.f32 %v380_v40, %v371_v37 }
  0xee   :  { %v385_v62 = vadd.f32 %v3999_v11, %v383_v44  ;;  %v625_v11 = vld [vmem:[%s5546_s4 + $0x8] sm:$0xff] }
  0xf0   :  { %v387_v45 = vpack.c.bf16 %v385_v62, %v385_v62  ;;  %v3804_v5 = vld [vmem:[#allocation2 + $0x4] sm:$0xf] }
  0xf1   :  { %v3543_v19 = vld [vmem:[#allocation2 + $0x4] sm:$0xf] }
  0xf2   :  { %390 = vst.msk [vmem:[#allocation2 + $0x10] sm:$0xf] %vm388_vm5, %v387_v45 }
  0xf9   :  { %v3518_v48 = vld [vmem:[#allocation2 + $0xc] sm:$0xf0] }
  0xfa   :  { %v3521_v22 = vor.u32 %v3804_v5, %v3518_v48  ;;  %v3809_v16 = vld [vmem:[#allocation2 + $0xc] sm:$0xf0] }
  0xfb   :  { %v3544_v50 = vor.u32 %v3809_v16, %v3543_v19 }
  0xfc   :  { %443 = vrot.lane.b32.xlu1 %v3521_v22, %s3902_s21  ;;  %475 = vrot.lane.b32.xlu0 %v3521_v22, %s3904_s23 }
  0xfd   :  { %413 = vrot.lane.b32.xlu2 %v3521_v22, %s3903_s22 }
 0x104   :  { %602 = vrot.lane.b32.xlu1 %v3544_v50, %s3905_s24  ;;  %572 = vrot.lane.b32.xlu0 %v3544_v50, %s3906_s25 }
 0x105   :  { %473 = vrot.lane.b32.xlu2 %v4148_v49, %s3904_s23  ;;  %v3569_v49 = vld [vmem:[%s5544_s2 + $0x10] sm:$0xff] }
 0x10c   :  { %633 = vperm.xlu1 %3865, %v625_v11   ;;  %651 = vperm.xlu0 %3864, %v3568_v52  }
 0x10d   :  { %542 = vrot.lane.b32.xlu2 %v3544_v50, %s3907_s30 }
 0x114   :  { %646 = vperm.xlu1 %3865, %v3567_v43   ;;  %970 = vperm.xlu0 %3864, %v3569_v49  }
 0x115   :  { %628 = vperm.xlu2 %3866, %v624_v57  }
 0x117   :  { %v412_v56 = vpop.permute.xlu2 %411 }
 0x11c   :  { %988 = vperm.xlu1 %3865, %v984_v4   ;;  %1035 = vperm.xlu0 %3864, %v3579_v53  }
 0x11d   :  { %975 = vperm.xlu2 %3866, %v3570_v27  }
 0x124   :  { %1040 = vperm.xlu1 %3865, %v3580_v54   ;;  %1364 = vperm.xlu0 %3864, %v3582_v55  }
 0x125   :  { %993 = vperm.xlu2 %3866, %v985_v30  }
 0x12d   :  { %1359 = vperm.xlu2 %3866, %v3581_v42  }
 0x12f   :  { %v442_v1 = vpop.permute.xlu0 %441 }
 0x157   :  { %v414_v46 = vpop.permute.xlu2 %413 }
 0x158   :  { %v416_v60 = vsel %vm415_vm8, %v412_v56, %v414_v46 }
 0x159   :  { %429 = vmatpush.bf16.msra.mxu2 %v416_v60 }
 0x15c   :  { %3522 = vmatmul.msk.bf16.vlgmr.msra.gmra.mxu2 %vm418_vm9, %v3806_v61 }
 0x15f   :  { %v474_v63 = vpop.permute.xlu2 %473 }
 0x167   :  { %v543_v3 = vpop.permute.xlu2 %542 }
 0x168   :  { %555 = vmatpush.bf16.msra.mxu0 %v543_v3 }
 0x16b   :  { %3552 = vmatmul.msk.bf16.vlgmr.msra.gmra.mxu0 %vm418_vm9, %v3810_v20 }
 0x16e   :  { %v444_v10 = vpop.permute.xlu1 %443  ;;  %v476_v59 = vpop.permute.xlu0 %475 }
 0x16f   :  { %v446_v58 = vsel %vm445_vm10, %v442_v1, %v444_v10  ;;  %v478_v0 = vsel %vm477_vm11, %v474_v63, %v476_v59  ;;  %v629_v45 = vpop.permute.xlu2 %628 }
 0x170   :  { %458 = vmatpush.bf16.msra.mxu3 %v446_v58  ;;  %490 = vmatpush.bf16.msrb.mxu2 %v478_v0 }
 0x173   :  { %3527 = vmatmul.msk.bf16.vlgmr.msra.gmra.mxu3 %vm418_vm9, %v3803_v15  ;;  %3534 = vmatmul.msk.bf16.vlgmr.msrb.gmra.mxu2 %vm418_vm9, %v3807_v21 }
 0x174   :  { %525 = vmatpush.bf16.msrb.mxu3 %v3544_v50 }
 0x176   :  { %v603_v24 = vpop.permute.xlu1 %602  ;;  %v573_v51 = vpop.permute.xlu0 %572 }
 0x177   :  { %585 = vmatpush.bf16.msra.mxu1 %v573_v51  ;;  %615 = vmatpush.bf16.msra.mxu2 %v603_v24 }
 0x17a   :  { %3559 = vmatmul.msk.bf16.vlgmr.msra.gmra.mxu1 %vm418_vm9, %v3811_v47 }
 0x17e   :  { %v634_v9 = vpop.permute.xlu1 %633  ;;  %v652_v60 = vpop.permute.xlu0 %651 }
 0x183   :  { %3545 = vmatmul.msk.bf16.vlgmr.msrb.gmra.mxu3 %vm418_vm9, %v3808_v25  ;;  %3566 = vmatmul.msk.bf16.vlgmr.msra.gmra.mxu2 %vm418_vm9, %v3812_v29 }
 0x186   :  { %v647_v16 = vpop.permute.xlu1 %646 }
 0x1df   :  { %v431_v31 = vpop.f32.mrf.mxu2 }
 0x1e7   :  { %v433_v17 = vpop.f32.mrf.mxu2 }
 0x1e8   :  { %v557_v34 = vpop.f32.mrf.mxu0 }
 0x1f0   :  { %v559_v19 = vpop.f32.mrf.mxu0 }
 0x1f6   :  { %v460_v23 = vpop.f32.mrf.mxu3  ;;  %v492_v12 = vpop.f32.mrf.mxu2 }
 0x1f7   :  { %v461_v13 = vadd.f32 %v460_v23, %v431_v31  ;;  %v587_v7 = vpop.f32.mrf.mxu1 }
 0x1f9   :  { %v497_v14 = vadd.f32 %v492_v12, %v461_v13 }
 0x1fe   :  { %v462_v33 = vpop.f32.mrf.mxu3  ;;  %v494_v18 = vpop.f32.mrf.mxu2 }
 0x1ff   :  { %v463_v36 = vadd.f32 %v462_v33, %v433_v17  ;;  %v589_v52 = vpop.f32.mrf.mxu1 }
 0x201   :  { %v498_v44 = vadd.f32 %v494_v18, %v463_v36 }
 0x206   :  { %v527_v39 = vpop.f32.mrf.mxu3  ;;  %v617_v37 = vpop.f32.mrf.mxu2 }
 0x207   :  { %v532_v8 = vadd.f32 %v527_v39, %v497_v14 }
 0x209   :  { %v562_v6 = vadd.f32 %v557_v34, %v532_v8 }
 0x20b   :  { %v592_v40 = vadd.f32 %v587_v7, %v562_v6 }
 0x20d   :  { %v622_v62 = vadd.f32 %v617_v37, %v592_v40 }
 0x20e   :  { %v529_v5 = vpop.f32.mrf.mxu3  ;;  %v619_v4 = vpop.f32.mrf.mxu2 }
 0x20f   :  { %v4240_v48 = vadd.f32 %v629_v45, %v622_v62  ;;  %v533_v22 = vadd.f32 %v529_v5, %v498_v44 }
 0x211   :  { %v4243_v50 = vmul.f32 %v647_v16, %v4240_v48  ;;  %v563_v11 = vadd.f32 %v559_v19, %v533_v22 }
 0x213   :  { %v659_v43 = vand.u32 2139095040, %v4243_v50  ;;  %v593_v49 = vadd.f32 %v589_v52, %v563_v11  ;;  %v656_v55 = vand.u32 2147483647, %v4243_v50 }
 0x215   :  { %v660_v53 = vshrl.u32 %v659_v43, 23  ;;  %v623_v54 = vadd.f32 %v619_v4, %v593_v49  ;;  %v663_v1 = vand.u32 8388607, %v656_v55 }
 0x217   :  { %v3571_v56 = vadd.s32 4294967169, %v660_v53  ;;  %v4247_v46 = vadd.f32 %v634_v9, %v623_v54  ;;  %v664_v58 = vor.u32 8388608, %v663_v1 }
 0x219   :  { %v666_v61 = vadd.s32 1, %v3571_v56  ;;  %v4250_v63 = vmul.f32 %v652_v60, %v4247_v46  ;;  %v4273_v14 = vshll.u32 %v664_v58, 8 }
 0x21b   :  { %vm667_vm12 = vcmp.gt.s32.totalorder %v666_v61, 0  ;;  %v811_v20 = vand.u32 2147483647, %v4250_v63  ;;  %v814_v10 = vand.u32 2139095040, %v4250_v63  ;;  %v705_v45 = vand.u32 65535, %v4273_v14 }
 0x21c   :  { %v668_v3 = vsel %vm667_vm12, %v666_v61, 0  ;;  %v706_v53 = vshrl.u32 %v4273_v14, 16 }
 0x21d   :  { %v670_v59 = vand.u32 31, %v668_v3  ;;  %v815_v15 = vshrl.u32 %v814_v10, 23  ;;  %v4256_v21 = vshrl.u32 %v668_v3, 5  ;;  %v818_v47 = vand.u32 8388607, %v811_v20 }
 0x21f   :  { %v671_v0 = vsub.s32 32, %v670_v59  ;;  %v673_v24 = vshll.u32 %v3896_v26, %v670_v59  ;;  %v676_v51 = vshll.u32 %v3897_v28, %v670_v59  ;;  %v679_v25 = vshll.u32 %v3898_v32, %v670_v59 }
 0x220   :  { %v682_v30 = vshll.u32 %v3899_v35, %v670_v59  ;;  %v685_v31 = vshll.u32 %v3900_v38, %v670_v59  ;;  %v3574_v18 = vadd.s32 4294967169, %v815_v15  ;;  %vm688_vm13 = vcmp.lt.s32.totalorder %v4256_v21, 1 }
 0x221   :  { %v674_v57 = vshrl.u32 %v3897_v28, %v671_v0  ;;  %v677_v27 = vshrl.u32 %v3898_v32, %v671_v0  ;;  %v680_v29 = vshrl.u32 %v3899_v35, %v671_v0  ;;  %v683_v42 = vshrl.u32 %v3900_v38, %v671_v0 }
 0x222   :  { %v686_v17 = vshrl.u32 %v3901_v41, %v671_v0  ;;  %vm690_vm14 = vcmp.lt.s32.totalorder %v4256_v21, 3  ;;  %vm691_vm15 = vcmp.lt.s32.totalorder %v4256_v21, 4  ;;  %v819_v36 = vor.u32 8388608, %v818_v47 }
 0x223   :  { %v675_v23 = vor.u32 %v674_v57, %v673_v24  ;;  %v4270_v12 = vor.u32 %v677_v27, %v676_v51  ;;  %v681_v33 = vor.u32 %v680_v29, %v679_v25  ;;  %v684_v13 = vor.u32 %v683_v42, %v682_v30 }
 0x224   :  { %v687_v9 = vor.u32 %v686_v17, %v685_v31  ;;  %v821_v6 = vadd.s32 1, %v3574_v18  ;;  %vm689_vm0 = vcmp.lt.s32.totalorder %v4256_v21, 2  ;;  %v672_v16 = vshrl.u32 %v3896_v26, %v671_v0 }
 0x225   :  { %v696_v34 = vsel %vm688_vm13, %v675_v23, %v4270_v12  ;;  %v700_v39 = vsel %vm688_vm13, %v4270_v12, %v681_v33  ;;  %v697_v8 = vsel %vm691_vm15, %v684_v13, 920167782  ;;  %v4300_v11 = vshll.u32 %v819_v36, 8 }
 0x226   :  { %v701_v7 = vsel %vm691_vm15, %v687_v9, 1326507024  ;;  %v698_v37 = vsel %vm690_vm14, %v681_v33, %v697_v8  ;;  %vm822_vm1 = vcmp.gt.s32.totalorder %v821_v6, 0  ;;  %v4307_v49 = vsel %vm688_vm13, %v672_v16, %v675_v23 }
 0x227   :  { %v702_v40 = vsel %vm690_vm14, %v684_v13, %v701_v7  ;;  %v4294_v44 = vsel %vm689_vm0, %v696_v34, %v698_v37  ;;  %v823_v19 = vsel %vm822_vm1, %v821_v6, 0  ;;  %v4311_v4 = vsel %vm691_vm15, %v681_v33, 2102212464 }
 0x228   :  { %v703_v62 = vsel %vm689_vm0, %v700_v39, %v702_v40  ;;  %v729_v43 = vand.u32 65535, %v4294_v44  ;;  %v730_v60 = vshrl.u32 %v4294_v44, 16  ;;  %v825_v61 = vand.u32 31, %v823_v19 }
 0x229   :  { %v707_v5 = vand.u32 65535, %v703_v62  ;;  %v708_v22 = vshrl.u32 %v703_v62, 16  ;;  %v4319_v10 = vand.u32 65535, %v4300_v11  ;;  %v4322_v59 = vshrl.u32 %v4300_v11, 16 }
 0x22a   :  { %v4324_v58 = vmul.u32 %v729_v43, %v705_v45  ;;  %v4326_v0 = vshrl.u32 %v823_v19, 5  ;;  %v826_v15 = vsub.s32 32, %v825_v61  ;;  %v828_v47 = vshll.u32 %v3896_v26, %v825_v61 }
 0x22b   :  { %v4302_v52 = vmul.u32 %v708_v22, %v705_v45  ;;  %v709_v54 = vmul.u32 %v707_v5, %v705_v45  ;;  %v4316_v1 = vmul.u32 %v707_v5, %v706_v53  ;;  %v712_v3 = vmul.u32 %v708_v22, %v706_v53 }
 0x22c   :  { %v831_v57 = vshll.u32 %v3897_v28, %v825_v61  ;;  %v829_v27 = vshrl.u32 %v3897_v28, %v826_v15  ;;  %v832_v25 = vshrl.u32 %v3898_v32, %v826_v15  ;;  %v834_v29 = vshll.u32 %v3898_v32, %v825_v61 }
 0x22d   :  { %v713_v56 = vshll.u32 %v4302_v52, 16  ;;  %v837_v30 = vshll.u32 %v3899_v35, %v825_v61  ;;  %v835_v42 = vshrl.u32 %v3899_v35, %v826_v15  ;;  %v838_v31 = vshrl.u32 %v3900_v38, %v826_v15 }
 0x22e   :  { %v840_v17 = vshll.u32 %v3900_v38, %v825_v61  ;;  %v841_v23 = vshrl.u32 %v3901_v41, %v826_v15  ;;  %v715_v33 = vshll.u32 %v4316_v1, 16  ;;  %v4340_v13 = vor.u32 %v829_v27, %v828_v47 }
 0x22f   :  { %vm717_vm2 = vc.u32 %v709_v54, %v713_v56  ;;  %v719_v51 = vadd.s32 %v713_v56, %v709_v54  ;;  %v4342_v9 = vor.u32 %v832_v25, %v831_v57  ;;  %v836_v34 = vor.u32 %v835_v42, %v834_v29 }
 0x230   :  { %v718_v24 = vsel %vm717_vm2, 1, %v3895_v2  ;;  %v839_v39 = vor.u32 %v838_v31, %v837_v30  ;;  %v842_v8 = vor.u32 %v841_v23, %v840_v17  ;;  %vm843_vm3 = vcmp.lt.s32.totalorder %v4326_v0, 1 }
 0x231   :  { %v720_v18 = vadd.s32 %v718_v24, %v712_v3  ;;  %v4345_v7 = vmul.u32 %v730_v60, %v705_v45  ;;  %vm846_vm4 = vcmp.lt.s32.totalorder %v4326_v0, 4  ;;  %v851_v36 = vsel %vm843_vm3, %v4340_v13, %v4342_v9 }
 0x232   :  { %vm721_vm6 = vc.u32 %v719_v51, %v715_v33  ;;  %vm845_vm7 = vcmp.lt.s32.totalorder %v4326_v0, 3  ;;  %v852_v6 = vsel %vm846_vm4, %v839_v39, 920167782  ;;  %v855_v37 = vsel %vm843_vm3, %v4342_v9, %v836_v34 }
 0x233   :  { %v856_v40 = vsel %vm846_vm4, %v842_v8, 1326507024  ;;  %vm844_vm8 = vcmp.lt.s32.totalorder %v4326_v0, 2  ;;  %v853_v44 = vsel %vm845_vm7, %v836_v34, %v852_v6  ;;  %v722_v45 = vsel %vm721_vm6, 1, %v3895_v2 }
 0x234   :  { %v857_v62 = vsel %vm845_vm7, %v839_v39, %v856_v40  ;;  %v4366_v5 = vmul.u32 %v729_v43, %v706_v53  ;;  %v854_v22 = vsel %vm844_vm8, %v851_v36, %v853_v44  ;;  %v724_v19 = vadd.s32 %v722_v45, %v720_v18 }
 0x235   :  { %v858_v16 = vsel %vm844_vm8, %v855_v37, %v857_v62  ;;  %v884_v61 = vand.u32 65535, %v854_v22  ;;  %v885_v3 = vshrl.u32 %v854_v22, 16  ;;  %v734_v24 = vmul.u32 %v730_v60, %v706_v53 }
 0x236   :  { %v862_v54 = vand.u32 65535, %v858_v16  ;;  %v863_v56 = vshrl.u32 %v858_v16, 16  ;;  %v714_v51 = vshrl.u32 %v4302_v52, 16  ;;  %v716_v47 = vshrl.u32 %v4316_v1, 16 }
 0x237   :  { %v735_v57 = vshll.u32 %v4345_v7, 16  ;;  %v827_v43 = vshrl.u32 %v3896_v26, %v826_v15  ;;  %v736_v29 = vshrl.u32 %v4345_v7, 16  ;;  %v848_v30 = vsel %vm846_vm4, %v836_v34, 2102212464 }
 0x238   :  { %v865_v27 = vmul.u32 %v863_v56, %v4319_v10  ;;  %v866_v25 = vmul.u32 %v862_v54, %v4322_v59  ;;  %v887_v42 = vmul.u32 %v885_v3, %v4319_v10  ;;  %v888_v53 = vmul.u32 %v884_v61, %v4322_v59 }
 0x239   :  { %v725_v52 = vadd.s32 %v724_v19, %v714_v51  ;;  %v864_v60 = vmul.u32 %v862_v54, %v4319_v10  ;;  %v867_v1 = vmul.u32 %v863_v56, %v4322_v59  ;;  %v737_v15 = vshll.u32 %v4366_v5, 16 }
 0x23a   :  { %v868_v31 = vshll.u32 %v865_v27, 16  ;;  %v870_v17 = vshll.u32 %v866_v25, 16  ;;  %v886_v23 = vmul.u32 %v884_v61, %v4319_v10  ;;  %v889_v33 = vmul.u32 %v885_v3, %v4322_v59 }
 0x23b   :  { %v890_v18 = vshll.u32 %v887_v42, 16  ;;  %v892_v39 = vshll.u32 %v888_v53, 16  ;;  %vm739_vm13 = vc.u32 %v4324_v58, %v735_v57  ;;  %v741_v10 = vadd.s32 %v735_v57, %v4324_v58 }
 0x23c   :  { %vm872_vm12 = vc.u32 %v864_v60, %v868_v31  ;;  %v874_v34 = vadd.s32 %v868_v31, %v864_v60  ;;  %v740_v36 = vsel %vm739_vm13, 1, %v3895_v2  ;;  %v869_v40 = vshrl.u32 %v865_v27, 16 }
 0x23d   :  { %v873_v8 = vsel %vm872_vm12, 1, %v3895_v2  ;;  %vm894_vm15 = vc.u32 %v886_v23, %v890_v18  ;;  %v896_v7 = vadd.s32 %v890_v18, %v886_v23  ;;  %v742_v22 = vadd.s32 %v740_v36, %v734_v24 }
 0x23e   :  { %v875_v6 = vadd.s32 %v873_v8, %v867_v1  ;;  %vm876_vm1 = vc.u32 %v874_v34, %v870_v17  ;;  %v895_v37 = vsel %vm894_vm15, 1, %v3895_v2  ;;  %vm743_vm4 = vc.u32 %v741_v10, %v737_v15 }
 0x23f   :  { %v877_v59 = vsel %vm876_vm1, 1, %v3895_v2  ;;  %v897_v44 = vadd.s32 %v895_v37, %v889_v33  ;;  %vm898_vm2 = vc.u32 %v896_v7, %v892_v39  ;;  %v847_v16 = vsel %vm843_vm3, %v827_v43, %v4340_v13 }
 0x240   :  { %v879_v62 = vadd.s32 %v877_v59, %v875_v6  ;;  %v899_v45 = vsel %vm898_vm2, 1, %v3895_v2  ;;  %v891_v19 = vshrl.u32 %v887_v42, 16  ;;  %v744_v56 = vsel %vm743_vm4, 1, %v3895_v2 }
 0x241   :  { %v901_v54 = vadd.s32 %v899_v45, %v897_v44  ;;  %v849_v58 = vsel %vm845_vm7, %v4342_v9, %v848_v30  ;;  %v871_v61 = vshrl.u32 %v866_v25, 16  ;;  %v746_v51 = vadd.s32 %v744_v56, %v742_v22 }
 0x242   :  { %v880_v3 = vadd.s32 %v879_v62, %v869_v40  ;;  %v694_v24 = vsel %vm690_vm14, %v4270_v12, %v4311_v4  ;;  %v893_v57 = vshrl.u32 %v888_v53, 16  ;;  %v726_v60 = vadd.s32 %v725_v52, %v716_v47 }
 0x243   :  { %v902_v27 = vadd.s32 %v901_v54, %v891_v19  ;;  %v900_v43 = vadd.s32 %v896_v7, %v892_v39  ;;  %v738_v42 = vshrl.u32 %v4366_v5, 16  ;;  %v747_v1 = vadd.s32 %v746_v51, %v736_v29 }
 0x244   :  { %v881_v13 = vadd.s32 %v880_v3, %v871_v61  ;;  %v850_v31 = vsel %vm844_vm8, %v847_v16, %v849_v58  ;;  %v745_v25 = vadd.s32 %v741_v10, %v737_v15  ;;  %v695_v30 = vsel %vm689_vm0, %v4307_v49, %v694_v24 }
 0x245   :  { %v903_v9 = vadd.s32 %v902_v27, %v893_v57  ;;  %v748_v17 = vadd.s32 %v747_v1, %v738_v42  ;;  %v904_v4 = vmul.u32 %v4300_v11, %v850_v31  ;;  %v749_v53 = vmul.u32 %v4273_v14, %v695_v30 }
 0x246   :  { %vm906_vm3 = vc.u32 %v881_v13, %v900_v43  ;;  %vm751_vm14 = vc.u32 %v726_v60, %v745_v25  ;;  %v905_v59 = vadd.s32 %v900_v43, %v881_v13  ;;  %v750_v22 = vadd.s32 %v745_v25, %v726_v60 }
 0x247   :  { %v907_v12 = vadd.s32 1, %v903_v9  ;;  %v752_v47 = vadd.s32 1, %v748_v17  ;;  %vm813_vm12 = vcmp.lt.s32.totalorder %v4250_v63, 0  ;;  %vm658_vm13 = vcmp.lt.s32.totalorder %v4243_v50, 0 }
 0x248   :  { %vm4421_vm15 = vcmp.le.f32.partialorder %v811_v20, 0.7853982  ;;  %vm4430_vm1 = vcmp.le.f32.partialorder %v656_v55, 0.7853982  ;;  %vm954_vm2 = vweird.f32 %v4250_v63 }
 0x249   :  { %v908_v5 = vsel %vm906_vm3, %v907_v12, %v903_v9  ;;  %v753_v52 = vsel %vm751_vm14, %v752_v47, %v748_v17 }
 0x24a   :  { %v909_v29 = vadd.s32 %v908_v5, %v904_v4  ;;  %v754_v0 = vadd.s32 %v753_v52, %v749_v53 }
 0x24c   :  { %v910_v23 = vadd.s32 536870912, %v909_v29  ;;  %v755_v33 = vadd.s32 536870912, %v754_v0 }
 0x24e   :  { %v911_v15 = vshrl.u32 %v910_v23, 30  ;;  %v4414_v18 = vshrl.u32 %v755_v33, 30 }
 0x250   :  { %v912_v21 = vshll.u32 %v911_v15, 30  ;;  %v757_v49 = vshll.u32 %v4414_v18, 30  ;;  %v935_v53 = vsub.s32 4, %v911_v15  ;;  %v780_v20 = vsub.s32 4, %v4414_v18 }
 0x252   :  { %v913_v34 = vsub.s32 %v909_v29, %v912_v21  ;;  %v758_v39 = vsub.s32 %v754_v0, %v757_v49 }
 0x254   :  { %vm914_vm0 = vcmp.lt.s32.totalorder %v913_v34, 0  ;;  %v915_v8 = vsub.s32 0, %v913_v34  ;;  %vm759_vm6 = vcmp.lt.s32.totalorder %v758_v39, 0  ;;  %v760_v11 = vsub.s32 0, %v758_v39 }
 0x256   :  { %v916_v7 = vsel %vm914_vm0, %v915_v8, %v913_v34  ;;  %v761_v36 = vsel %vm759_vm6, %v760_v11, %v758_v39 }
 0x257   :  { %v917_v14 = vclz %v916_v7  ;;  %v762_v6 = vclz %v761_v36  ;;  %v781_v7 = vsel %vm658_vm13, %v780_v20, %v4414_v18 }
 0x259   :  { %v3575_v37 = vadd.s32 4294967294, %v917_v14  ;;  %v3572_v10 = vadd.s32 4294967294, %v762_v6 }
 0x25b   :  { %vm3576_vm7 = vcmp.lt.s32.totalorder %v3575_v37, 0  ;;  %vm3573_vm8 = vcmp.lt.s32.totalorder %v3572_v10, 0 }
 0x25c   :  { %v920_v40 = vsel %vm3576_vm7, 0, %v3575_v37  ;;  %v765_v45 = vsel %vm3573_vm8, 0, %v3572_v10  ;;  %vm799_vm8 = vweird.f32 %v4243_v50 }
 0x25d   :  { %v921_v44 = vsub.s32 32, %v920_v40  ;;  %v925_v62 = vsub.s32 4294967266, %v920_v40  ;;  %v766_v16 = vsub.s32 32, %v765_v45  ;;  %v770_v19 = vsub.s32 4294967266, %v765_v45 }
 0x25e   :  { %v922_v54 = vshll.u32 %v913_v34, %v920_v40  ;;  %v767_v61 = vshll.u32 %v758_v39, %v765_v45  ;;  %v936_v34 = vsel %vm813_vm12, %v935_v53, %v911_v15  ;;  %v783_v40 = vsel %vm4430_vm1, 0, %v781_v7 }
 0x25f   :  { %v923_v56 = vshrl.u32 %v905_v59, %v921_v44  ;;  %v926_v58 = vadd.s32 127, %v925_v62  ;;  %v768_v3 = vshrl.u32 %v750_v22, %v766_v16  ;;  %v771_v51 = vadd.s32 127, %v770_v19 }
 0x260   :  { %v938_v6 = vsel %vm4421_vm15, 0, %v936_v34  ;;  %v800_v18 = vadd.s32 3, %v783_v40 }
 0x261   :  { %v924_v24 = vor.u32 %v923_v56, %v922_v54  ;;  %v927_v57 = vshll.u32 %v926_v58, 23  ;;  %v769_v27 = vor.u32 %v768_v3, %v767_v61  ;;  %v772_v42 = vshll.u32 %v771_v51, 23 }
 0x262   :  { %v955_v45 = vadd.s32 3, %v938_v6 }
 0x263   :  { %v928_v1 = vor.u32 4788187, %v927_v57  ;;  %v773_v31 = vor.u32 4788187, %v772_v42  ;;  %v931_v13 = vcvt.s32.f32 %v924_v24  ;;  %v776_v30 = vcvt.s32.f32 %v769_v27 }
 0x264   :  { %v956_v51 = vand.u32 3, %v955_v45 }
 0x265   :  { %v929_v9 = vand.u32 2147483647, %v928_v1  ;;  %v774_v43 = vand.u32 2147483647, %v773_v31  ;;  %v801_v1 = vand.u32 3, %v800_v18 }
 0x266   :  { %vm957_vm4 = vcmp.lt.s32.totalorder %v956_v51, 2  ;;  %vm958_vm3 = vcmp.eq.s32.totalorder %v956_v51, 0  ;;  %vm961_vm14 = vcmp.eq.s32.totalorder %v956_v51, 2 }
 0x267   :  { %v932_v17 = vmul.f32 %v931_v13, %v929_v9  ;;  %v777_v60 = vmul.f32 %v776_v30, %v774_v43  ;;  %vm803_vm0 = vcmp.eq.s32.totalorder %v801_v1, 0  ;;  %vm806_vm6 = vcmp.eq.s32.totalorder %v801_v1, 2 }
 0x268   :  { %vm802_vm7 = vcmp.lt.s32.totalorder %v801_v1, 2 }
 0x269   :  { %v933_v25 = vxor.u32 2147483648, %v932_v17  ;;  %v778_v12 = vxor.u32 2147483648, %v777_v60 }
 0x26b   :  { %v934_v47 = vsel %vm813_vm12, %v933_v25, %v932_v17  ;;  %v779_v52 = vsel %vm658_vm13, %v778_v12, %v777_v60 }
 0x26c   :  { %v937_v5 = vsel %vm4421_vm15, %v4250_v63, %v934_v47  ;;  %v782_v23 = vsel %vm4430_vm1, %v4243_v50, %v779_v52  ;;  %v976_v63 = vpop.permute.xlu2 %975  ;;  %v971_v52 = vpop.permute.xlu0 %970  ;;  %v983_v50 = vld [vmem:[%s5547_s5 + $0x8] sm:$0xff] }
 0x26d   :  { %v939_v0 = vmul.f32 %v937_v5, %v937_v5  ;;  %v784_v33 = vmul.f32 %v782_v23, %v782_v23 }
 0x26f   :  { %v940_v21 = vmul.f32 -0.001358992, %v939_v0  ;;  %v947_v49 = vmul.f32 -0.00019511016, %v939_v0  ;;  %v785_v39 = vmul.f32 -0.001358992, %v784_v33 }
 0x270   :  { %v792_v8 = vmul.f32 -0.00019511016, %v784_v33 }
 0x271   :  { %v941_v55 = vadd.f32 0.041655596, %v940_v21  ;;  %v948_v11 = vadd.f32 0.008332121, %v947_v49  ;;  %v786_v14 = vadd.f32 0.041655596, %v785_v39  ;;  %v989_v49 = vpop.permute.xlu1 %988 }
 0x272   :  { %v793_v36 = vadd.f32 0.008332121, %v792_v8  ;;  %v982_v21 = vld [vmem:[%s5547_s5] sm:$0xff] }
 0x273   :  { %v942_v37 = vmul.f32 %v941_v55, %v939_v0  ;;  %v949_v10 = vmul.f32 %v948_v11, %v939_v0  ;;  %v787_v59 = vmul.f32 %v786_v14, %v784_v33 }
 0x274   :  { %v794_v15 = vmul.f32 %v793_v36, %v784_v33  ;;  %v1036_v8 = vpop.permute.xlu0 %1035  ;;  %v994_v14 = vpop.permute.xlu2 %993 }
 0x275   :  { %v943_v44 = vadd.f32 -0.4999988, %v942_v37  ;;  %v950_v62 = vadd.f32 -0.16666654, %v949_v10  ;;  %v788_v22 = vadd.f32 -0.4999988, %v787_v59 }
 0x276   :  { %v795_v16 = vadd.f32 -0.16666654, %v794_v15  ;;  %v3868_v15 = vld [vmem:[%s5542_s0 + $0x8] sm:$0xff] }
 0x277   :  { %v944_v19 = vmul.f32 %v943_v44, %v939_v0  ;;  %v951_v54 = vmul.f32 %v950_v62, %v939_v0  ;;  %v789_v56 = vmul.f32 %v788_v22, %v784_v33 }
 0x278   :  { %v796_v58 = vmul.f32 %v795_v16, %v784_v33 }
 0x279   :  { %v945_v61 = vadd.f32 1.0, %v944_v19  ;;  %v952_v3 = vadd.f32 1.0, %v951_v54  ;;  %v790_v24 = vadd.f32 1.0, %v789_v56  ;;  %v1041_v62 = vpop.permute.xlu1 %1040 }
 0x27a   :  { %v797_v57 = vadd.f32 1.0, %v796_v58 }
 0x27b   :  { %v953_v27 = vmul.f32 %v952_v3, %v937_v5  ;;  %v962_v42 = vxor.u32 2147483648, %v945_v61  ;;  %v807_v9 = vxor.u32 2147483648, %v790_v24 }
 0x27c   :  { %v798_v31 = vmul.f32 %v797_v57, %v782_v23 }
 0x27d   :  { %v959_v13 = vxor.u32 2147483648, %v953_v27  ;;  %v963_v17 = vsel %vm961_vm14, %v962_v42, %v953_v27 }
 0x27e   :  { %v804_v43 = vxor.u32 2147483648, %v798_v31  ;;  %v808_v12 = vsel %vm806_vm6, %v807_v9, %v798_v31 }
 0x27f   :  { %v960_v30 = vsel %vm958_vm3, %v945_v61, %v959_v13 }
 0x280   :  { %v964_v60 = vsel %vm957_vm4, %v960_v30, %v963_v17  ;;  %v805_v25 = vsel %vm803_vm0, %v790_v24, %v804_v43 }
 0x281   :  { %v965_v4 = vsel %vm954_vm2, nan, %v964_v60  ;;  %v809_v47 = vsel %vm802_vm7, %v805_v25, %v808_v12 }
 0x282   :  { %v967_v53 = vmul.f32 %v965_v4, %v965_v4  ;;  %v810_v5 = vsel %vm799_vm8, nan, %v809_v47 }
 0x283   :  { %v966_v29 = vmul.f32 %v810_v5, %v810_v5 }
 0x284   :  { %v979_v0 = vmul.f32 %v976_v63, %v967_v53 }
 0x285   :  { %v978_v20 = vmul.f32 %v971_v52, %v966_v29 }
 0x286   :  { %v981_v23 = vadd.f32 %v979_v0, %v4247_v46 }
 0x287   :  { %v980_v33 = vadd.f32 %v978_v20, %v4240_v48  ;;  %v3867_v48 = vld [vmem:[%s5542_s0] sm:$0xff]  ;;  %s3908_s0 = smov 6  }
 0x288   :  { %1016 = vmatpush.msra.mxu3 %v981_v23 }
 0x28a   :  { %1017 = vmatpush.msra.mxu3 %v980_v33 }
 0x28b   :  { %3577 = vmatmul.msk.f32.vlgmr.msra.gmra.mxu3 %vm418_vm9, %v982_v21 }
 0x293   :  { %3578 = vmatmul.msk.f32.gmra.mxu3 %vm418_vm9, %v983_v50 }
 0x30e   :  { %v1019_v34 = vpop.f32.mrf.mxu3 }
 0x30f   :  { %v1020_v39 = vadd.f32 %v1019_v34, %v989_v49 }
 0x311   :  { %v4462_v46 = vadd.f32 %v3867_v48, %v1020_v39 }
 0x313   :  { %v4465_v55 = vmul.f32 %v1036_v8, %v4462_v46 }
 0x315   :  { %v1045_v11 = vand.u32 2147483647, %v4465_v55  ;;  %v1048_v7 = vand.u32 2139095040, %v4465_v55 }
 0x316   :  { %v1022_v36 = vpop.f32.mrf.mxu3 }
 0x317   :  { %v1049_v6 = vshrl.u32 %v1048_v7, 23  ;;  %v1052_v37 = vand.u32 8388607, %v1045_v11  ;;  %v1023_v10 = vadd.f32 %v1022_v36, %v994_v14 }
 0x319   :  { %v3583_v40 = vadd.s32 4294967169, %v1049_v6  ;;  %v1053_v59 = vor.u32 8388608, %v1052_v37  ;;  %v4474_v44 = vadd.f32 %v3868_v15, %v1023_v10 }
 0x31b   :  { %v1055_v45 = vadd.s32 1, %v3583_v40  ;;  %v4477_v22 = vmul.f32 %v1041_v62, %v4474_v44  ;;  %v4479_v16 = vshll.u32 %v1053_v59, 8 }
 0x31d   :  { %vm1056_vm12 = vcmp.gt.s32.totalorder %v1055_v45, 0  ;;  %v1200_v54 = vand.u32 2147483647, %v4477_v22  ;;  %v1203_v18 = vand.u32 2139095040, %v4477_v22  ;;  %v1094_v61 = vand.u32 65535, %v4479_v16 }
 0x31e   :  { %v1057_v19 = vsel %vm1056_vm12, %v1055_v45, 0  ;;  %v1095_v3 = vshrl.u32 %v4479_v16, 16 }
 0x31f   :  { %v1059_v56 = vand.u32 31, %v1057_v19  ;;  %v1204_v51 = vshrl.u32 %v1203_v18, 23  ;;  %v1058_v24 = vshrl.u32 %v1057_v19, 5  ;;  %v4489_v42 = vand.u32 8388607, %v1200_v54 }
 0x321   :  { %v1060_v58 = vsub.s32 32, %v1059_v56  ;;  %v1062_v57 = vshll.u32 %v3896_v26, %v1059_v56  ;;  %v1065_v27 = vshll.u32 %v3897_v28, %v1059_v56  ;;  %v1068_v9 = vshll.u32 %v3898_v32, %v1059_v56 }
 0x322   :  { %v1071_v43 = vshll.u32 %v3899_v35, %v1059_v56  ;;  %v1074_v17 = vshll.u32 %v3900_v38, %v1059_v56  ;;  %v3586_v47 = vadd.s32 4294967169, %v1204_v51  ;;  %vm1077_vm13 = vcmp.lt.s32.totalorder %v1058_v24, 1 }
 0x323   :  { %v1063_v1 = vshrl.u32 %v3897_v28, %v1060_v58  ;;  %v1066_v31 = vshrl.u32 %v3898_v32, %v1060_v58  ;;  %v1069_v13 = vshrl.u32 %v3899_v35, %v1060_v58  ;;  %v1072_v30 = vshrl.u32 %v3900_v38, %v1060_v58 }
 0x324   :  { %v1075_v60 = vshrl.u32 %v3901_v41, %v1060_v58  ;;  %vm1080_vm15 = vcmp.lt.s32.totalorder %v1058_v24, 4  ;;  %v1061_v63 = vshrl.u32 %v3896_v26, %v1060_v58  ;;  %vm1079_vm1 = vcmp.lt.s32.totalorder %v1058_v24, 3 }
 0x325   :  { %v1064_v25 = vor.u32 %v1063_v1, %v1062_v57  ;;  %v1067_v12 = vor.u32 %v1066_v31, %v1065_v27  ;;  %v1070_v4 = vor.u32 %v1069_v13, %v1068_v9  ;;  %v1073_v53 = vor.u32 %v1072_v30, %v1071_v43 }
 0x326   :  { %v1076_v5 = vor.u32 %v1075_v60, %v1074_v17  ;;  %v1210_v33 = vadd.s32 1, %v3586_v47  ;;  %vm1078_vm2 = vcmp.lt.s32.totalorder %v1058_v24, 2  ;;  %v1208_v6 = vor.u32 8388608, %v4489_v42 }
 0x327   :  { %v1082_v29 = vsel %vm1080_vm15, %v1070_v4, 2102212464  ;;  %v1085_v52 = vsel %vm1077_vm13, %v1064_v25, %v1067_v12  ;;  %v1089_v0 = vsel %vm1077_vm13, %v1067_v12, %v1070_v4  ;;  %v1086_v20 = vsel %vm1080_vm15, %v1073_v53, 920167782 }
 0x328   :  { %v1090_v23 = vsel %vm1080_vm15, %v1076_v5, 1326507024  ;;  %v1081_v21 = vsel %vm1077_vm13, %v1061_v63, %v1064_v25  ;;  %v1087_v50 = vsel %vm1079_vm1, %v1070_v4, %v1086_v20  ;;  %v1083_v34 = vsel %vm1079_vm1, %v1067_v12, %v1082_v29 }
 0x329   :  { %v1091_v49 = vsel %vm1079_vm1, %v1073_v53, %v1090_v23  ;;  %v1088_v39 = vsel %vm1078_vm2, %v1085_v52, %v1087_v50  ;;  %vm1211_vm4 = vcmp.gt.s32.totalorder %v1210_v33, 0  ;;  %v4501_v37 = vsel %vm1078_vm2, %v1081_v21, %v1083_v34 }
 0x32a   :  { %v1092_v48 = vsel %vm1078_vm2, %v1089_v0, %v1091_v49  ;;  %v1118_v14 = vand.u32 65535, %v1088_v39  ;;  %v1119_v36 = vshrl.u32 %v1088_v39, 16  ;;  %v1212_v59 = vsel %vm1211_vm4, %v1210_v33, 0 }
 0x32b   :  { %v1096_v8 = vand.u32 65535, %v1092_v48  ;;  %v1097_v7 = vshrl.u32 %v1092_v48, 16  ;;  %v1214_v9 = vand.u32 31, %v1212_v59  ;;  %v4508_v12 = vshrl.u32 %v1212_v59, 5 }
 0x32c   :  { %v1121_v45 = vmul.u32 %v1119_v36, %v1094_v61  ;;  %v1122_v19 = vmul.u32 %v1118_v14, %v1095_v3  ;;  %v1120_v58 = vmul.u32 %v1118_v14, %v1094_v61  ;;  %v1123_v51 = vmul.u32 %v1119_v36, %v1095_v3 }
 0x32d   :  { %v1099_v10 = vmul.u32 %v1097_v7, %v1094_v61  ;;  %v1100_v40 = vmul.u32 %v1096_v8, %v1095_v3  ;;  %v1098_v15 = vmul.u32 %v1096_v8, %v1094_v61  ;;  %v1101_v62 = vmul.u32 %v1097_v7, %v1095_v3 }
 0x32e   :  { %v1124_v27 = vshll.u32 %v1121_v45, 16  ;;  %v1125_v1 = vshrl.u32 %v1121_v45, 16  ;;  %v1126_v42 = vshll.u32 %v1122_v19, 16  ;;  %v1127_v43 = vshrl.u32 %v1122_v19, 16 }
 0x32f   :  { %v1102_v18 = vshll.u32 %v1099_v10, 16  ;;  %v1103_v56 = vshrl.u32 %v1099_v10, 16  ;;  %v1104_v24 = vshll.u32 %v1100_v40, 16  ;;  %v1105_v57 = vshrl.u32 %v1100_v40, 16 }
 0x330   :  { %vm1128_vm14 = vc.u32 %v1120_v58, %v1124_v27  ;;  %v1130_v30 = vadd.s32 %v1124_v27, %v1120_v58  ;;  %v4505_v25 = vsub.s32 32, %v1214_v9  ;;  %v1217_v5 = vshll.u32 %v3896_v26, %v1214_v9 }
 0x331   :  { %vm1106_vm3 = vc.u32 %v1098_v15, %v1102_v18  ;;  %v1108_v31 = vadd.s32 %v1102_v18, %v1098_v15  ;;  %v1129_v60 = vsel %vm1128_vm14, 1, %v3895_v2  ;;  %v1220_v52 = vshll.u32 %v3897_v28, %v1214_v9 }
 0x332   :  { %v1107_v13 = vsel %vm1106_vm3, 1, %v3895_v2  ;;  %v1131_v3 = vadd.s32 %v1129_v60, %v1123_v51  ;;  %vm1132_vm6 = vc.u32 %v1130_v30, %v1126_v42  ;;  %v4511_v53 = vadd.s32 %v1130_v30, %v1126_v42 }
 0x333   :  { %v1109_v17 = vadd.s32 %v1107_v13, %v1101_v62  ;;  %vm1110_vm0 = vc.u32 %v1108_v31, %v1104_v24  ;;  %v1133_v47 = vsel %vm1132_vm6, 1, %v3895_v2  ;;  %v1218_v29 = vshrl.u32 %v3897_v28, %v4505_v25 }
 0x334   :  { %v1111_v61 = vsel %vm1110_vm0, 1, %v3895_v2  ;;  %v1135_v63 = vadd.s32 %v1133_v47, %v1131_v3  ;;  %v1221_v0 = vshrl.u32 %v3898_v32, %v4505_v25  ;;  %v1223_v23 = vshll.u32 %v3898_v32, %v1214_v9 }
 0x335   :  { %v1113_v4 = vadd.s32 %v1111_v61, %v1109_v17  ;;  %v1224_v33 = vshrl.u32 %v3899_v35, %v4505_v25  ;;  %v1226_v21 = vshll.u32 %v3899_v35, %v1214_v9  ;;  %v4523_v49 = vor.u32 %v1218_v29, %v1217_v5 }
 0x336   :  { %v1136_v50 = vadd.s32 %v1135_v63, %v1125_v1  ;;  %v4525_v34 = vor.u32 %v1221_v0, %v1220_v52  ;;  %v1227_v39 = vshrl.u32 %v3900_v38, %v4505_v25  ;;  %v1229_v7 = vshll.u32 %v3900_v38, %v1214_v9 }
 0x337   :  { %v1114_v20 = vadd.s32 %v1113_v4, %v1103_v56  ;;  %v1225_v8 = vor.u32 %v1224_v33, %v1223_v23  ;;  %v1230_v14 = vshrl.u32 %v3901_v41, %v4505_v25  ;;  %vm1232_vm8 = vcmp.lt.s32.totalorder %v4508_v12, 1 }
 0x338   :  { %v1137_v36 = vadd.s32 %v1136_v50, %v1127_v43  ;;  %v1228_v10 = vor.u32 %v1227_v39, %v1226_v21  ;;  %v4537_v59 = vshll.u32 %v1208_v6, 8  ;;  %v1138_v15 = vmul.u32 %v4479_v16, %v4501_v37 }
 0x339   :  { %v4529_v48 = vadd.s32 %v1114_v20, %v1105_v57  ;;  %v1231_v40 = vor.u32 %v1230_v14, %v1229_v7  ;;  %vm1235_vm12 = vcmp.lt.s32.totalorder %v4508_v12, 4  ;;  %v1240_v45 = vsel %vm1232_vm8, %v4523_v49, %v4525_v34 }
 0x33a   :  { %v1141_v62 = vadd.s32 1, %v1137_v36  ;;  %vm1234_vm13 = vcmp.lt.s32.totalorder %v4508_v12, 3  ;;  %v1241_v19 = vsel %vm1235_vm12, %v1228_v10, 920167782  ;;  %v1244_v6 = vsel %vm1232_vm8, %v4525_v34, %v1225_v8 }
 0x33b   :  { %vm1140_vm7 = vc.u32 %v4529_v48, %v4511_v53  ;;  %v1245_v16 = vsel %vm1235_vm12, %v1231_v40, 1326507024  ;;  %vm1233_vm15 = vcmp.lt.s32.totalorder %v4508_v12, 2  ;;  %v1242_v18 = vsel %vm1234_vm13, %v1225_v8, %v1241_v19 }
 0x33c   :  { %v1142_v37 = vsel %vm1140_vm7, %v1141_v62, %v1137_v36  ;;  %v1246_v56 = vsel %vm1234_vm13, %v1228_v10, %v1245_v16  ;;  %v1243_v51 = vsel %vm1233_vm15, %v1240_v45, %v1242_v18  ;;  %v1249_v57 = vand.u32 65535, %v4537_v59 }
 0x33d   :  { %v1143_v58 = vadd.s32 %v1142_v37, %v1138_v15  ;;  %v1247_v24 = vsel %vm1233_vm15, %v1244_v6, %v1246_v56  ;;  %v1250_v27 = vshrl.u32 %v4537_v59, 16  ;;  %v1274_v42 = vshrl.u32 %v1243_v51, 16 }
 0x33e   :  { %v1251_v1 = vand.u32 65535, %v1247_v24  ;;  %v1252_v31 = vshrl.u32 %v1247_v24, 16  ;;  %v1273_v13 = vand.u32 65535, %v1243_v51  ;;  %v1237_v19 = vsel %vm1235_vm12, %v1225_v8, 2102212464 }
 0x33f   :  { %v1144_v9 = vadd.s32 536870912, %v1143_v58  ;;  %v1276_v60 = vmul.u32 %v1274_v42, %v1249_v57  ;;  %v1278_v7 = vmul.u32 %v1274_v42, %v1250_v27  ;;  %v1216_v16 = vshrl.u32 %v3896_v26, %v4505_v25 }
 0x340   :  { %v1254_v43 = vmul.u32 %v1252_v31, %v1249_v57  ;;  %v1255_v30 = vmul.u32 %v1251_v1, %v1250_v27  ;;  %v1253_v61 = vmul.u32 %v1251_v1, %v1249_v57  ;;  %v1256_v47 = vmul.u32 %v1252_v31, %v1250_v27 }
 0x341   :  { %v4565_v17 = vshrl.u32 %v1144_v9, 30  ;;  %v1275_v5 = vmul.u32 %v1273_v13, %v1249_v57  ;;  %v1279_v63 = vshll.u32 %v1276_v60, 16  ;;  %v1277_v0 = vmul.u32 %v1273_v13, %v1250_v27 }
 0x342   :  { %v1257_v3 = vshll.u32 %v1254_v43, 16  ;;  %v1259_v29 = vshll.u32 %v1255_v30, 16  ;;  %v1258_v33 = vshrl.u32 %v1254_v43, 16  ;;  %v1260_v37 = vshrl.u32 %v1255_v30, 16 }
 0x343   :  { %v1146_v4 = vshll.u32 %v4565_v17, 30  ;;  %vm1283_vm4 = vc.u32 %v1275_v5, %v1279_v63  ;;  %v1281_v36 = vshll.u32 %v1277_v0, 16  ;;  %v1285_v40 = vadd.s32 %v1279_v63, %v1275_v5 }
 0x344   :  { %vm1261_vm1 = vc.u32 %v1253_v61, %v1257_v3  ;;  %v1263_v52 = vadd.s32 %v1257_v3, %v1253_v61  ;;  %v1284_v10 = vsel %vm1283_vm4, 1, %v3895_v2  ;;  %v1236_v24 = vsel %vm1232_vm8, %v1216_v16, %v4523_v49  ;;  %v3599_v16 = vld [vmem:[#allocation2] sm:$0xf] }
 0x345   :  { %v1147_v20 = vsub.s32 %v1143_v58, %v1146_v4  ;;  %v1262_v23 = vsel %vm1261_vm1, 1, %v3895_v2  ;;  %v1286_v62 = vadd.s32 %v1284_v10, %v1278_v7  ;;  %vm1287_vm14 = vc.u32 %v1285_v40, %v1281_v36 }
 0x346   :  { %v1264_v21 = vadd.s32 %v1262_v23, %v1256_v47  ;;  %vm1265_vm2 = vc.u32 %v1263_v52, %v1259_v29  ;;  %v1288_v18 = vsel %vm1287_vm14, 1, %v3895_v2  ;;  %v1280_v58 = vshrl.u32 %v1276_v60, 16 }
 0x347   :  { %vm1148_vm3 = vcmp.lt.s32.totalorder %v1147_v20, 0  ;;  %v1149_v50 = vsub.s32 0, %v1147_v20  ;;  %v1266_v39 = vsel %vm1265_vm2, 1, %v3895_v2  ;;  %v1290_v51 = vadd.s32 %v1288_v18, %v1286_v62 }
 0x348   :  { %v1268_v14 = vadd.s32 %v1266_v39, %v1264_v21  ;;  %v1238_v57 = vsel %vm1234_vm13, %v4525_v34, %v1237_v19  ;;  %v1282_v27 = vshrl.u32 %v1277_v0, 16  ;;  %v1139_v25 = vadd.s32 %v4511_v53, %v4529_v48 }
 0x349   :  { %v1150_v15 = vsel %vm1148_vm3, %v1149_v50, %v1147_v20  ;;  %v1291_v1 = vadd.s32 %v1290_v51, %v1280_v58  ;;  %v1289_v42 = vadd.s32 %v1285_v40, %v1281_v36  ;;  %v1239_v43 = vsel %vm1233_vm15, %v1236_v24, %v1238_v57 }
 0x34a   :  { %v1151_v45 = vclz %v1150_v15  ;;  %v1269_v6 = vadd.s32 %v1268_v14, %v1258_v33  ;;  %v1293_v3 = vmul.u32 %v4537_v59, %v1239_v43  ;;  %vm1047_vm7 = vcmp.lt.s32.totalorder %v4465_v55, 0 }
 0x34b   :  { %v1292_v30 = vadd.s32 %v1291_v1, %v1282_v27  ;;  %vm4593_vm8 = vcmp.le.f32.partialorder %v1045_v11, 0.7853982  ;;  %v1169_v50 = vsub.s32 4, %v4565_v17  ;;  %vm1188_vm4 = vweird.f32 %v4465_v55 }
 0x34c   :  { %v3584_v56 = vadd.s32 4294967294, %v1151_v45  ;;  %v1270_v8 = vadd.s32 %v1269_v6, %v1260_v37  ;;  %v3815_v37 = vld [vmem:[#allocation2 + $0x8] sm:$0xf0]  ;;  %vm1202_vm3 = vcmp.lt.s32.totalorder %v4477_v22, 0  ;;  %vm4614_vm14 = vcmp.le.f32.partialorder %v1200_v54, 0.7853982 }
 0x34d   :  { %v1296_v34 = vadd.s32 1, %v1292_v30  ;;  %v1170_v10 = vsel %vm1047_vm7, %v1169_v50, %v4565_v17  ;;  %v4604_v58 = vor.u32 %v3815_v37, %v3599_v16 }
 0x34e   :  { %vm3585_vm0 = vcmp.lt.s32.totalorder %v3584_v56, 0  ;;  %vm1295_vm6 = vc.u32 %v1270_v8, %v1289_v42  ;;  %v1172_v6 = vsel %vm4593_vm8, 0, %v1170_v10  ;;  %v1294_v17 = vadd.s32 %v1289_v42, %v1270_v8 }
 0x34f   :  { %v1154_v31 = vsel %vm3585_vm0, 0, %v3584_v56  ;;  %v1297_v5 = vsel %vm1295_vm6, %v1296_v34, %v1292_v30  ;;  %1457 = vrot.lane.b32.xlu1 %v4604_v58, %s3902_s21  ;;  %1396 = vrot.lane.b32.xlu0 %v4604_v58, %s3908_s0  ;;  %v1189_v1 = vadd.s32 3, %v1172_v6 }
 0x350   :  { %v1155_v9 = vsub.s32 32, %v1154_v31  ;;  %v1159_v13 = vsub.s32 4294967266, %v1154_v31  ;;  %v1156_v49 = vshll.u32 %v1147_v20, %v1154_v31  ;;  %v1298_v63 = vadd.s32 %v1297_v5, %v1293_v3 }
 0x352   :  { %v1157_v60 = vshrl.u32 %v1139_v25, %v1155_v9  ;;  %v1160_v61 = vadd.s32 127, %v1159_v13  ;;  %v1299_v48 = vadd.s32 536870912, %v1298_v63 }
 0x354   :  { %v1158_v4 = vor.u32 %v1157_v60, %v1156_v49  ;;  %v1161_v47 = vshll.u32 %v1160_v61, 23  ;;  %v4587_v0 = vshrl.u32 %v1299_v48, 30  ;;  %v1190_v61 = vand.u32 3, %v1189_v1 }
 0x356   :  { %v1162_v53 = vor.u32 4788187, %v1161_v47  ;;  %v1165_v52 = vcvt.s32.f32 %v1158_v4  ;;  %v1301_v23 = vshll.u32 %v4587_v0, 30  ;;  %vm1192_vm15 = vcmp.eq.s32.totalorder %v1190_v61, 0 }
 0x357   :  { %vm1195_vm1 = vcmp.eq.s32.totalorder %v1190_v61, 2  ;;  %vm1191_vm2 = vcmp.lt.s32.totalorder %v1190_v61, 2 }
 0x358   :  { %v1163_v29 = vand.u32 2147483647, %v1162_v53  ;;  %v1302_v20 = vsub.s32 %v1298_v63, %v1301_v23 }
 0x35a   :  { %v1166_v12 = vmul.f32 %v1165_v52, %v1163_v29  ;;  %vm1303_vm12 = vcmp.lt.s32.totalorder %v1302_v20, 0  ;;  %v1304_v7 = vsub.s32 0, %v1302_v20 }
 0x35c   :  { %v1167_v33 = vxor.u32 2147483648, %v1166_v12  ;;  %v1305_v36 = vsel %vm1303_vm12, %v1304_v7, %v1302_v20  ;;  %vm1429_vm12 = vcmask 72704  }
 0x35d   :  { %v1306_v62 = vclz %v1305_v36 }
 0x35e   :  { %v1168_v21 = vsel %vm1047_vm7, %v1167_v33, %v1166_v12 }
 0x35f   :  { %v1171_v39 = vsel %vm4593_vm8, %v4465_v55, %v1168_v21  ;;  %v3587_v19 = vadd.s32 4294967294, %v1306_v62  ;;  %vm1343_vm8 = vweird.f32 %v4477_v22 }
 0x360   :  { %v1173_v14 = vmul.f32 %v1171_v39, %v1171_v39 }
 0x361   :  { %vm3588_vm13 = vcmp.lt.s32.totalorder %v3587_v19, 0 }
 0x362   :  { %v1174_v40 = vmul.f32 -0.001358992, %v1173_v14  ;;  %v1181_v15 = vmul.f32 -0.00019511016, %v1173_v14  ;;  %v1309_v51 = vsel %vm3588_vm13, 0, %v3587_v19  ;;  %vm1400_vm13 = vcmask 48128  }
 0x363   :  { %v1310_v27 = vsub.s32 32, %v1309_v51  ;;  %v1314_v25 = vsub.s32 4294967266, %v1309_v51  ;;  %v1311_v43 = vshll.u32 %v1302_v20, %v1309_v51  ;;  %v1360_v20 = vpop.permute.xlu2 %1359 }
 0x364   :  { %v1175_v11 = vadd.f32 0.041655596, %v1174_v40  ;;  %v1182_v45 = vadd.f32 0.008332121, %v1181_v15 }
 0x365   :  { %v1312_v13 = vshrl.u32 %v1294_v17, %v1310_v27  ;;  %v1315_v30 = vadd.s32 127, %v1314_v25 }
 0x366   :  { %v1176_v18 = vmul.f32 %v1175_v11, %v1173_v14  ;;  %v1183_v56 = vmul.f32 %v1182_v45, %v1173_v14 }
 0x367   :  { %v1313_v34 = vor.u32 %v1312_v13, %v1311_v43  ;;  %v1316_v8 = vshll.u32 %v1315_v30, 23  ;;  %v1365_v43 = vpop.permute.xlu0 %1364 }
 0x368   :  { %v1177_v24 = vadd.f32 -0.4999988, %v1176_v18  ;;  %v1184_v57 = vadd.f32 -0.16666654, %v1183_v56 }
 0x369   :  { %v1317_v4 = vor.u32 4788187, %v1316_v8  ;;  %v1320_v63 = vcvt.s32.f32 %v1313_v34 }
 0x36a   :  { %v1178_v31 = vmul.f32 %v1177_v24, %v1173_v14  ;;  %v1185_v9 = vmul.f32 %v1184_v57, %v1173_v14 }
 0x36b   :  { %v1318_v5 = vand.u32 2147483647, %v1317_v4 }
 0x36c   :  { %v1179_v49 = vadd.f32 1.0, %v1178_v31  ;;  %v1186_v60 = vadd.f32 1.0, %v1185_v9 }
 0x36d   :  { %v1321_v52 = vmul.f32 %v1320_v63, %v1318_v5  ;;  %v3654_v5 = vld [vmem:[%s5544_s2 + $0x30] sm:$0xff] }
 0x36e   :  { %v1187_v42 = vmul.f32 %v1186_v60, %v1171_v39  ;;  %v1196_v3 = vxor.u32 2147483648, %v1179_v49  ;;  %v1324_v39 = vsub.s32 4, %v4587_v0  ;;  %v3650_v63 = vld [vmem:[%s5546_s4 + $0x10] sm:$0xff] }
 0x36f   :  { %v1322_v33 = vxor.u32 2147483648, %v1321_v52 }
 0x370   :  { %v1193_v47 = vxor.u32 2147483648, %v1187_v42  ;;  %v1197_v48 = vsel %vm1195_vm1, %v1196_v3, %v1187_v42  ;;  %v1325_v15 = vsel %vm1202_vm3, %v1324_v39, %v4587_v0  ;;  %v3817_v39 = vld [vmem:[%s5545_s3 + $0x48] sm:$0xff] }
 0x371   :  { %v1323_v50 = vsel %vm1202_vm3, %v1322_v33, %v1321_v52  ;;  %v1327_v11 = vsel %vm4614_vm14, 0, %v1325_v15  ;;  %v3671_v52 = vld [vmem:[%s5544_s2 + $0x48] sm:$0xff]  ;;  %v3670_v33 = vld [vmem:[%s5544_s2 + $0x40] sm:$0xff] }
 0x372   :  { %v1194_v53 = vsel %vm1192_vm15, %v1179_v49, %v1193_v47  ;;  %v1326_v55 = vsel %vm4614_vm14, %v4477_v22, %v1323_v50  ;;  %v1344_v37 = vadd.s32 3, %v1327_v11  ;;  %v3653_v22 = vld [vmem:[%s5543_s1 + $0x38] sm:$0xff] }
 0x373   :  { %v1198_v29 = vsel %vm1191_vm2, %v1194_v53, %v1197_v48  ;;  %v1328_v14 = vmul.f32 %v1326_v55, %v1326_v55  ;;  %v3651_v47 = vld [vmem:[%s5546_s4 + $0x18] sm:$0xff]  ;;  %v3668_v53 = vld [vmem:[%s5543_s1 + $0x40] sm:$0xff]  ;;  %v3664_v48 = vld [vmem:[%s5548_s6 + $0x10] sm:$0xff] }
 0x374   :  { %v1199_v12 = vsel %vm1188_vm4, nan, %v1198_v29  ;;  %v1345_v57 = vand.u32 3, %v1344_v37  ;;  %v3655_v29 = vld [vmem:[%s5544_s2 + $0x38] sm:$0xff] }
 0x375   :  { %v1355_v23 = vmul.f32 %v1199_v12, %v1199_v12  ;;  %v1329_v10 = vmul.f32 -0.001358992, %v1328_v14  ;;  %v1336_v40 = vmul.f32 -0.00019511016, %v1328_v14  ;;  %v3669_v12 = vld [vmem:[%s5543_s1 + $0x48] sm:$0xff] }
 0x376   :  { %vm1347_vm0 = vcmp.eq.s32.totalorder %v1345_v57, 0  ;;  %vm1350_vm6 = vcmp.eq.s32.totalorder %v1345_v57, 2  ;;  %vm1346_vm7 = vcmp.lt.s32.totalorder %v1345_v57, 2 }
 0x377   :  { %v1367_v59 = vmul.f32 %v1360_v20, %v1355_v23  ;;  %v1330_v54 = vadd.f32 0.041655596, %v1329_v10  ;;  %v1337_v62 = vadd.f32 0.008332121, %v1336_v40  ;;  %v3665_v23 = vld [vmem:[%s5548_s6 + $0x18] sm:$0xff]  ;;  %v3818_v20 = vld [vmem:[%s5545_s3 + $0x50] sm:$0xff] }
 0x378   :  { %v3813_v40 = vld [vmem:[%s5545_s3 + $0x38] sm:$0xff] }
 0x379   :  { %v1369_v7 = vadd.f32 %v1367_v59, %v4462_v46  ;;  %v1331_v45 = vmul.f32 %v1330_v54, %v1328_v14  ;;  %v1338_v19 = vmul.f32 %v1337_v62, %v1328_v14  ;;  %v3816_v54 = vld [vmem:[%s5545_s3 + $0x40] sm:$0xff] }
 0x37b   :  { %v1371_v36 = vpack.c.bf16 %v1369_v7, %v1369_v7  ;;  %v1332_v6 = vadd.f32 -0.4999988, %v1331_v45  ;;  %v1339_v16 = vadd.f32 -0.16666654, %v1338_v19  ;;  %v3822_v19 = vld [vmem:[%s5545_s3 + $0x68] sm:$0xff] }
 0x37d   :  { %1373 = vst.msk [vmem:[#allocation2 + $0x4] sm:$0xf] %vm388_vm5, %v1371_v36  ;;  %v1333_v18 = vmul.f32 %v1332_v6, %v1328_v14  ;;  %v1340_v56 = vmul.f32 %v1339_v16, %v1328_v14  ;;  %v3821_v6 = vld [vmem:[%s5545_s3 + $0x60] sm:$0xff]  ;;  %v3820_v16 = vld [vmem:[%s5545_s3 + $0x58] sm:$0xff] }
 0x37f   :  { %v1334_v51 = vadd.f32 1.0, %v1333_v18  ;;  %v1341_v24 = vadd.f32 1.0, %v1340_v56 }
 0x381   :  { %v1342_v17 = vmul.f32 %v1341_v24, %v1326_v55  ;;  %v1351_v27 = vxor.u32 2147483648, %v1334_v51 }
 0x383   :  { %v1348_v0 = vxor.u32 2147483648, %v1342_v17  ;;  %v1352_v25 = vsel %vm1350_vm6, %v1351_v27, %v1342_v17 }
 0x384   :  { %v3626_v61 = vld [vmem:[#allocation2 + $0x4] sm:$0xf] }
 0x385   :  { %v1349_v1 = vsel %vm1347_vm0, %v1334_v51, %v1348_v0  ;;  %v3814_v8 = vld [vmem:[#allocation2 + $0x4] sm:$0xf] }
 0x386   :  { %v1353_v31 = vsel %vm1346_vm7, %v1349_v1, %v1352_v25 }
 0x387   :  { %v1354_v9 = vsel %vm1343_vm8, nan, %v1353_v31 }
 0x388   :  { %v1356_v13 = vmul.f32 %v1354_v9, %v1354_v9 }
 0x38a   :  { %v1368_v30 = vmul.f32 %v1365_v43, %v1356_v13 }
 0x38c   :  { %v1370_v49 = vadd.f32 %v1368_v30, %v4474_v44 }
 0x38e   :  { %v1372_v60 = vpack.c.bf16 %v1370_v49, %v1370_v49 }
 0x390   :  { %1374 = vst.msk [vmem:[#allocation2 + $0x10] sm:$0xf] %vm388_vm5, %v1372_v60 }
 0x397   :  { %v3819_v34 = vld [vmem:[#allocation2 + $0xc] sm:$0xf0] }
 0x398   :  { %v3601_v42 = vld [vmem:[#allocation2 + $0xc] sm:$0xf0]  ;;  %v3627_v3 = vor.u32 %v3819_v34, %v3626_v61 }
 0x399   :  { %v3604_v4 = vor.u32 %v3814_v8, %v3601_v42 }
 0x39a   :  { %1508 = vmatpush.bf16.msrb.mxu3 %v3627_v3 }
 0x39b   :  { %1427 = vrot.lane.b32.xlu0 %v3604_v4, %s3909_s16  ;;  %1398 = vrot.lane.b32.xlu1 %v3604_v4, %s3908_s0 }
 0x39c   :  { %1459 = vrot.lane.b32.xlu2 %v3604_v4, %s3902_s21  ;;  %s3912_s21 = smov 18  }
 0x39d   :  { %3628 = vmatmul.msk.bf16.vlgmr.msrb.gmra.mxu3 %vm418_vm9, %v3818_v20 }
 0x3a3   :  { %1555 = vrot.lane.b32.xlu0 %v3627_v3, %s3910_s17  ;;  %1585 = vrot.lane.b32.xlu1 %v3627_v3, %s3911_s18 }
 0x3a4   :  { %1425 = vrot.lane.b32.xlu2 %v4604_v58, %s3909_s16  ;;  %v3652_v58 = vld [vmem:[%s5543_s1 + $0x30] sm:$0xff] }
 0x3ab   :  { %1635 = vperm.xlu0 %3864, %v3653_v22   ;;  %1617 = vperm.xlu1 %3865, %v3651_v47  }
 0x3ac   :  { %1525 = vrot.lane.b32.xlu2 %v3627_v3, %s3905_s24 }
 0x3b3   :  { %1954 = vperm.xlu0 %3864, %v3654_v5   ;;  %1630 = vperm.xlu1 %3865, %v3652_v58  }
 0x3b4   :  { %1612 = vperm.xlu2 %3866, %v3650_v63  }
 0x3bb   :  { %2021 = vperm.xlu0 %3864, %v3668_v53   ;;  %1974 = vperm.xlu1 %3865, %v3664_v48  }
 0x3bc   :  { %1959 = vperm.xlu2 %3866, %v3655_v29  }
 0x3c1   :  { %v1458_v59 = vpop.permute.xlu1 %1457  ;;  %v1397_v55 = vpop.permute.xlu0 %1396 }
 0x3c3   :  { %2350 = vperm.xlu0 %3864, %v3671_v52   ;;  %2026 = vperm.xlu1 %3865, %v3669_v12  }
 0x3c4   :  { %1979 = vperm.xlu2 %3866, %v3665_v23  }
 0x3cc   :  { %2345 = vperm.xlu2 %3866, %v3670_v33  }
 0x3f6   :  { %v1460_v21 = vpop.permute.xlu2 %1459 }
 0x3f7   :  { %v1461_v50 = vsel %vm445_vm10, %v1458_v59, %v1460_v21 }
 0x3f8   :  { %1473 = vmatpush.bf16.msrb.mxu2 %v1461_v50 }
 0x3fb   :  { %3617 = vmatmul.msk.bf16.vlgmr.msrb.gmra.mxu2 %vm418_vm9, %v3817_v39 }
 0x3fe   :  { %v1426_v7 = vpop.permute.xlu2 %1425 }
 0x406   :  { %v1526_v62 = vpop.permute.xlu2 %1525 }
 0x40d   :  { %v1428_v14 = vpop.permute.xlu0 %1427  ;;  %v1399_v36 = vpop.permute.xlu1 %1398 }
 0x40e   :  { %v1430_v10 = vsel %vm1429_vm12, %v1426_v7, %v1428_v14  ;;  %v1401_v15 = vsel %vm1400_vm13, %v1397_v55, %v1399_v36  ;;  %v1613_v8 = vpop.permute.xlu2 %1612 }
 0x40f   :  { %1442 = vmatpush.bf16.msrb.mxu1 %v1430_v10  ;;  %1413 = vmatpush.bf16.msrb.mxu0 %v1401_v15 }
 0x412   :  { %3610 = vmatmul.msk.bf16.vlgmr.msrb.gmra.mxu1 %vm418_vm9, %v3813_v40  ;;  %3605 = vmatmul.msk.bf16.vlgmr.msrb.gmra.mxu0 %vm418_vm9, %v3816_v54 }
 0x413   :  { %1538 = vmatpush.bf16.msra.mxu0 %v1526_v62 }
 0x415   :  { %v1556_v11 = vpop.permute.xlu0 %1555  ;;  %v1586_v45 = vpop.permute.xlu1 %1585 }
 0x416   :  { %1568 = vmatpush.bf16.msra.mxu1 %v1556_v11  ;;  %1598 = vmatpush.bf16.msra.mxu2 %v1586_v45 }
 0x419   :  { %3649 = vmatmul.msk.bf16.vlgmr.msra.gmra.mxu2 %vm418_vm9, %v3822_v19 }
 0x41d   :  { %v1618_v1 = vpop.permute.xlu1 %1617  ;;  %v1636_v20 = vpop.permute.xlu0 %1635 }
 0x420   :  { %v1510_v27 = vpop.f32.mrf.mxu3 }
 0x422   :  { %3642 = vmatmul.msk.bf16.vlgmr.msra.gmra.mxu1 %vm418_vm9, %v3821_v6  ;;  %3635 = vmatmul.msk.bf16.vlgmr.msra.gmra.mxu0 %vm418_vm9, %v3820_v16 }
 0x425   :  { %v1631_v4 = vpop.permute.xlu1 %1630 }
 0x428   :  { %v1512_v61 = vpop.f32.mrf.mxu3 }
 0x47e   :  { %v1475_v37 = vpop.f32.mrf.mxu2 }
 0x486   :  { %v1477_v57 = vpop.f32.mrf.mxu2 }
 0x48f   :  { %v1444_v18 = vpop.f32.mrf.mxu1  ;;  %v1415_v56 = vpop.f32.mrf.mxu0 }
 0x490   :  { %v1445_v51 = vadd.f32 %v1444_v18, %v1415_v56 }
 0x492   :  { %v1480_v0 = vadd.f32 %v1475_v37, %v1445_v51 }
 0x494   :  { %v1515_v25 = vadd.f32 %v1510_v27, %v1480_v0 }
 0x497   :  { %v1446_v24 = vpop.f32.mrf.mxu1  ;;  %v1417_v17 = vpop.f32.mrf.mxu0 }
 0x498   :  { %v1447_v31 = vadd.f32 %v1446_v24, %v1417_v17 }
 0x49a   :  { %v1481_v49 = vadd.f32 %v1477_v57, %v1447_v31 }
 0x49c   :  { %v1600_v30 = vpop.f32.mrf.mxu2  ;;  %v1516_v42 = vadd.f32 %v1512_v61, %v1481_v49 }
 0x49f   :  { %v1540_v9 = vpop.f32.mrf.mxu0  ;;  %v1570_v13 = vpop.f32.mrf.mxu1 }
 0x4a0   :  { %v1545_v43 = vadd.f32 %v1540_v9, %v1515_v25 }
 0x4a2   :  { %v1575_v60 = vadd.f32 %v1570_v13, %v1545_v43 }
 0x4a4   :  { %v1605_v34 = vadd.f32 %v1600_v30, %v1575_v60  ;;  %v1602_v48 = vpop.f32.mrf.mxu2 }
 0x4a6   :  { %v4703_v3 = vadd.f32 %v1613_v8, %v1605_v34 }
 0x4a7   :  { %v1542_v22 = vpop.f32.mrf.mxu0  ;;  %v1572_v58 = vpop.f32.mrf.mxu1 }
 0x4a8   :  { %v4706_v47 = vmul.f32 %v1631_v4, %v4703_v3  ;;  %v1546_v5 = vadd.f32 %v1542_v22, %v1516_v42 }
 0x4aa   :  { %v1643_v63 = vand.u32 2139095040, %v4706_v47  ;;  %v1576_v53 = vadd.f32 %v1572_v58, %v1546_v5  ;;  %v1640_v12 = vand.u32 2147483647, %v4706_v47 }
 0x4ac   :  { %v1644_v29 = vshrl.u32 %v1643_v63, 23  ;;  %v1606_v52 = vadd.f32 %v1602_v48, %v1576_v53  ;;  %v1647_v50 = vand.u32 8388607, %v1640_v12 }
 0x4ae   :  { %v3656_v23 = vadd.s32 4294967169, %v1644_v29  ;;  %v4710_v33 = vadd.f32 %v1618_v1, %v1606_v52  ;;  %v1648_v36 = vor.u32 8388608, %v1647_v50 }
 0x4b0   :  { %v1650_v59 = vadd.s32 1, %v3656_v23  ;;  %v4713_v21 = vmul.f32 %v1636_v20, %v4710_v33  ;;  %v4745_v31 = vshll.u32 %v1648_v36, 8 }
 0x4b2   :  { %vm1651_vm10 = vcmp.gt.s32.totalorder %v1650_v59, 0  ;;  %v1795_v55 = vand.u32 2147483647, %v4713_v21  ;;  %v1798_v7 = vand.u32 2139095040, %v4713_v21  ;;  %v1689_v8 = vand.u32 65535, %v4745_v31 }
 0x4b3   :  { %v1652_v39 = vsel %vm1651_vm10, %v1650_v59, 0  ;;  %v1690_v53 = vshrl.u32 %v4745_v31, 16 }
 0x4b4   :  { %v1654_v14 = vand.u32 31, %v1652_v39  ;;  %v1799_v40 = vshrl.u32 %v1798_v7, 23  ;;  %v4719_v15 = vshrl.u32 %v1652_v39, 5  ;;  %v1802_v11 = vand.u32 8388607, %v1795_v55 }
 0x4b6   :  { %v1655_v10 = vsub.s32 32, %v1654_v14  ;;  %v1657_v54 = vshll.u32 %v3896_v26, %v1654_v14  ;;  %v1660_v62 = vshll.u32 %v3897_v28, %v1654_v14  ;;  %v1663_v6 = vshll.u32 %v3898_v32, %v1654_v14 }
 0x4b7   :  { %v1666_v37 = vshll.u32 %v3899_v35, %v1654_v14  ;;  %v1669_v56 = vshll.u32 %v3900_v38, %v1654_v14  ;;  %v3659_v27 = vadd.s32 4294967169, %v1799_v40  ;;  %vm1672_vm15 = vcmp.lt.s32.totalorder %v4719_v15, 1 }
 0x4b8   :  { %v1658_v45 = vshrl.u32 %v3897_v28, %v1655_v10  ;;  %v1661_v19 = vshrl.u32 %v3898_v32, %v1655_v10  ;;  %v1664_v16 = vshrl.u32 %v3899_v35, %v1655_v10  ;;  %v1667_v18 = vshrl.u32 %v3900_v38, %v1655_v10 }
 0x4b9   :  { %v1670_v51 = vshrl.u32 %v3901_v41, %v1655_v10  ;;  %vm1675_vm1 = vcmp.lt.s32.totalorder %v4719_v15, 4  ;;  %v1803_v9 = vor.u32 8388608, %v1802_v11  ;;  %vm1674_vm2 = vcmp.lt.s32.totalorder %v4719_v15, 3 }
 0x4ba   :  { %v4733_v24 = vor.u32 %v1658_v45, %v1657_v54  ;;  %v4735_v57 = vor.u32 %v1661_v19, %v1660_v62  ;;  %v4737_v17 = vor.u32 %v1664_v16, %v1663_v6  ;;  %v1668_v0 = vor.u32 %v1667_v18, %v1666_v37 }
 0x4bb   :  { %v1671_v1 = vor.u32 %v1670_v51, %v1669_v56  ;;  %v1805_v30 = vadd.s32 1, %v3659_v27  ;;  %vm1673_vm4 = vcmp.lt.s32.totalorder %v4719_v15, 2  ;;  %v4765_v4 = vshll.u32 %v1803_v9, 8 }
 0x4bc   :  { %v1684_v25 = vsel %vm1672_vm15, %v4735_v57, %v4737_v17  ;;  %v1681_v13 = vsel %vm1675_vm1, %v1668_v0, 920167782  ;;  %v1680_v49 = vsel %vm1672_vm15, %v4733_v24, %v4735_v57  ;;  %v4773_v29 = vshrl.u32 %v3896_v26, %v1655_v10 }
 0x4bd   :  { %v1685_v43 = vsel %vm1675_vm1, %v1671_v1, 1326507024  ;;  %v1682_v60 = vsel %vm1674_vm2, %v4737_v17, %v1681_v13  ;;  %vm1806_vm3 = vcmp.gt.s32.totalorder %v1805_v30, 0  ;;  %v1844_v20 = vand.u32 65535, %v4765_v4 }
 0x4be   :  { %v1686_v61 = vsel %vm1674_vm2, %v1668_v0, %v1685_v43  ;;  %v1683_v22 = vsel %vm1673_vm4, %v1680_v49, %v1682_v60  ;;  %v1807_v58 = vsel %vm1806_vm3, %v1805_v30, 0  ;;  %v1845_v7 = vshrl.u32 %v4765_v4, 16 }
 0x4bf   :  { %v1687_v34 = vsel %vm1673_vm4, %v1684_v25, %v1686_v61  ;;  %v1809_v48 = vand.u32 31, %v1807_v58  ;;  %v1713_v52 = vand.u32 65535, %v1683_v22  ;;  %v1714_v23 = vshrl.u32 %v1683_v22, 16 }
 0x4c0   :  { %v1692_v42 = vshrl.u32 %v1687_v34, 16  ;;  %v1691_v5 = vand.u32 65535, %v1687_v34  ;;  %v4778_v36 = vshrl.u32 %v1807_v58, 5 }
 0x4c1   :  { %v1810_v39 = vsub.s32 32, %v1809_v48  ;;  %v1812_v40 = vshll.u32 %v3896_v26, %v1809_v48  ;;  %v1815_v54 = vshll.u32 %v3897_v28, %v1809_v48  ;;  %v1818_v11 = vshll.u32 %v3898_v32, %v1809_v48 }
 0x4c2   :  { %v4769_v63 = vmul.u32 %v1692_v42, %v1689_v8  ;;  %v1693_v59 = vmul.u32 %v1691_v5, %v1689_v8  ;;  %v1696_v50 = vmul.u32 %v1692_v42, %v1690_v53  ;;  %v1821_v19 = vshll.u32 %v3899_v35, %v1809_v48 }
 0x4c3   :  { %v1813_v10 = vshrl.u32 %v3897_v28, %v1810_v39  ;;  %v1816_v62 = vshrl.u32 %v3898_v32, %v1810_v39  ;;  %v1819_v45 = vshrl.u32 %v3899_v35, %v1810_v39  ;;  %v1822_v6 = vshrl.u32 %v3900_v38, %v1810_v39 }
 0x4c4   :  { %v1697_v14 = vshll.u32 %v4769_v63, 16  ;;  %v1824_v16 = vshll.u32 %v3900_v38, %v1809_v48  ;;  %v1825_v37 = vshrl.u32 %v3901_v41, %v1810_v39  ;;  %v4790_v18 = vmul.u32 %v1714_v23, %v1689_v8 }
 0x4c5   :  { %v1814_v56 = vor.u32 %v1813_v10, %v1812_v40  ;;  %v4792_v51 = vor.u32 %v1816_v62, %v1815_v54  ;;  %v1820_v27 = vor.u32 %v1819_v45, %v1818_v11  ;;  %v4794_v0 = vmul.u32 %v1714_v23, %v1690_v53 }
 0x4c6   :  { %v1823_v1 = vor.u32 %v1822_v6, %v1821_v19  ;;  %v1826_v25 = vor.u32 %v1825_v37, %v1824_v16  ;;  %vm1827_vm14 = vcmp.lt.s32.totalorder %v4778_v36, 1  ;;  %vm1701_vm0 = vc.u32 %v1693_v59, %v1697_v14 }
 0x4c7   :  { %vm1830_vm6 = vcmp.lt.s32.totalorder %v4778_v36, 4  ;;  %v1835_v9 = vsel %vm1827_vm14, %v1814_v56, %v4792_v51  ;;  %v1839_v13 = vsel %vm1827_vm14, %v4792_v51, %v1820_v27  ;;  %vm1829_vm7 = vcmp.lt.s32.totalorder %v4778_v36, 3 }
 0x4c8   :  { %v1836_v43 = vsel %vm1830_vm6, %v1823_v1, 920167782  ;;  %v1840_v30 = vsel %vm1830_vm6, %v1826_v25, 1326507024  ;;  %v4809_v49 = vmul.u32 %v1691_v5, %v1690_v53  ;;  %v1703_v60 = vadd.s32 %v1697_v14, %v1693_v59 }
 0x4c9   :  { %vm1828_vm8 = vcmp.lt.s32.totalorder %v4778_v36, 2  ;;  %v1837_v61 = vsel %vm1829_vm7, %v1820_v27, %v1836_v43  ;;  %v1841_v34 = vsel %vm1829_vm7, %v1823_v1, %v1840_v30  ;;  %v1811_v42 = vshrl.u32 %v3896_v26, %v1810_v39 }
 0x4ca   :  { %v1838_v22 = vsel %vm1828_vm8, %v1835_v9, %v1837_v61  ;;  %v1842_v58 = vsel %vm1828_vm8, %v1839_v13, %v1841_v34  ;;  %v1702_v5 = vsel %vm1701_vm0, 1, %v3895_v2  ;;  %v1698_v40 = vshrl.u32 %v4769_v63, 16 }
 0x4cb   :  { %v1846_v48 = vand.u32 65535, %v1842_v58  ;;  %v1847_v23 = vshrl.u32 %v1842_v58, 16  ;;  %v1868_v59 = vand.u32 65535, %v1838_v22  ;;  %v1869_v14 = vshrl.u32 %v1838_v22, 16 }
 0x4cc   :  { %v1699_v54 = vshll.u32 %v4809_v49, 16  ;;  %v1715_v10 = vmul.u32 %v1713_v52, %v1689_v8  ;;  %v4824_v62 = vmul.u32 %v1713_v52, %v1690_v53  ;;  %v1831_v39 = vsel %vm1827_vm14, %v1811_v42, %v1814_v56 }
 0x4cd   :  { %v1832_v11 = vsel %vm1830_vm6, %v1820_v27, 2102212464  ;;  %v1849_v45 = vmul.u32 %v1847_v23, %v1844_v20  ;;  %v1850_v19 = vmul.u32 %v1846_v48, %v1845_v7  ;;  %v1871_v6 = vmul.u32 %v1869_v14, %v1844_v20 }
 0x4ce   :  { %v1872_v16 = vmul.u32 %v1868_v59, %v1845_v7  ;;  %v1704_v37 = vadd.s32 %v1702_v5, %v1696_v50  ;;  %vm1705_vm13 = vc.u32 %v1703_v60, %v1699_v54  ;;  %v1848_v1 = vmul.u32 %v1846_v48, %v1844_v20 }
 0x4cf   :  { %v1851_v25 = vmul.u32 %v1847_v23, %v1845_v7  ;;  %v1852_v63 = vshll.u32 %v1849_v45, 16  ;;  %v1719_v9 = vshll.u32 %v4790_v18, 16  ;;  %v1854_v8 = vshll.u32 %v1850_v19, 16 }
 0x4d0   :  { %v1870_v53 = vmul.u32 %v1868_v59, %v1844_v20  ;;  %v1873_v52 = vmul.u32 %v1869_v14, %v1845_v7  ;;  %v1874_v13 = vshll.u32 %v1871_v6, 16  ;;  %v1876_v43 = vshll.u32 %v1872_v16, 16 }
 0x4d1   :  { %vm1856_vm10 = vc.u32 %v1848_v1, %v1852_v63  ;;  %v1858_v56 = vadd.s32 %v1852_v63, %v1848_v1  ;;  %v1706_v27 = vsel %vm1705_vm13, 1, %v3895_v2  ;;  %vm1723_vm0 = vc.u32 %v1715_v10, %v1719_v9 }
 0x4d2   :  { %v1857_v30 = vsel %vm1856_vm10, 1, %v3895_v2  ;;  %vm1878_vm3 = vc.u32 %v1870_v53, %v1874_v13  ;;  %v1880_v61 = vadd.s32 %v1874_v13, %v1870_v53  ;;  %v1708_v50 = vadd.s32 %v1706_v27, %v1704_v37 }
 0x4d3   :  { %v1859_v60 = vadd.s32 %v1857_v30, %v1851_v25  ;;  %vm1860_vm14 = vc.u32 %v1858_v56, %v1854_v8  ;;  %v1879_v34 = vsel %vm1878_vm3, 1, %v3895_v2  ;;  %v1721_v7 = vshll.u32 %v4824_v62, 16 }
 0x4d4   :  { %v1861_v42 = vsel %vm1860_vm14, 1, %v3895_v2  ;;  %v1881_v20 = vadd.s32 %v1879_v34, %v1873_v52  ;;  %vm1882_vm6 = vc.u32 %v1880_v61, %v1876_v43  ;;  %v1853_v22 = vshrl.u32 %v1849_v45, 16 }
 0x4d5   :  { %v1863_v58 = vadd.s32 %v1861_v42, %v1859_v60  ;;  %v1883_v5 = vsel %vm1882_vm6, 1, %v3895_v2  ;;  %v1724_v48 = vsel %vm1723_vm0, 1, %v3895_v2  ;;  %v1875_v23 = vshrl.u32 %v1871_v6, 16 }
 0x4d6   :  { %v1885_v59 = vadd.s32 %v1883_v5, %v1881_v20  ;;  %v1725_v14 = vadd.s32 %v1719_v9, %v1715_v10  ;;  %v1726_v54 = vadd.s32 %v1724_v48, %v4794_v0  ;;  %v1833_v37 = vsel %vm1829_vm7, %v4792_v51, %v1832_v11 }
 0x4d7   :  { %v1855_v1 = vshrl.u32 %v1850_v19, 16  ;;  %v1864_v25 = vadd.s32 %v1863_v58, %v1853_v22  ;;  %v1709_v63 = vadd.s32 %v1708_v50, %v1698_v40  ;;  %v1677_v45 = vsel %vm1675_vm1, %v4737_v17, 2102212464 }
 0x4d8   :  { %v1877_v8 = vshrl.u32 %v1872_v16, 16  ;;  %v1886_v53 = vadd.s32 %v1885_v59, %v1875_v23  ;;  %vm1727_vm13 = vc.u32 %v1725_v14, %v1721_v7  ;;  %v1884_v6 = vadd.s32 %v1880_v61, %v1876_v43 }
 0x4d9   :  { %v1865_v52 = vadd.s32 %v1864_v25, %v1855_v1  ;;  %v1700_v10 = vshrl.u32 %v4809_v49, 16  ;;  %v1728_v0 = vsel %vm1727_vm13, 1, %v3895_v2  ;;  %v1834_v9 = vsel %vm1828_vm8, %v1831_v39, %v1833_v37 }
 0x4da   :  { %v1887_v51 = vadd.s32 %v1886_v53, %v1877_v8  ;;  %v1720_v11 = vshrl.u32 %v4790_v18, 16  ;;  %v1730_v40 = vadd.s32 %v1728_v0, %v1726_v54  ;;  %v1676_v17 = vsel %vm1672_vm15, %v4773_v29, %v4733_v24 }
 0x4db   :  { %v1678_v19 = vsel %vm1674_vm2, %v4735_v57, %v1677_v45  ;;  %vm1890_vm1 = vc.u32 %v1865_v52, %v1884_v6  ;;  %v1710_v49 = vadd.s32 %v1709_v63, %v1700_v10  ;;  %v1722_v13 = vshrl.u32 %v4824_v62, 16 }
 0x4dc   :  { %v1891_v16 = vadd.s32 1, %v1887_v51  ;;  %v1731_v36 = vadd.s32 %v1730_v40, %v1720_v11  ;;  %v1888_v39 = vmul.u32 %v4765_v4, %v1834_v9  ;;  %v1729_v56 = vadd.s32 %v1725_v14, %v1721_v7 }
 0x4dd   :  { %v1679_v18 = vsel %vm1673_vm4, %v1676_v17, %v1678_v19  ;;  %v1889_v14 = vadd.s32 %v1884_v6, %v1865_v52  ;;  %vm1797_vm10 = vcmp.lt.s32.totalorder %v4713_v21, 0  ;;  %vm4868_vm3 = vcmp.le.f32.partialorder %v1795_v55, 0.7853982 }
 0x4de   :  { %v1892_v43 = vsel %vm1890_vm1, %v1891_v16, %v1887_v51  ;;  %v1732_v27 = vadd.s32 %v1731_v36, %v1722_v13  ;;  %vm1735_vm15 = vc.u32 %v1710_v49, %v1729_v56  ;;  %v1733_v29 = vmul.u32 %v4745_v31, %v1679_v18 }
 0x4df   :  { %v1893_v30 = vadd.s32 %v1892_v43, %v1888_v39  ;;  %v1734_v0 = vadd.s32 %v1729_v56, %v1710_v49  ;;  %vm1642_vm14 = vcmp.lt.s32.totalorder %v4706_v47, 0  ;;  %vm4878_vm0 = vcmp.le.f32.partialorder %v1640_v12, 0.7853982 }
 0x4e0   :  { %v1736_v24 = vadd.s32 1, %v1732_v27 }
 0x4e1   :  { %v1894_v57 = vadd.s32 536870912, %v1893_v30 }
 0x4e2   :  { %v1737_v61 = vsel %vm1735_vm15, %v1736_v24, %v1732_v27  ;;  %vm1938_vm15 = vweird.f32 %v4713_v21 }
 0x4e3   :  { %v1895_v50 = vshrl.u32 %v1894_v57, 30  ;;  %v1738_v60 = vadd.s32 %v1737_v61, %v1733_v29 }
 0x4e5   :  { %v1896_v34 = vshll.u32 %v1895_v50, 30  ;;  %v1739_v62 = vadd.s32 536870912, %v1738_v60 }
 0x4e7   :  { %v1897_v42 = vsub.s32 %v1893_v30, %v1896_v34  ;;  %v4862_v20 = vshrl.u32 %v1739_v62, 30  ;;  %v1919_v30 = vsub.s32 4, %v1895_v50 }
 0x4e9   :  { %vm1898_vm2 = vcmp.lt.s32.totalorder %v1897_v42, 0  ;;  %v1899_v4 = vsub.s32 0, %v1897_v42  ;;  %v1741_v15 = vshll.u32 %v4862_v20, 30  ;;  %v1920_v62 = vsel %vm1797_vm10, %v1919_v30, %v1895_v50 }
 0x4ea   :  { %v1922_v50 = vsel %vm4868_vm3, 0, %v1920_v62 }
 0x4eb   :  { %v1900_v7 = vsel %vm1898_vm2, %v1899_v4, %v1897_v42  ;;  %v1742_v22 = vsub.s32 %v1738_v60, %v1741_v15 }
 0x4ec   :  { %v1901_v58 = vclz %v1900_v7  ;;  %v1764_v7 = vsub.s32 4, %v4862_v20 }
 0x4ed   :  { %vm1743_vm4 = vcmp.lt.s32.totalorder %v1742_v22, 0  ;;  %v1744_v48 = vsub.s32 0, %v1742_v22 }
 0x4ee   :  { %v3660_v5 = vadd.s32 4294967294, %v1901_v58 }
 0x4ef   :  { %v1745_v31 = vsel %vm1743_vm4, %v1744_v48, %v1742_v22 }
 0x4f0   :  { %vm3661_vm7 = vcmp.lt.s32.totalorder %v3660_v5, 0  ;;  %v1746_v59 = vclz %v1745_v31 }
 0x4f1   :  { %v1904_v23 = vsel %vm3661_vm7, 0, %v3660_v5 }
 0x4f2   :  { %v1905_v54 = vsub.s32 32, %v1904_v23  ;;  %v1909_v37 = vsub.s32 4294967266, %v1904_v23  ;;  %v3657_v1 = vadd.s32 4294967294, %v1746_v59  ;;  %v1906_v25 = vshll.u32 %v1897_v42, %v1904_v23 }
 0x4f4   :  { %v1907_v63 = vshrl.u32 %v1889_v14, %v1905_v54  ;;  %v1910_v45 = vadd.s32 127, %v1909_v37  ;;  %vm3658_vm8 = vcmp.lt.s32.totalorder %v3657_v1, 0  ;;  %v1765_v14 = vsel %vm1642_vm14, %v1764_v7, %v4862_v20  ;;  %v3662_v7 = vld [vmem:[%s5547_s5 + $0x10] sm:$0xff] }
 0x4f5   :  { %v1749_v10 = vsel %vm3658_vm8, 0, %v3657_v1  ;;  %v1939_v54 = vadd.s32 3, %v1922_v50  ;;  %vm1783_vm8 = vweird.f32 %v4706_v47 }
 0x4f6   :  { %v1908_v8 = vor.u32 %v1907_v63, %v1906_v25  ;;  %v1911_v53 = vshll.u32 %v1910_v45, 23  ;;  %v1750_v9 = vsub.s32 32, %v1749_v10  ;;  %v1754_v51 = vsub.s32 4294967266, %v1749_v10 }
 0x4f7   :  { %v1751_v40 = vshll.u32 %v1742_v22, %v1749_v10  ;;  %v1767_v45 = vsel %vm4878_vm0, 0, %v1765_v14 }
 0x4f8   :  { %v1912_v11 = vor.u32 4788187, %v1911_v53  ;;  %v1752_v17 = vshrl.u32 %v1734_v0, %v1750_v9  ;;  %v1755_v19 = vadd.s32 127, %v1754_v51  ;;  %v1915_v13 = vcvt.s32.f32 %v1908_v8 }
 0x4f9   :  { %v1940_v9 = vand.u32 3, %v1939_v54 }
 0x4fa   :  { %v1913_v16 = vand.u32 2147483647, %v1912_v11  ;;  %v1753_v52 = vor.u32 %v1752_v17, %v1751_v40  ;;  %v1756_v6 = vshll.u32 %v1755_v19, 23  ;;  %v1784_v19 = vadd.s32 3, %v1767_v45 }
 0x4fb   :  { %vm1942_vm6 = vcmp.eq.s32.totalorder %v1940_v9, 0  ;;  %vm1945_vm13 = vcmp.eq.s32.totalorder %v1940_v9, 2  ;;  %vm1941_vm1 = vcmp.lt.s32.totalorder %v1940_v9, 2 }
 0x4fc   :  { %v1916_v36 = vmul.f32 %v1915_v13, %v1913_v16  ;;  %v1757_v39 = vor.u32 4788187, %v1756_v6  ;;  %v1760_v27 = vcvt.s32.f32 %v1753_v52 }
 0x4fe   :  { %v1917_v18 = vxor.u32 2147483648, %v1916_v36  ;;  %v1758_v43 = vand.u32 2147483647, %v1757_v39 }
 0x500   :  { %v1918_v56 = vsel %vm1797_vm10, %v1917_v18, %v1916_v36  ;;  %v1761_v29 = vmul.f32 %v1760_v27, %v1758_v43  ;;  %v1785_v18 = vand.u32 3, %v1784_v19 }
 0x501   :  { %v1921_v24 = vsel %vm4868_vm3, %v4713_v21, %v1918_v56 }
 0x502   :  { %v1923_v57 = vmul.f32 %v1921_v24, %v1921_v24  ;;  %v1762_v61 = vxor.u32 2147483648, %v1761_v29  ;;  %vm1787_vm2 = vcmp.eq.s32.totalorder %v1785_v18, 0  ;;  %vm1790_vm4 = vcmp.eq.s32.totalorder %v1785_v18, 2 }
 0x503   :  { %vm1786_vm7 = vcmp.lt.s32.totalorder %v1785_v18, 2 }
 0x504   :  { %v1924_v60 = vmul.f32 -0.001358992, %v1923_v57  ;;  %v1931_v34 = vmul.f32 -0.00019511016, %v1923_v57  ;;  %v1763_v42 = vsel %vm1642_vm14, %v1762_v61, %v1761_v29  ;;  %v1960_v29 = vpop.permute.xlu2 %1959 }
 0x505   :  { %v1766_v22 = vsel %vm4878_vm0, %v4706_v47, %v1763_v42  ;;  %v1955_v42 = vpop.permute.xlu0 %1954  ;;  %v3663_v47 = vld [vmem:[%s5547_s5 + $0x18] sm:$0xff] }
 0x506   :  { %v1925_v4 = vadd.f32 0.041655596, %v1924_v60  ;;  %v1932_v15 = vadd.f32 0.008332121, %v1931_v34  ;;  %v1768_v58 = vmul.f32 %v1766_v22, %v1766_v22 }
 0x508   :  { %v1926_v5 = vmul.f32 %v1925_v4, %v1923_v57  ;;  %v1933_v12 = vmul.f32 %v1932_v15, %v1923_v57  ;;  %v1769_v48 = vmul.f32 -0.001358992, %v1768_v58  ;;  %v1776_v31 = vmul.f32 -0.00019511016, %v1768_v58 }
 0x50a   :  { %v1927_v23 = vadd.f32 -0.4999988, %v1926_v5  ;;  %v1934_v59 = vadd.f32 -0.16666654, %v1933_v12  ;;  %v1770_v37 = vadd.f32 0.041655596, %v1769_v48 }
 0x50b   :  { %v1777_v1 = vadd.f32 0.008332121, %v1776_v31 }
 0x50c   :  { %v1928_v25 = vmul.f32 %v1927_v23, %v1923_v57  ;;  %v1935_v63 = vmul.f32 %v1934_v59, %v1923_v57  ;;  %v1771_v8 = vmul.f32 %v1770_v37, %v1768_v58  ;;  %v1980_v31 = vpop.permute.xlu2 %1979 }
 0x50d   :  { %v1778_v53 = vmul.f32 %v1777_v1, %v1768_v58 }
 0x50e   :  { %v1929_v10 = vadd.f32 1.0, %v1928_v25  ;;  %v1936_v0 = vadd.f32 1.0, %v1935_v63  ;;  %v1772_v51 = vadd.f32 -0.4999988, %v1771_v8 }
 0x50f   :  { %v1779_v11 = vadd.f32 -0.16666654, %v1778_v53 }
 0x510   :  { %v1937_v40 = vmul.f32 %v1936_v0, %v1921_v24  ;;  %v1946_v17 = vxor.u32 2147483648, %v1929_v10  ;;  %v1773_v16 = vmul.f32 %v1772_v51, %v1768_v58 }
 0x511   :  { %v1780_v20 = vmul.f32 %v1779_v11, %v1768_v58 }
 0x512   :  { %v1943_v13 = vxor.u32 2147483648, %v1937_v40  ;;  %v1774_v52 = vadd.f32 1.0, %v1773_v16  ;;  %v1947_v39 = vsel %vm1945_vm13, %v1946_v17, %v1937_v40 }
 0x513   :  { %v1781_v6 = vadd.f32 1.0, %v1780_v20 }
 0x514   :  { %v1944_v36 = vsel %vm1942_vm6, %v1929_v10, %v1943_v13  ;;  %v1791_v49 = vxor.u32 2147483648, %v1774_v52 }
 0x515   :  { %v1948_v43 = vsel %vm1941_vm1, %v1944_v36, %v1947_v39  ;;  %v1782_v27 = vmul.f32 %v1781_v6, %v1766_v22 }
 0x516   :  { %v1949_v56 = vsel %vm1938_vm15, nan, %v1948_v43 }
 0x517   :  { %v1951_v30 = vmul.f32 %v1949_v56, %v1949_v56  ;;  %v1788_v24 = vxor.u32 2147483648, %v1782_v27  ;;  %v1792_v60 = vsel %vm1790_vm4, %v1791_v49, %v1782_v27 }
 0x519   :  { %v1963_v57 = vmul.f32 %v1960_v29, %v1951_v30  ;;  %v1789_v61 = vsel %vm1787_vm2, %v1774_v52, %v1788_v24 }
 0x51a   :  { %v1793_v34 = vsel %vm1786_vm7, %v1789_v61, %v1792_v60 }
 0x51b   :  { %v1965_v62 = vadd.f32 %v1963_v57, %v4710_v33  ;;  %v1794_v55 = vsel %vm1783_vm8, nan, %v1793_v34  ;;  %v1975_v33 = vpop.permute.xlu1 %1974 }
 0x51c   :  { %v1950_v21 = vmul.f32 %v1794_v55, %v1794_v55 }
 0x51d   :  { %2002 = vmatpush.msra.mxu3 %v1965_v62 }
 0x51e   :  { %v1962_v4 = vmul.f32 %v1955_v42, %v1950_v21 }
 0x520   :  { %v1964_v15 = vadd.f32 %v1962_v4, %v4703_v3  ;;  %v2022_v3 = vpop.permute.xlu0 %2021 }
 0x522   :  { %2003 = vmatpush.msra.mxu3 %v1964_v15 }
 0x523   :  { %3666 = vmatmul.msk.f32.vlgmr.msra.gmra.mxu3 %vm418_vm9, %v3662_v7  ;;  %v2027_v25 = vpop.permute.xlu1 %2026 }
 0x52b   :  { %3667 = vmatmul.msk.f32.gmra.mxu3 %vm418_vm9, %v3663_v47 }
 0x5a6   :  { %v2005_v22 = vpop.f32.mrf.mxu3 }
 0x5a7   :  { %v2006_v58 = vadd.f32 %v2005_v22, %v1975_v33 }
 0x5a9   :  { %v4908_v50 = vadd.f32 %v2006_v58, %v4462_v46 }
 0x5ab   :  { %v4911_v5 = vmul.f32 %v2022_v3, %v4908_v50 }
 0x5ad   :  { %v2031_v12 = vand.u32 2147483647, %v4911_v5  ;;  %v2034_v48 = vand.u32 2139095040, %v4911_v5 }
 0x5ae   :  { %v2008_v23 = vpop.f32.mrf.mxu3 }
 0x5af   :  { %v2035_v59 = vshrl.u32 %v2034_v48, 23  ;;  %v2038_v14 = vand.u32 8388607, %v2031_v12  ;;  %v2009_v54 = vadd.f32 %v2008_v23, %v1980_v31 }
 0x5b1   :  { %v3672_v37 = vadd.s32 4294967169, %v2035_v59  ;;  %v2039_v1 = vor.u32 8388608, %v2038_v14  ;;  %v4918_v46 = vadd.f32 %v2009_v54, %v4474_v44 }
 0x5b3   :  { %v2041_v63 = vadd.s32 1, %v3672_v37  ;;  %v4921_v45 = vmul.f32 %v2027_v25, %v4918_v46  ;;  %v4923_v8 = vshll.u32 %v2039_v1, 8 }
 0x5b5   :  { %vm2042_vm10 = vcmp.gt.s32.totalorder %v2041_v63, 0  ;;  %v2186_v10 = vand.u32 2147483647, %v4921_v45  ;;  %v2189_v0 = vand.u32 2139095040, %v4921_v45  ;;  %v2080_v11 = vand.u32 65535, %v4923_v8 }
 0x5b6   :  { %v2043_v53 = vsel %vm2042_vm10, %v2041_v63, 0  ;;  %v2081_v44 = vshrl.u32 %v4923_v8, 16 }
 0x5b7   :  { %v2045_v9 = vand.u32 31, %v2043_v53  ;;  %v2190_v40 = vshrl.u32 %v2189_v0, 23  ;;  %v2044_v17 = vshrl.u32 %v2043_v53, 5  ;;  %v4933_v20 = vand.u32 8388607, %v2186_v10 }
 0x5b9   :  { %v2046_v51 = vsub.s32 32, %v2045_v9  ;;  %v2048_v19 = vshll.u32 %v3896_v26, %v2045_v9  ;;  %v2051_v16 = vshll.u32 %v3897_v28, %v2045_v9  ;;  %v2054_v6 = vshll.u32 %v3898_v32, %v2045_v9 }
 0x5ba   :  { %v2057_v39 = vshll.u32 %v3899_v35, %v2045_v9  ;;  %v2060_v43 = vshll.u32 %v3900_v38, %v2045_v9  ;;  %v3675_v24 = vadd.s32 4294967169, %v2190_v40  ;;  %vm2063_vm3 = vcmp.lt.s32.totalorder %v2044_v17, 1 }
 0x5bb   :  { %v2049_v13 = vshrl.u32 %v3897_v28, %v2046_v51  ;;  %v2052_v52 = vshrl.u32 %v3898_v32, %v2046_v51  ;;  %v2055_v36 = vshrl.u32 %v3899_v35, %v2046_v51  ;;  %v2058_v18 = vshrl.u32 %v3900_v38, %v2046_v51 }
 0x5bc   :  { %v2061_v27 = vshrl.u32 %v3901_v41, %v2046_v51  ;;  %vm2066_vm14 = vcmp.lt.s32.totalorder %v2044_v17, 4  ;;  %v2047_v61 = vshrl.u32 %v3896_v26, %v2046_v51  ;;  %vm2065_vm0 = vcmp.lt.s32.totalorder %v2044_v17, 3 }
 0x5bd   :  { %v2050_v49 = vor.u32 %v2049_v13, %v2048_v19  ;;  %v2053_v56 = vor.u32 %v2052_v52, %v2051_v16  ;;  %v2056_v30 = vor.u32 %v2055_v36, %v2054_v6  ;;  %v2059_v29 = vor.u32 %v2058_v18, %v2057_v39 }
 0x5be   :  { %v2062_v57 = vor.u32 %v2061_v27, %v2060_v43  ;;  %v2196_v42 = vadd.s32 1, %v3675_v24  ;;  %vm2064_vm6 = vcmp.lt.s32.totalorder %v2044_v17, 2  ;;  %v2194_v23 = vor.u32 8388608, %v4933_v20 }
 0x5bf   :  { %v2068_v60 = vsel %vm2066_vm14, %v2056_v30, 2102212464  ;;  %v2071_v34 = vsel %vm2063_vm3, %v2050_v49, %v2053_v56  ;;  %v2075_v62 = vsel %vm2063_vm3, %v2053_v56, %v2056_v30  ;;  %v2072_v55 = vsel %vm2066_vm14, %v2059_v29, 920167782 }
 0x5c0   :  { %v2076_v21 = vsel %vm2066_vm14, %v2062_v57, 1326507024  ;;  %v2067_v4 = vsel %vm2063_vm3, %v2047_v61, %v2050_v49  ;;  %v2073_v15 = vsel %vm2065_vm0, %v2056_v30, %v2072_v55  ;;  %v2069_v47 = vsel %vm2065_vm0, %v2053_v56, %v2068_v60 }
 0x5c1   :  { %v2077_v7 = vsel %vm2065_vm0, %v2059_v29, %v2076_v21  ;;  %v2074_v33 = vsel %vm2064_vm6, %v2071_v34, %v2073_v15  ;;  %vm2197_vm13 = vcmp.gt.s32.totalorder %v2196_v42, 0  ;;  %v4945_v59 = vsel %vm2064_vm6, %v2067_v4, %v2069_v47 }
 0x5c2   :  { %v2078_v22 = vsel %vm2064_vm6, %v2075_v62, %v2077_v7  ;;  %v2104_v48 = vand.u32 65535, %v2074_v33  ;;  %v2105_v31 = vshrl.u32 %v2074_v33, 16  ;;  %v2198_v37 = vsel %vm2197_vm13, %v2196_v42, 0 }
 0x5c3   :  { %v2082_v58 = vand.u32 65535, %v2078_v22  ;;  %v2083_v3 = vshrl.u32 %v2078_v22, 16  ;;  %v2200_v6 = vand.u32 31, %v2198_v37  ;;  %v4952_v56 = vshrl.u32 %v2198_v37, 5 }
 0x5c4   :  { %v2107_v63 = vmul.u32 %v2105_v31, %v2080_v11  ;;  %v2108_v53 = vmul.u32 %v2104_v48, %v2081_v44  ;;  %v2106_v51 = vmul.u32 %v2104_v48, %v2080_v11  ;;  %v2109_v40 = vmul.u32 %v2105_v31, %v2081_v44 }
 0x5c5   :  { %v2085_v14 = vmul.u32 %v2083_v3, %v2080_v11  ;;  %v2086_v54 = vmul.u32 %v2082_v58, %v2081_v44  ;;  %v2084_v1 = vmul.u32 %v2082_v58, %v2080_v11  ;;  %v2087_v25 = vmul.u32 %v2083_v3, %v2081_v44 }
 0x5c6   :  { %v2110_v16 = vshll.u32 %v2107_v63, 16  ;;  %v2111_v13 = vshrl.u32 %v2107_v63, 16  ;;  %v2112_v20 = vshll.u32 %v2108_v53, 16  ;;  %v2113_v39 = vshrl.u32 %v2108_v53, 16 }
 0x5c7   :  { %v2088_v0 = vshll.u32 %v2085_v14, 16  ;;  %v2089_v9 = vshrl.u32 %v2085_v14, 16  ;;  %v2090_v17 = vshll.u32 %v2086_v54, 16  ;;  %v2091_v19 = vshrl.u32 %v2086_v54, 16 }
 0x5c8   :  { %vm2114_vm15 = vc.u32 %v2106_v51, %v2110_v16  ;;  %v2116_v18 = vadd.s32 %v2110_v16, %v2106_v51  ;;  %v4949_v49 = vsub.s32 32, %v2200_v6  ;;  %v2203_v57 = vshll.u32 %v3896_v26, %v2200_v6 }
 0x5c9   :  { %vm2092_vm1 = vc.u32 %v2084_v1, %v2088_v0  ;;  %v2094_v52 = vadd.s32 %v2088_v0, %v2084_v1  ;;  %v2115_v27 = vsel %vm2114_vm15, 1, %v3895_v2  ;;  %v2206_v34 = vshll.u32 %v3897_v28, %v2200_v6 }
 0x5ca   :  { %v2093_v36 = vsel %vm2092_vm1, 1, %v3895_v2  ;;  %v2117_v44 = vadd.s32 %v2115_v27, %v2109_v40  ;;  %vm2118_vm4 = vc.u32 %v2116_v18, %v2112_v20  ;;  %v4955_v29 = vadd.s32 %v2116_v18, %v2112_v20 }
 0x5cb   :  { %v2095_v43 = vadd.s32 %v2093_v36, %v2087_v25  ;;  %vm2096_vm2 = vc.u32 %v2094_v52, %v2090_v17  ;;  %v2119_v24 = vsel %vm2118_vm4, 1, %v3895_v2  ;;  %v2204_v60 = vshrl.u32 %v3897_v28, %v4949_v49 }
 0x5cc   :  { %v2097_v11 = vsel %vm2096_vm2, 1, %v3895_v2  ;;  %v2121_v61 = vadd.s32 %v2119_v24, %v2117_v44  ;;  %v2207_v62 = vshrl.u32 %v3898_v32, %v4949_v49  ;;  %v2209_v21 = vshll.u32 %v3898_v32, %v2200_v6 }
 0x5cd   :  { %v2099_v30 = vadd.s32 %v2097_v11, %v2095_v43  ;;  %v2210_v42 = vshrl.u32 %v3899_v35, %v4949_v49  ;;  %v2212_v4 = vshll.u32 %v3899_v35, %v2200_v6  ;;  %v4967_v7 = vor.u32 %v2204_v60, %v2203_v57 }
 0x5ce   :  { %v2122_v15 = vadd.s32 %v2121_v61, %v2111_v13  ;;  %v4969_v47 = vor.u32 %v2207_v62, %v2206_v34  ;;  %v2213_v33 = vshrl.u32 %v3900_v38, %v4949_v49  ;;  %v2215_v3 = vshll.u32 %v3900_v38, %v2200_v6 }
 0x5cf   :  { %v2100_v55 = vadd.s32 %v2099_v30, %v2089_v9  ;;  %v2211_v58 = vor.u32 %v2210_v42, %v2209_v21  ;;  %v2216_v48 = vshrl.u32 %v3901_v41, %v4949_v49  ;;  %vm2218_vm8 = vcmp.lt.s32.totalorder %v4952_v56, 1 }
 0x5d0   :  { %v2123_v31 = vadd.s32 %v2122_v15, %v2113_v39  ;;  %v2214_v14 = vor.u32 %v2213_v33, %v2212_v4  ;;  %v4981_v37 = vshll.u32 %v2194_v23, 8  ;;  %v2124_v1 = vmul.u32 %v4923_v8, %v4945_v59 }
 0x5d1   :  { %v4973_v22 = vadd.s32 %v2100_v55, %v2091_v19  ;;  %v2217_v54 = vor.u32 %v2216_v48, %v2215_v3  ;;  %vm2221_vm10 = vcmp.lt.s32.totalorder %v4952_v56, 4  ;;  %v2226_v63 = vsel %vm2218_vm8, %v4967_v7, %v4969_v47 }
 0x5d2   :  { %v2127_v25 = vadd.s32 1, %v2123_v31  ;;  %vm2220_vm3 = vcmp.lt.s32.totalorder %v4952_v56, 3  ;;  %v2227_v53 = vsel %vm2221_vm10, %v2214_v14, 920167782  ;;  %v2230_v23 = vsel %vm2218_vm8, %v4969_v47, %v2211_v58 }
 0x5d3   :  { %vm2126_vm7 = vc.u32 %v4973_v22, %v4955_v29  ;;  %v2231_v8 = vsel %vm2221_vm10, %v2217_v54, 1326507024  ;;  %vm2219_vm14 = vcmp.lt.s32.totalorder %v4952_v56, 2  ;;  %v2228_v0 = vsel %vm2220_vm3, %v2211_v58, %v2227_v53 }
 0x5d4   :  { %v2128_v59 = vsel %vm2126_vm7, %v2127_v25, %v2123_v31  ;;  %v2232_v9 = vsel %vm2220_vm3, %v2214_v14, %v2231_v8  ;;  %v2229_v40 = vsel %vm2219_vm14, %v2226_v63, %v2228_v0  ;;  %v2235_v19 = vand.u32 65535, %v4981_v37 }
 0x5d5   :  { %v2129_v51 = vadd.s32 %v2128_v59, %v2124_v1  ;;  %v2233_v17 = vsel %vm2219_vm14, %v2230_v23, %v2232_v9  ;;  %v2236_v16 = vshrl.u32 %v4981_v37, 16  ;;  %v2260_v20 = vshrl.u32 %v2229_v40, 16 }
 0x5d6   :  { %v2237_v13 = vand.u32 65535, %v2233_v17  ;;  %v2238_v52 = vshrl.u32 %v2233_v17, 16  ;;  %v2259_v36 = vand.u32 65535, %v2229_v40  ;;  %v2223_v53 = vsel %vm2221_vm10, %v2211_v58, 2102212464 }
 0x5d7   :  { %v2130_v6 = vadd.s32 536870912, %v2129_v51  ;;  %v2262_v27 = vmul.u32 %v2260_v20, %v2235_v19  ;;  %v2264_v3 = vmul.u32 %v2260_v20, %v2236_v16  ;;  %v2202_v8 = vshrl.u32 %v3896_v26, %v4949_v49 }
 0x5d8   :  { %v2240_v39 = vmul.u32 %v2238_v52, %v2235_v19  ;;  %v2241_v18 = vmul.u32 %v2237_v13, %v2236_v16  ;;  %v2239_v11 = vmul.u32 %v2237_v13, %v2235_v19  ;;  %v2242_v24 = vmul.u32 %v2238_v52, %v2236_v16 }
 0x5d9   :  { %v5009_v43 = vshrl.u32 %v2130_v6, 30  ;;  %v2261_v57 = vmul.u32 %v2259_v36, %v2235_v19  ;;  %v2265_v61 = vshll.u32 %v2262_v27, 16  ;;  %v2263_v62 = vmul.u32 %v2259_v36, %v2236_v16 }
 0x5da   :  { %v2243_v44 = vshll.u32 %v2240_v39, 16  ;;  %v2245_v60 = vshll.u32 %v2241_v18, 16  ;;  %v2244_v42 = vshrl.u32 %v2240_v39, 16  ;;  %v2246_v59 = vshrl.u32 %v2241_v18, 16 }
 0x5db   :  { %v2132_v30 = vshll.u32 %v5009_v43, 30  ;;  %vm2269_vm13 = vc.u32 %v2261_v57, %v2265_v61  ;;  %v2267_v31 = vshll.u32 %v2263_v62, 16  ;;  %v2271_v54 = vadd.s32 %v2265_v61, %v2261_v57 }
 0x5dc   :  { %vm2247_vm0 = vc.u32 %v2239_v11, %v2243_v44  ;;  %v2249_v34 = vadd.s32 %v2243_v44, %v2239_v11  ;;  %v2270_v14 = vsel %vm2269_vm13, 1, %v3895_v2  ;;  %v2222_v17 = vsel %vm2218_vm8, %v2202_v8, %v4967_v7  ;;  %v3688_v8 = vld [vmem:[#allocation2] sm:$0xf] }
 0x5dd   :  { %v2133_v55 = vsub.s32 %v2129_v51, %v2132_v30  ;;  %v2248_v21 = vsel %vm2247_vm0, 1, %v3895_v2  ;;  %v2272_v25 = vadd.s32 %v2270_v14, %v2264_v3  ;;  %vm2273_vm15 = vc.u32 %v2271_v54, %v2267_v31 }
 0x5de   :  { %v2250_v4 = vadd.s32 %v2248_v21, %v2242_v24  ;;  %vm2251_vm6 = vc.u32 %v2249_v34, %v2245_v60  ;;  %v2274_v0 = vsel %vm2273_vm15, 1, %v3895_v2  ;;  %v2266_v51 = vshrl.u32 %v2262_v27, 16 }
 0x5df   :  { %vm2134_vm1 = vcmp.lt.s32.totalorder %v2133_v55, 0  ;;  %v2135_v15 = vsub.s32 0, %v2133_v55  ;;  %v2252_v33 = vsel %vm2251_vm6, 1, %v3895_v2  ;;  %v2276_v40 = vadd.s32 %v2274_v0, %v2272_v25 }
 0x5e0   :  { %v2254_v48 = vadd.s32 %v2252_v33, %v2250_v4  ;;  %v2224_v19 = vsel %vm2220_vm3, %v4969_v47, %v2223_v53  ;;  %v2268_v16 = vshrl.u32 %v2263_v62, 16  ;;  %v2125_v49 = vadd.s32 %v4955_v29, %v4973_v22 }
 0x5e1   :  { %v2136_v1 = vsel %vm2134_vm1, %v2135_v15, %v2133_v55  ;;  %v2277_v13 = vadd.s32 %v2276_v40, %v2266_v51  ;;  %v2275_v20 = vadd.s32 %v2271_v54, %v2267_v31  ;;  %v2225_v39 = vsel %vm2219_vm14, %v2222_v17, %v2224_v19 }
 0x5e2   :  { %v2137_v63 = vclz %v2136_v1  ;;  %v2255_v23 = vadd.s32 %v2254_v48, %v2244_v42  ;;  %v2279_v44 = vmul.u32 %v4981_v37, %v2225_v39  ;;  %vm2033_vm7 = vcmp.lt.s32.totalorder %v4911_v5, 0 }
 0x5e3   :  { %v2278_v18 = vadd.s32 %v2277_v13, %v2268_v16  ;;  %vm5037_vm8 = vcmp.le.f32.partialorder %v2031_v12, 0.7853982  ;;  %v2155_v15 = vsub.s32 4, %v5009_v43  ;;  %vm2174_vm13 = vweird.f32 %v4911_v5 }
 0x5e4   :  { %v3673_v9 = vadd.s32 4294967294, %v2137_v63  ;;  %v2256_v58 = vadd.s32 %v2255_v23, %v2246_v59  ;;  %v3825_v59 = vld [vmem:[#allocation2 + $0x8] sm:$0xf0]  ;;  %vm2188_vm1 = vcmp.lt.s32.totalorder %v4921_v45, 0  ;;  %vm5058_vm15 = vcmp.le.f32.partialorder %v2186_v10, 0.7853982 }
 0x5e5   :  { %v2282_v47 = vadd.s32 1, %v2278_v18  ;;  %v2156_v14 = vsel %vm2033_vm7, %v2155_v15, %v5009_v43  ;;  %v5048_v51 = vor.u32 %v3825_v59, %v3688_v8 }
 0x5e6   :  { %vm3674_vm2 = vcmp.lt.s32.totalorder %v3673_v9, 0  ;;  %vm2281_vm4 = vc.u32 %v2256_v58, %v2275_v20  ;;  %v2158_v23 = vsel %vm5037_vm8, 0, %v2156_v14  ;;  %v2280_v43 = vadd.s32 %v2275_v20, %v2256_v58 }
 0x5e7   :  { %v2140_v52 = vsel %vm3674_vm2, 0, %v3673_v9  ;;  %v2283_v57 = vsel %vm2281_vm4, %v2282_v47, %v2278_v18  ;;  %2443 = vrot.lane.b32.xlu1 %v5048_v51, %s3909_s16  ;;  %2382 = vrot.lane.b32.xlu0 %v5048_v51, %s3912_s21  ;;  %v2175_v13 = vadd.s32 3, %v2158_v23 }
 0x5e8   :  { %v2141_v6 = vsub.s32 32, %v2140_v52  ;;  %v2145_v36 = vsub.s32 4294967266, %v2140_v52  ;;  %v2142_v7 = vshll.u32 %v2133_v55, %v2140_v52  ;;  %v2284_v61 = vadd.s32 %v2283_v57, %v2279_v44 }
 0x5ea   :  { %v2143_v27 = vshrl.u32 %v2125_v49, %v2141_v6  ;;  %v2146_v11 = vadd.s32 127, %v2145_v36  ;;  %v2285_v22 = vadd.s32 536870912, %v2284_v61 }
 0x5ec   :  { %v2144_v30 = vor.u32 %v2143_v27, %v2142_v7  ;;  %v2147_v24 = vshll.u32 %v2146_v11, 23  ;;  %v5031_v62 = vshrl.u32 %v2285_v22, 30  ;;  %v2176_v11 = vand.u32 3, %v2175_v13 }
 0x5ee   :  { %v2148_v29 = vor.u32 4788187, %v2147_v24  ;;  %v2151_v34 = vcvt.s32.f32 %v2144_v30  ;;  %v2287_v21 = vshll.u32 %v5031_v62, 30  ;;  %vm2178_vm14 = vcmp.eq.s32.totalorder %v2176_v11, 0 }
 0x5ef   :  { %vm2181_vm0 = vcmp.eq.s32.totalorder %v2176_v11, 2  ;;  %vm2177_vm6 = vcmp.lt.s32.totalorder %v2176_v11, 2 }
 0x5f0   :  { %v2149_v60 = vand.u32 2147483647, %v2148_v29  ;;  %v2288_v55 = vsub.s32 %v2284_v61, %v2287_v21 }
 0x5f2   :  { %v2152_v56 = vmul.f32 %v2151_v34, %v2149_v60  ;;  %vm2289_vm10 = vcmp.lt.s32.totalorder %v2288_v55, 0  ;;  %v2290_v3 = vsub.s32 0, %v2288_v55 }
 0x5f4   :  { %v2153_v42 = vxor.u32 2147483648, %v2152_v56  ;;  %v2291_v31 = vsel %vm2289_vm10, %v2290_v3, %v2288_v55  ;;  %vm2415_vm10 = vcmask 220160  }
 0x5f5   :  { %v2292_v25 = vclz %v2291_v31 }
 0x5f6   :  { %v2154_v4 = vsel %vm2033_vm7, %v2153_v42, %v2152_v56 }
 0x5f7   :  { %v2157_v33 = vsel %vm5037_vm8, %v4911_v5, %v2154_v4  ;;  %v3676_v53 = vadd.s32 4294967294, %v2292_v25  ;;  %vm2329_vm8 = vweird.f32 %v4921_v45 }
 0x5f8   :  { %v2159_v48 = vmul.f32 %v2157_v33, %v2157_v33 }
 0x5f9   :  { %vm3677_vm3 = vcmp.lt.s32.totalorder %v3676_v53, 0 }
 0x5fa   :  { %v2160_v54 = vmul.f32 -0.001358992, %v2159_v48  ;;  %v2167_v1 = vmul.f32 -0.00019511016, %v2159_v48  ;;  %v2295_v40 = vsel %vm3677_vm3, 0, %v3676_v53  ;;  %vm2386_vm3 = vcmask 146432  }
 0x5fb   :  { %v2296_v16 = vsub.s32 32, %v2295_v40  ;;  %v2300_v49 = vsub.s32 4294967266, %v2295_v40  ;;  %v2297_v39 = vshll.u32 %v2288_v55, %v2295_v40  ;;  %v2346_v55 = vpop.permute.xlu2 %2345 }
 0x5fc   :  { %v2161_v12 = vadd.f32 0.041655596, %v2160_v54  ;;  %v2168_v63 = vadd.f32 0.008332121, %v2167_v1 }
 0x5fd   :  { %v2298_v36 = vshrl.u32 %v2280_v43, %v2296_v16  ;;  %v2301_v18 = vadd.s32 127, %v2300_v49 }
 0x5fe   :  { %v2162_v0 = vmul.f32 %v2161_v12, %v2159_v48  ;;  %v2169_v9 = vmul.f32 %v2168_v63, %v2159_v48 }
 0x5ff   :  { %v2299_v47 = vor.u32 %v2298_v36, %v2297_v39  ;;  %v2302_v58 = vshll.u32 %v2301_v18, 23  ;;  %v2351_v39 = vpop.permute.xlu0 %2350 }
 0x600   :  { %v2163_v17 = vadd.f32 -0.4999988, %v2162_v0  ;;  %v2170_v19 = vadd.f32 -0.16666654, %v2169_v9 }
 0x601   :  { %v2303_v30 = vor.u32 4788187, %v2302_v58  ;;  %v2306_v61 = vcvt.s32.f32 %v2299_v47 }
 0x602   :  { %v2164_v52 = vmul.f32 %v2163_v17, %v2159_v48  ;;  %v2171_v6 = vmul.f32 %v2170_v19, %v2159_v48 }
 0x603   :  { %v2304_v57 = vand.u32 2147483647, %v2303_v30 }
 0x604   :  { %v2165_v7 = vadd.f32 1.0, %v2164_v52  ;;  %v2172_v27 = vadd.f32 1.0, %v2171_v6 }
 0x605   :  { %v2307_v34 = vmul.f32 %v2306_v61, %v2304_v57  ;;  %v3743_v57 = vld [vmem:[%s5544_s2 + $0x50] sm:$0xff]  ;;  %v3739_v61 = vld [vmem:[%s5546_s4 + $0x20] sm:$0xff] }
 0x606   :  { %v2173_v20 = vmul.f32 %v2172_v27, %v2157_v33  ;;  %v2182_v44 = vxor.u32 2147483648, %v2165_v7  ;;  %v2310_v33 = vsub.s32 4, %v5031_v62 }
 0x607   :  { %v2308_v42 = vxor.u32 2147483648, %v2307_v34 }
 0x608   :  { %v2179_v24 = vxor.u32 2147483648, %v2173_v20  ;;  %v2183_v22 = vsel %vm2181_vm0, %v2182_v44, %v2173_v20  ;;  %v2311_v1 = vsel %vm2188_vm1, %v2310_v33, %v5031_v62  ;;  %v3453_v33 = vld [vmem:[%s5550_s8 + $0x18] sm:$0xff] }
 0x609   :  { %v2309_v15 = vsel %vm2188_vm1, %v2308_v42, %v2307_v34  ;;  %v2313_v12 = vsel %vm5058_vm15, 0, %v2311_v1  ;;  %v3760_v34 = vld [vmem:[%s5544_s2 + $0x68] sm:$0xff]  ;;  %v3795_v42 = vld [vmem:[#allocation2] sm:$0xf] }
 0x60a   :  { %v2180_v29 = vsel %vm2178_vm14, %v2165_v7, %v2179_v24  ;;  %v2312_v5 = vsel %vm5058_vm15, %v4921_v45, %v2309_v15  ;;  %v2330_v59 = vadd.s32 3, %v2313_v12  ;;  %v3742_v45 = vld [vmem:[%s5543_s1 + $0x58] sm:$0xff]  ;;  %v3740_v24 = vld [vmem:[%s5546_s4 + $0x28] sm:$0xff]  ;;  %v3759_v15 = vld [vmem:[%s5544_s2 + $0x60] sm:$0xff] }
 0x60b   :  { %v2184_v60 = vsel %vm2177_vm6, %v2180_v29, %v2183_v22  ;;  %v2314_v48 = vmul.f32 %v2312_v5, %v2312_v5  ;;  %v3757_v29 = vld [vmem:[%s5543_s1 + $0x60] sm:$0xff] }
 0x60c   :  { %v2185_v56 = vsel %vm2174_vm13, nan, %v2184_v60  ;;  %v2331_v19 = vand.u32 3, %v2330_v59  ;;  %v3753_v22 = vld [vmem:[%s5548_s6 + $0x20] sm:$0xff]  ;;  %v3744_v60 = vld [vmem:[%s5544_s2 + $0x58] sm:$0xff]  ;;  %s3489_s2 = sshll.u32 %s5551_s9, 4  ;;  %s3490_s2 = int_to_ptr.hbm [resolvable:$true] %s3489_s2 }
 0x60d   :  { %v2341_v21 = vmul.f32 %v2185_v56, %v2185_v56  ;;  %v2315_v14 = vmul.f32 -0.001358992, %v2314_v48  ;;  %v2322_v54 = vmul.f32 -0.00019511016, %v2314_v48  ;;  %v3758_v56 = vld [vmem:[%s5543_s1 + $0x68] sm:$0xff] }
 0x60e   :  { %vm2333_vm2 = vcmp.eq.s32.totalorder %v2331_v19, 0  ;;  %vm2336_vm4 = vcmp.eq.s32.totalorder %v2331_v19, 2  ;;  %vm2332_vm7 = vcmp.lt.s32.totalorder %v2331_v19, 2  ;;  %v3830_v19 = vld [vmem:[%s5545_s3 + $0x90] sm:$0xff] }
 0x60f   :  { %v2353_v37 = vmul.f32 %v2346_v55, %v2341_v21  ;;  %v2316_v10 = vadd.f32 0.041655596, %v2315_v14  ;;  %v2323_v25 = vadd.f32 0.008332121, %v2322_v54  ;;  %v3754_v21 = vld [vmem:[%s5548_s6 + $0x28] sm:$0xff]  ;;  %v3827_v54 = vld [vmem:[%s5545_s3 + $0x80] sm:$0xff] }
 0x610   :  { %v3836_v55 = vld [vmem:[#allocation2 + $0x8] sm:$0xf0] }
 0x611   :  { %v2355_v3 = vadd.f32 %v2353_v37, %v4908_v50  ;;  %v2317_v63 = vmul.f32 %v2316_v10, %v2314_v48  ;;  %v2324_v53 = vmul.f32 %v2323_v25, %v2314_v48  ;;  %v3450_v37 = vld [vmem:[%s5550_s8] sm:$0xff]  ;;  %v3796_v4 = vor.u32 %v3836_v55, %v3795_v42 }
 0x613   :  { %v2357_v31 = vpack.c.bf16 %v2355_v3, %v2355_v3  ;;  %v2318_v23 = vadd.f32 -0.4999988, %v2317_v63  ;;  %v2325_v8 = vadd.f32 -0.16666654, %v2324_v53  ;;  %v3828_v3 = vld [vmem:[%s5545_s3 + $0x88] sm:$0xff]  ;;  %v3823_v53 = vld [vmem:[%s5545_s3 + $0x70] sm:$0xff] }
 0x615   :  { %2359 = vst.msk [vmem:[#allocation2 + $0x4] sm:$0xf] %vm388_vm5, %v2357_v31  ;;  %v2319_v0 = vmul.f32 %v2318_v23, %v2314_v48  ;;  %v2326_v9 = vmul.f32 %v2325_v8, %v2314_v48  ;;  %v3826_v8 = vld [vmem:[%s5545_s3 + $0x78] sm:$0xff] }
 0x617   :  { %v2320_v40 = vadd.f32 1.0, %v2319_v0  ;;  %v2327_v17 = vadd.f32 1.0, %v2326_v9 }
 0x619   :  { %v2328_v43 = vmul.f32 %v2327_v17, %v2312_v5  ;;  %v2337_v16 = vxor.u32 2147483648, %v2320_v40  ;;  %v3451_v5 = vld [vmem:[%s5550_s8 + $0x8] sm:$0xff]  ;;  %v3831_v17 = vld [vmem:[%s5545_s3 + $0x98] sm:$0xff] }
 0x61b   :  { %v2334_v62 = vxor.u32 2147483648, %v2328_v43  ;;  %v2338_v49 = vsel %vm2336_vm4, %v2337_v16, %v2328_v43 }
 0x61c   :  { %v3715_v11 = vld [vmem:[#allocation2 + $0x4] sm:$0xf] }
 0x61d   :  { %v2335_v13 = vsel %vm2333_vm2, %v2320_v40, %v2334_v62  ;;  %v3824_v58 = vld [vmem:[#allocation2 + $0x4] sm:$0xf] }
 0x61e   :  { %v2339_v52 = vsel %vm2332_vm7, %v2335_v13, %v2338_v49  ;;  %v3832_v40 = vld [vmem:[%s5545_s3 + $0xa0] sm:$0xff] }
 0x61f   :  { %v2340_v6 = vsel %vm2329_vm8, nan, %v2339_v52 }
 0x620   :  { %v2342_v36 = vmul.f32 %v2340_v6, %v2340_v6 }
 0x622   :  { %v2354_v18 = vmul.f32 %v2351_v39, %v2342_v36 }
 0x624   :  { %v2356_v7 = vadd.f32 %v2354_v18, %v4918_v46 }
 0x626   :  { %v2358_v27 = vpack.c.bf16 %v2356_v7, %v2356_v7 }
 0x628   :  { %2360 = vst.msk [vmem:[#allocation2 + $0x10] sm:$0xf] %vm388_vm5, %v2358_v27 }
 0x62f   :  { %v3829_v47 = vld [vmem:[#allocation2 + $0xc] sm:$0xf0] }
 0x630   :  { %v3690_v20 = vld [vmem:[#allocation2 + $0xc] sm:$0xf0]  ;;  %v3716_v44 = vor.u32 %v3829_v47, %v3715_v11 }
 0x631   :  { %v3693_v30 = vor.u32 %v3824_v58, %v3690_v20 }
 0x632   :  { %2494 = vmatpush.bf16.msrb.mxu3 %v3716_v44 }
 0x633   :  { %2413 = vrot.lane.b32.xlu0 %v3693_v30, %s3913_s26  ;;  %2384 = vrot.lane.b32.xlu1 %v3693_v30, %s3912_s21 }
 0x634   :  { %2445 = vrot.lane.b32.xlu2 %v3693_v30, %s3909_s16 }
 0x635   :  { %3717 = vmatmul.msk.bf16.vlgmr.msrb.gmra.mxu3 %vm418_vm9, %v3828_v3 }
 0x63b   :  { %2541 = vrot.lane.b32.xlu0 %v3716_v44, %s3914_s27  ;;  %2571 = vrot.lane.b32.xlu1 %v3716_v44, %s3915_s28 }
 0x63c   :  { %2411 = vrot.lane.b32.xlu2 %v5048_v51, %s3913_s26  ;;  %v3741_v51 = vld [vmem:[%s5543_s1 + $0x50] sm:$0xff] }
 0x643   :  { %2621 = vperm.xlu0 %3864, %v3742_v45   ;;  %2603 = vperm.xlu1 %3865, %v3740_v24  }
 0x644   :  { %2511 = vrot.lane.b32.xlu2 %v3716_v44, %s3911_s18 }
 0x64b   :  { %2940 = vperm.xlu0 %3864, %v3743_v57   ;;  %2616 = vperm.xlu1 %3865, %v3741_v51  }
 0x64c   :  { %2598 = vperm.xlu2 %3866, %v3739_v61  }
 0x653   :  { %3007 = vperm.xlu0 %3864, %v3757_v29   ;;  %2960 = vperm.xlu1 %3865, %v3753_v22  }
 0x654   :  { %2945 = vperm.xlu2 %3866, %v3744_v60  }
 0x659   :  { %v2444_v48 = vpop.permute.xlu1 %2443  ;;  %v2383_v1 = vpop.permute.xlu0 %2382 }
 0x65b   :  { %3336 = vperm.xlu0 %3864, %v3760_v34   ;;  %3012 = vperm.xlu1 %3865, %v3758_v56  }
 0x65c   :  { %2965 = vperm.xlu2 %3866, %v3754_v21  }
 0x663   :  { %3456 = vperm.xlu0 %3864, %v3450_v37   ;;  %3419 = vrot.lane.b32.xlu1 %v3796_v4, %s3904_s23 }
 0x664   :  { %3331 = vperm.xlu2 %3866, %v3759_v15  }
 0x66b   :  { %3471 = vperm.xlu0 %3864, %v3453_v33   ;;  %3461 = vperm.xlu1 %3865, %v3451_v5  }
 0x68e   :  { %v2446_v31 = vpop.permute.xlu2 %2445 }
 0x68f   :  { %v2447_v14 = vsel %vm1429_vm12, %v2444_v48, %v2446_v31 }
 0x690   :  { %2459 = vmatpush.bf16.msrb.mxu2 %v2447_v14 }
 0x693   :  { %3706 = vmatmul.msk.bf16.vlgmr.msrb.gmra.mxu2 %vm418_vm9, %v3827_v54 }
 0x696   :  { %v2412_v10 = vpop.permute.xlu2 %2411 }
 0x69e   :  { %v2512_v59 = vpop.permute.xlu2 %2511 }
 0x6a5   :  { %v2414_v25 = vpop.permute.xlu0 %2413  ;;  %v2385_v63 = vpop.permute.xlu1 %2384 }
 0x6a6   :  { %v2416_v12 = vsel %vm2415_vm10, %v2412_v10, %v2414_v25  ;;  %v2387_v23 = vsel %vm2386_vm3, %v2383_v1, %v2385_v63  ;;  %v2599_v57 = vpop.permute.xlu2 %2598 }
 0x6a7   :  { %2428 = vmatpush.bf16.msrb.mxu1 %v2416_v12  ;;  %2399 = vmatpush.bf16.msrb.mxu0 %v2387_v23 }
 0x6aa   :  { %3699 = vmatmul.msk.bf16.vlgmr.msrb.gmra.mxu1 %vm418_vm9, %v3823_v53  ;;  %3694 = vmatmul.msk.bf16.vlgmr.msrb.gmra.mxu0 %vm418_vm9, %v3826_v8 }
 0x6ab   :  { %2524 = vmatpush.bf16.msra.mxu0 %v2512_v59 }
 0x6ad   :  { %v2542_v0 = vpop.permute.xlu0 %2541  ;;  %v2572_v9 = vpop.permute.xlu1 %2571 }
 0x6ae   :  { %2554 = vmatpush.bf16.msra.mxu1 %v2542_v0  ;;  %2584 = vmatpush.bf16.msra.mxu2 %v2572_v9 }
 0x6b1   :  { %3738 = vmatmul.msk.bf16.vlgmr.msra.gmra.mxu2 %vm418_vm9, %v3832_v40 }
 0x6b5   :  { %v2604_v18 = vpop.permute.xlu1 %2603  ;;  %v2622_v3 = vpop.permute.xlu0 %2621 }
 0x6b8   :  { %v2496_v36 = vpop.f32.mrf.mxu3 }
 0x6ba   :  { %3731 = vmatmul.msk.bf16.vlgmr.msra.gmra.mxu1 %vm418_vm9, %v3831_v17  ;;  %3724 = vmatmul.msk.bf16.vlgmr.msra.gmra.mxu0 %vm418_vm9, %v3830_v19 }
 0x6bd   :  { %v2617_v29 = vpop.permute.xlu1 %2616 }
 0x6c0   :  { %v2498_v45 = vpop.f32.mrf.mxu3 }
 0x716   :  { %v2461_v43 = vpop.f32.mrf.mxu2 }
 0x71e   :  { %v2463_v52 = vpop.f32.mrf.mxu2 }
 0x727   :  { %v2430_v16 = vpop.f32.mrf.mxu1  ;;  %v2401_v62 = vpop.f32.mrf.mxu0 }
 0x728   :  { %v2431_v13 = vadd.f32 %v2430_v16, %v2401_v62 }
 0x72a   :  { %v2466_v39 = vadd.f32 %v2461_v43, %v2431_v13 }
 0x72c   :  { %v2501_v7 = vadd.f32 %v2496_v36, %v2466_v39 }
 0x72f   :  { %v2432_v49 = vpop.f32.mrf.mxu1  ;;  %v2403_v6 = vpop.f32.mrf.mxu0 }
 0x730   :  { %v2433_v27 = vadd.f32 %v2432_v49, %v2403_v6 }
 0x732   :  { %v2467_v44 = vadd.f32 %v2463_v52, %v2433_v27 }
 0x734   :  { %v2586_v20 = vpop.f32.mrf.mxu2  ;;  %v2502_v51 = vadd.f32 %v2498_v45, %v2467_v44 }
 0x737   :  { %v2526_v11 = vpop.f32.mrf.mxu0  ;;  %v2556_v47 = vpop.f32.mrf.mxu1 }
 0x738   :  { %v2531_v58 = vadd.f32 %v2526_v11, %v2501_v7 }
 0x73a   :  { %v2561_v30 = vadd.f32 %v2556_v47, %v2531_v58 }
 0x73c   :  { %v2591_v24 = vadd.f32 %v2586_v20, %v2561_v30  ;;  %v2588_v55 = vpop.f32.mrf.mxu2 }
 0x73e   :  { %v5153_v61 = vadd.f32 %v2599_v57, %v2591_v24 }
 0x73f   :  { %v2528_v22 = vpop.f32.mrf.mxu0  ;;  %v2558_v56 = vpop.f32.mrf.mxu1 }
 0x740   :  { %v5156_v60 = vmul.f32 %v2617_v29, %v5153_v61  ;;  %v2532_v34 = vadd.f32 %v2528_v22, %v2502_v51 }
 0x742   :  { %v2629_v21 = vand.u32 2139095040, %v5156_v60  ;;  %v2562_v42 = vadd.f32 %v2558_v56, %v2532_v34  ;;  %v2626_v15 = vand.u32 2147483647, %v5156_v60 }
 0x744   :  { %v2630_v37 = vshrl.u32 %v2629_v21, 23  ;;  %v2592_v4 = vadd.f32 %v2588_v55, %v2562_v42  ;;  %v2633_v14 = vand.u32 8388607, %v2626_v15 }
 0x746   :  { %v3745_v33 = vadd.s32 4294967169, %v2630_v37  ;;  %v5160_v5 = vadd.f32 %v2604_v18, %v2592_v4  ;;  %v2634_v12 = vor.u32 8388608, %v2633_v14 }
 0x748   :  { %v2636_v48 = vadd.s32 1, %v3745_v33  ;;  %v5163_v31 = vmul.f32 %v2622_v3, %v5160_v5  ;;  %v5195_v27 = vshll.u32 %v2634_v12, 8 }
 0x74a   :  { %vm2637_vm12 = vcmp.gt.s32.totalorder %v2636_v48, 0  ;;  %v2781_v1 = vand.u32 2147483647, %v5163_v31  ;;  %v2784_v10 = vand.u32 2139095040, %v5163_v31  ;;  %v2675_v57 = vand.u32 65535, %v5195_v27 }
 0x74b   :  { %v2638_v54 = vsel %vm2637_vm12, %v2636_v48, 0  ;;  %v2676_v42 = vshrl.u32 %v5195_v27, 16 }
 0x74c   :  { %v2640_v25 = vand.u32 31, %v2638_v54  ;;  %v2785_v53 = vshrl.u32 %v2784_v10, 23  ;;  %v5169_v23 = vshrl.u32 %v2638_v54, 5  ;;  %v2788_v0 = vand.u32 8388607, %v2781_v1 }
 0x74e   :  { %v2641_v63 = vsub.s32 32, %v2640_v25  ;;  %v2643_v8 = vshll.u32 %v3896_v26, %v2640_v25  ;;  %v2646_v59 = vshll.u32 %v3897_v28, %v2640_v25  ;;  %v2649_v17 = vshll.u32 %v3898_v32, %v2640_v25 }
 0x74f   :  { %v2652_v43 = vshll.u32 %v3899_v35, %v2640_v25  ;;  %v2655_v62 = vshll.u32 %v3900_v38, %v2640_v25  ;;  %v3748_v36 = vadd.s32 4294967169, %v2785_v53  ;;  %vm2658_vm14 = vcmp.lt.s32.totalorder %v5169_v23, 1 }
 0x750   :  { %v2644_v9 = vshrl.u32 %v3897_v28, %v2641_v63  ;;  %v2647_v40 = vshrl.u32 %v3898_v32, %v2641_v63  ;;  %v2650_v19 = vshrl.u32 %v3899_v35, %v2641_v63  ;;  %v2653_v16 = vshrl.u32 %v3900_v38, %v2641_v63 }
 0x751   :  { %v2656_v13 = vshrl.u32 %v3901_v41, %v2641_v63  ;;  %vm2661_vm0 = vcmp.lt.s32.totalorder %v5169_v23, 4  ;;  %v2789_v11 = vor.u32 8388608, %v2788_v0  ;;  %vm2660_vm6 = vcmp.lt.s32.totalorder %v5169_v23, 3 }
 0x752   :  { %v5183_v49 = vor.u32 %v2644_v9, %v2643_v8  ;;  %v5185_v52 = vor.u32 %v2647_v40, %v2646_v59  ;;  %v5187_v6 = vor.u32 %v2650_v19, %v2649_v17  ;;  %v2654_v39 = vor.u32 %v2653_v16, %v2652_v43 }
 0x753   :  { %v2657_v18 = vor.u32 %v2656_v13, %v2655_v62  ;;  %v2791_v20 = vadd.s32 1, %v3748_v36  ;;  %vm2659_vm13 = vcmp.lt.s32.totalorder %v5169_v23, 2  ;;  %v5215_v29 = vshll.u32 %v2789_v11, 8 }
 0x754   :  { %v2670_v7 = vsel %vm2658_vm14, %v5185_v52, %v5187_v6  ;;  %v2667_v47 = vsel %vm2661_vm0, %v2654_v39, 920167782  ;;  %v2666_v44 = vsel %vm2658_vm14, %v5183_v49, %v5185_v52  ;;  %v5223_v37 = vshrl.u32 %v3896_v26, %v2641_v63 }
 0x755   :  { %v2671_v58 = vsel %vm2661_vm0, %v2657_v18, 1326507024  ;;  %v2668_v30 = vsel %vm2660_vm6, %v5187_v6, %v2667_v47  ;;  %vm2792_vm1 = vcmp.gt.s32.totalorder %v2791_v20, 0  ;;  %v2830_v3 = vand.u32 65535, %v5215_v29 }
 0x756   :  { %v2672_v45 = vsel %vm2660_vm6, %v2654_v39, %v2671_v58  ;;  %v2669_v22 = vsel %vm2659_vm13, %v2666_v44, %v2668_v30  ;;  %v2793_v56 = vsel %vm2792_vm1, %v2791_v20, 0  ;;  %v2831_v10 = vshrl.u32 %v5215_v29, 16 }
 0x757   :  { %v2673_v24 = vsel %vm2659_vm13, %v2670_v7, %v2672_v45  ;;  %v2795_v55 = vand.u32 31, %v2793_v56  ;;  %v2699_v4 = vand.u32 65535, %v2669_v22  ;;  %v2700_v33 = vshrl.u32 %v2669_v22, 16 }
 0x758   :  { %v2678_v51 = vshrl.u32 %v2673_v24, 16  ;;  %v2677_v34 = vand.u32 65535, %v2673_v24  ;;  %v5228_v12 = vshrl.u32 %v2793_v56, 5 }
 0x759   :  { %v2796_v54 = vsub.s32 32, %v2795_v55  ;;  %v2798_v53 = vshll.u32 %v3896_v26, %v2795_v55  ;;  %v2801_v8 = vshll.u32 %v3897_v28, %v2795_v55  ;;  %v2804_v0 = vshll.u32 %v3898_v32, %v2795_v55 }
 0x75a   :  { %v5219_v21 = vmul.u32 %v2678_v51, %v2675_v57  ;;  %v2679_v48 = vmul.u32 %v2677_v34, %v2675_v57  ;;  %v2682_v14 = vmul.u32 %v2678_v51, %v2676_v42  ;;  %v2807_v40 = vshll.u32 %v3899_v35, %v2795_v55 }
 0x75b   :  { %v2799_v63 = vshrl.u32 %v3897_v28, %v2796_v54  ;;  %v2802_v59 = vshrl.u32 %v3898_v32, %v2796_v54  ;;  %v2805_v9 = vshrl.u32 %v3899_v35, %v2796_v54  ;;  %v2808_v17 = vshrl.u32 %v3900_v38, %v2796_v54 }
 0x75c   :  { %v2683_v25 = vshll.u32 %v5219_v21, 16  ;;  %v2810_v19 = vshll.u32 %v3900_v38, %v2795_v55  ;;  %v2811_v43 = vshrl.u32 %v3901_v41, %v2796_v54  ;;  %v5240_v16 = vmul.u32 %v2700_v33, %v2675_v57 }
 0x75d   :  { %v2800_v62 = vor.u32 %v2799_v63, %v2798_v53  ;;  %v5242_v13 = vor.u32 %v2802_v59, %v2801_v8  ;;  %v2806_v36 = vor.u32 %v2805_v9, %v2804_v0  ;;  %v5244_v39 = vmul.u32 %v2700_v33, %v2676_v42 }
 0x75e   :  { %v2809_v18 = vor.u32 %v2808_v17, %v2807_v40  ;;  %v2812_v7 = vor.u32 %v2811_v43, %v2810_v19  ;;  %vm2813_vm15 = vcmp.lt.s32.totalorder %v5228_v12, 1  ;;  %vm2687_vm2 = vc.u32 %v2679_v48, %v2683_v25 }
 0x75f   :  { %vm2816_vm4 = vcmp.lt.s32.totalorder %v5228_v12, 4  ;;  %v2821_v11 = vsel %vm2813_vm15, %v2800_v62, %v5242_v13  ;;  %v2825_v47 = vsel %vm2813_vm15, %v5242_v13, %v2806_v36  ;;  %vm2815_vm7 = vcmp.lt.s32.totalorder %v5228_v12, 3 }
 0x760   :  { %v2822_v58 = vsel %vm2816_vm4, %v2809_v18, 920167782  ;;  %v2826_v20 = vsel %vm2816_vm4, %v2812_v7, 1326507024  ;;  %v5259_v44 = vmul.u32 %v2677_v34, %v2676_v42  ;;  %v2689_v30 = vadd.s32 %v2683_v25, %v2679_v48 }
 0x761   :  { %vm2814_vm8 = vcmp.lt.s32.totalorder %v5228_v12, 2  ;;  %v2823_v45 = vsel %vm2815_vm7, %v2806_v36, %v2822_v58  ;;  %v2827_v24 = vsel %vm2815_vm7, %v2809_v18, %v2826_v20  ;;  %v2797_v51 = vshrl.u32 %v3896_v26, %v2796_v54 }
 0x762   :  { %v2824_v22 = vsel %vm2814_vm8, %v2821_v11, %v2823_v45  ;;  %v2828_v56 = vsel %vm2814_vm8, %v2825_v47, %v2827_v24  ;;  %v2688_v34 = vsel %vm2687_vm2, 1, %v3895_v2  ;;  %v2684_v53 = vshrl.u32 %v5219_v21, 16 }
 0x763   :  { %v2832_v55 = vand.u32 65535, %v2828_v56  ;;  %v2833_v33 = vshrl.u32 %v2828_v56, 16  ;;  %v2854_v48 = vand.u32 65535, %v2824_v22  ;;  %v2855_v25 = vshrl.u32 %v2824_v22, 16 }
 0x764   :  { %v2685_v8 = vshll.u32 %v5259_v44, 16  ;;  %v2701_v63 = vmul.u32 %v2699_v4, %v2675_v57  ;;  %v5274_v59 = vmul.u32 %v2699_v4, %v2676_v42  ;;  %v2817_v54 = vsel %vm2813_vm15, %v2797_v51, %v2800_v62 }
 0x765   :  { %v2818_v0 = vsel %vm2816_vm4, %v2806_v36, 2102212464  ;;  %v2835_v9 = vmul.u32 %v2833_v33, %v2830_v3  ;;  %v2836_v40 = vmul.u32 %v2832_v55, %v2831_v10  ;;  %v2857_v17 = vmul.u32 %v2855_v25, %v2830_v3 }
 0x766   :  { %v2858_v19 = vmul.u32 %v2854_v48, %v2831_v10  ;;  %v2690_v43 = vadd.s32 %v2688_v34, %v2682_v14  ;;  %vm2691_vm10 = vc.u32 %v2689_v30, %v2685_v8  ;;  %v2834_v18 = vmul.u32 %v2832_v55, %v2830_v3 }
 0x767   :  { %v2837_v7 = vmul.u32 %v2833_v33, %v2831_v10  ;;  %v2838_v21 = vshll.u32 %v2835_v9, 16  ;;  %v2705_v11 = vshll.u32 %v5240_v16, 16  ;;  %v2840_v57 = vshll.u32 %v2836_v40, 16 }
 0x768   :  { %v2856_v42 = vmul.u32 %v2854_v48, %v2830_v3  ;;  %v2859_v4 = vmul.u32 %v2855_v25, %v2831_v10  ;;  %v2860_v47 = vshll.u32 %v2857_v17, 16  ;;  %v2862_v58 = vshll.u32 %v2858_v19, 16 }
 0x769   :  { %vm2842_vm3 = vc.u32 %v2834_v18, %v2838_v21  ;;  %v2844_v62 = vadd.s32 %v2838_v21, %v2834_v18  ;;  %v2692_v36 = vsel %vm2691_vm10, 1, %v3895_v2  ;;  %vm2709_vm15 = vc.u32 %v2701_v63, %v2705_v11 }
 0x76a   :  { %v2843_v20 = vsel %vm2842_vm3, 1, %v3895_v2  ;;  %vm2864_vm12 = vc.u32 %v2856_v42, %v2860_v47  ;;  %v2866_v45 = vadd.s32 %v2860_v47, %v2856_v42  ;;  %v2694_v14 = vadd.s32 %v2692_v36, %v2690_v43 }
 0x76b   :  { %v2845_v30 = vadd.s32 %v2843_v20, %v2837_v7  ;;  %vm2846_vm1 = vc.u32 %v2844_v62, %v2840_v57  ;;  %v2865_v24 = vsel %vm2864_vm12, 1, %v3895_v2  ;;  %v2707_v10 = vshll.u32 %v5274_v59, 16 }
 0x76c   :  { %v2847_v51 = vsel %vm2846_vm1, 1, %v3895_v2  ;;  %v2867_v3 = vadd.s32 %v2865_v24, %v2859_v4  ;;  %vm2868_vm2 = vc.u32 %v2866_v45, %v2862_v58  ;;  %v2839_v22 = vshrl.u32 %v2835_v9, 16 }
 0x76d   :  { %v2849_v56 = vadd.s32 %v2847_v51, %v2845_v30  ;;  %v2869_v34 = vsel %vm2868_vm2, 1, %v3895_v2  ;;  %v2710_v55 = vsel %vm2709_vm15, 1, %v3895_v2  ;;  %v2861_v33 = vshrl.u32 %v2857_v17, 16 }
 0x76e   :  { %v2871_v48 = vadd.s32 %v2869_v34, %v2867_v3  ;;  %v2711_v25 = vadd.s32 %v2705_v11, %v2701_v63  ;;  %v2712_v8 = vadd.s32 %v2710_v55, %v5244_v39  ;;  %v2819_v43 = vsel %vm2815_vm7, %v5242_v13, %v2818_v0 }
 0x76f   :  { %v2841_v18 = vshrl.u32 %v2836_v40, 16  ;;  %v2850_v7 = vadd.s32 %v2849_v56, %v2839_v22  ;;  %v2695_v21 = vadd.s32 %v2694_v14, %v2684_v53  ;;  %v2663_v9 = vsel %vm2661_vm0, %v5187_v6, 2102212464 }
 0x770   :  { %v2863_v57 = vshrl.u32 %v2858_v19, 16  ;;  %v2872_v42 = vadd.s32 %v2871_v48, %v2861_v33  ;;  %vm2713_vm4 = vc.u32 %v2711_v25, %v2707_v10  ;;  %v2870_v17 = vadd.s32 %v2866_v45, %v2862_v58 }
 0x771   :  { %v2851_v4 = vadd.s32 %v2850_v7, %v2841_v18  ;;  %v2686_v63 = vshrl.u32 %v5259_v44, 16  ;;  %v2714_v39 = vsel %vm2713_vm4, 1, %v3895_v2  ;;  %v2820_v11 = vsel %vm2814_vm8, %v2817_v54, %v2819_v43 }
 0x772   :  { %v2873_v13 = vadd.s32 %v2872_v42, %v2863_v57  ;;  %v2706_v0 = vshrl.u32 %v5240_v16, 16  ;;  %v2716_v53 = vadd.s32 %v2714_v39, %v2712_v8  ;;  %v2662_v6 = vsel %vm2658_vm14, %v5223_v37, %v5183_v49 }
 0x773   :  { %v2664_v40 = vsel %vm2660_vm6, %v5185_v52, %v2663_v9  ;;  %vm2876_vm0 = vc.u32 %v2851_v4, %v2870_v17  ;;  %v2696_v44 = vadd.s32 %v2695_v21, %v2686_v63  ;;  %v2708_v47 = vshrl.u32 %v5274_v59, 16 }
 0x774   :  { %v2877_v19 = vadd.s32 1, %v2873_v13  ;;  %v2717_v12 = vadd.s32 %v2716_v53, %v2706_v0  ;;  %v2874_v54 = vmul.u32 %v5215_v29, %v2820_v11  ;;  %v2715_v62 = vadd.s32 %v2711_v25, %v2707_v10 }
 0x775   :  { %v2665_v16 = vsel %vm2659_vm13, %v2662_v6, %v2664_v40  ;;  %v2875_v25 = vadd.s32 %v2870_v17, %v2851_v4  ;;  %vm2783_vm10 = vcmp.lt.s32.totalorder %v5163_v31, 0  ;;  %vm5318_vm3 = vcmp.le.f32.partialorder %v2781_v1, 0.7853982 }
 0x776   :  { %v2878_v58 = vsel %vm2876_vm0, %v2877_v19, %v2873_v13  ;;  %v2718_v36 = vadd.s32 %v2717_v12, %v2708_v47  ;;  %vm2721_vm14 = vc.u32 %v2696_v44, %v2715_v62  ;;  %v2719_v37 = vmul.u32 %v5195_v27, %v2665_v16 }
 0x777   :  { %v2879_v20 = vadd.s32 %v2878_v58, %v2874_v54  ;;  %v2720_v39 = vadd.s32 %v2715_v62, %v2696_v44  ;;  %vm2628_vm12 = vcmp.lt.s32.totalorder %v5156_v60, 0  ;;  %vm5328_vm1 = vcmp.le.f32.partialorder %v2626_v15, 0.7853982 }
 0x778   :  { %v2722_v49 = vadd.s32 1, %v2718_v36  ;;  %vm2924_vm0 = vweird.f32 %v5163_v31 }
 0x779   :  { %v2880_v52 = vadd.s32 536870912, %v2879_v20 }
 0x77a   :  { %v2723_v45 = vsel %vm2721_vm14, %v2722_v49, %v2718_v36 }
 0x77b   :  { %v2881_v14 = vshrl.u32 %v2880_v52, 30  ;;  %v2724_v30 = vadd.s32 %v2723_v45, %v2719_v37 }
 0x77d   :  { %v2882_v24 = vshll.u32 %v2881_v14, 30  ;;  %v2725_v59 = vadd.s32 536870912, %v2724_v30 }
 0x77f   :  { %v2883_v51 = vsub.s32 %v2879_v20, %v2882_v24  ;;  %v5312_v3 = vshrl.u32 %v2725_v59, 30  ;;  %v2905_v20 = vsub.s32 4, %v2881_v14 }
 0x781   :  { %vm2884_vm6 = vcmp.lt.s32.totalorder %v2883_v51, 0  ;;  %v2885_v29 = vsub.s32 0, %v2883_v51  ;;  %v2727_v23 = vshll.u32 %v5312_v3, 30  ;;  %v2906_v59 = vsel %vm2783_vm10, %v2905_v20, %v2881_v14 }
 0x782   :  { %v2908_v14 = vsel %vm5318_vm3, 0, %v2906_v59 }
 0x783   :  { %v2886_v10 = vsel %vm2884_vm6, %v2885_v29, %v2883_v51  ;;  %v2728_v22 = vsub.s32 %v2724_v30, %v2727_v23 }
 0x784   :  { %v2887_v56 = vclz %v2886_v10  ;;  %v2750_v10 = vsub.s32 4, %v5312_v3 }
 0x785   :  { %vm2729_vm13 = vcmp.lt.s32.totalorder %v2728_v22, 0  ;;  %v2730_v55 = vsub.s32 0, %v2728_v22 }
 0x786   :  { %v3749_v34 = vadd.s32 4294967294, %v2887_v56 }
 0x787   :  { %v2731_v27 = vsel %vm2729_vm13, %v2730_v55, %v2728_v22 }
 0x788   :  { %vm3750_vm7 = vcmp.lt.s32.totalorder %v3749_v34, 0  ;;  %v2732_v48 = vclz %v2731_v27 }
 0x789   :  { %v2890_v33 = vsel %vm3750_vm7, 0, %v3749_v34  ;;  %vm2769_vm7 = vweird.f32 %v5156_v60 }
 0x78a   :  { %v2891_v8 = vsub.s32 32, %v2890_v33  ;;  %v2895_v43 = vsub.s32 4294967266, %v2890_v33  ;;  %v3746_v18 = vadd.s32 4294967294, %v2732_v48  ;;  %v2892_v7 = vshll.u32 %v2883_v51, %v2890_v33 }
 0x78c   :  { %v2893_v21 = vshrl.u32 %v2875_v25, %v2891_v8  ;;  %v2896_v9 = vadd.s32 127, %v2895_v43  ;;  %vm3747_vm8 = vcmp.lt.s32.totalorder %v3746_v18, 0  ;;  %v2751_v25 = vsel %vm2628_vm12, %v2750_v10, %v5312_v3  ;;  %v3751_v10 = vld [vmem:[%s5547_s5 + $0x20] sm:$0xff] }
 0x78d   :  { %v2735_v63 = vsel %vm3747_vm8, 0, %v3746_v18  ;;  %v2925_v8 = vadd.s32 3, %v2908_v14 }
 0x78e   :  { %v2894_v57 = vor.u32 %v2893_v21, %v2892_v7  ;;  %v2897_v42 = vshll.u32 %v2896_v9, 23  ;;  %v2736_v11 = vsub.s32 32, %v2735_v63  ;;  %v2740_v13 = vsub.s32 4294967266, %v2735_v63 }
 0x78f   :  { %v2737_v53 = vshll.u32 %v2728_v22, %v2735_v63  ;;  %v2753_v9 = vsel %vm5328_vm1, 0, %v2751_v25 }
 0x790   :  { %v2898_v0 = vor.u32 4788187, %v2897_v42  ;;  %v2738_v6 = vshrl.u32 %v2720_v39, %v2736_v11  ;;  %v2741_v40 = vadd.s32 127, %v2740_v13  ;;  %v2901_v47 = vcvt.s32.f32 %v2894_v57 }
 0x791   :  { %v2926_v11 = vand.u32 3, %v2925_v8 }
 0x792   :  { %v2899_v19 = vand.u32 2147483647, %v2898_v0  ;;  %v2739_v4 = vor.u32 %v2738_v6, %v2737_v53  ;;  %v2742_v17 = vshll.u32 %v2741_v40, 23  ;;  %v2770_v40 = vadd.s32 3, %v2753_v9 }
 0x793   :  { %vm2928_vm15 = vcmp.eq.s32.totalorder %v2926_v11, 0  ;;  %vm2931_vm2 = vcmp.eq.s32.totalorder %v2926_v11, 2  ;;  %vm2927_vm4 = vcmp.lt.s32.totalorder %v2926_v11, 2 }
 0x794   :  { %v2902_v12 = vmul.f32 %v2901_v47, %v2899_v19  ;;  %v2743_v54 = vor.u32 4788187, %v2742_v17  ;;  %v2746_v36 = vcvt.s32.f32 %v2739_v4 }
 0x796   :  { %v2903_v16 = vxor.u32 2147483648, %v2902_v12  ;;  %v2744_v58 = vand.u32 2147483647, %v2743_v54 }
 0x798   :  { %v2904_v62 = vsel %vm2783_vm10, %v2903_v16, %v2902_v12  ;;  %v2747_v37 = vmul.f32 %v2746_v36, %v2744_v58  ;;  %v2771_v16 = vand.u32 3, %v2770_v40 }
 0x799   :  { %v2907_v49 = vsel %vm5318_vm3, %v5163_v31, %v2904_v62 }
 0x79a   :  { %v2909_v52 = vmul.f32 %v2907_v49, %v2907_v49  ;;  %v2748_v45 = vxor.u32 2147483648, %v2747_v37  ;;  %vm2773_vm14 = vcmp.eq.s32.totalorder %v2771_v16, 0  ;;  %vm2776_vm6 = vcmp.eq.s32.totalorder %v2771_v16, 2 }
 0x79b   :  { %vm2772_vm13 = vcmp.lt.s32.totalorder %v2771_v16, 2 }
 0x79c   :  { %v2910_v30 = vmul.f32 -0.001358992, %v2909_v52  ;;  %v2917_v24 = vmul.f32 -0.00019511016, %v2909_v52  ;;  %v2749_v51 = vsel %vm2628_vm12, %v2748_v45, %v2747_v37  ;;  %v2946_v37 = vpop.permute.xlu2 %2945 }
 0x79d   :  { %v2752_v22 = vsel %vm5328_vm1, %v5156_v60, %v2749_v51  ;;  %v2941_v51 = vpop.permute.xlu0 %2940  ;;  %v3752_v60 = vld [vmem:[%s5547_s5 + $0x28] sm:$0xff] }
 0x79e   :  { %v2911_v29 = vadd.f32 0.041655596, %v2910_v30  ;;  %v2918_v23 = vadd.f32 0.008332121, %v2917_v24  ;;  %v2754_v56 = vmul.f32 %v2752_v22, %v2752_v22 }
 0x7a0   :  { %v2912_v34 = vmul.f32 %v2911_v29, %v2909_v52  ;;  %v2919_v15 = vmul.f32 %v2918_v23, %v2909_v52  ;;  %v2755_v55 = vmul.f32 -0.001358992, %v2754_v56  ;;  %v2762_v27 = vmul.f32 -0.00019511016, %v2754_v56 }
 0x7a2   :  { %v2913_v33 = vadd.f32 -0.4999988, %v2912_v34  ;;  %v2920_v48 = vadd.f32 -0.16666654, %v2919_v15  ;;  %v2756_v43 = vadd.f32 0.041655596, %v2755_v55 }
 0x7a3   :  { %v2763_v18 = vadd.f32 0.008332121, %v2762_v27 }
 0x7a4   :  { %v2914_v7 = vmul.f32 %v2913_v33, %v2909_v52  ;;  %v2921_v21 = vmul.f32 %v2920_v48, %v2909_v52  ;;  %v2757_v57 = vmul.f32 %v2756_v43, %v2754_v56  ;;  %v2966_v27 = vpop.permute.xlu2 %2965 }
 0x7a5   :  { %v2764_v42 = vmul.f32 %v2763_v18, %v2754_v56 }
 0x7a6   :  { %v2915_v63 = vadd.f32 1.0, %v2914_v7  ;;  %v2922_v39 = vadd.f32 1.0, %v2921_v21  ;;  %v2758_v13 = vadd.f32 -0.4999988, %v2757_v57 }
 0x7a7   :  { %v2765_v0 = vadd.f32 -0.16666654, %v2764_v42 }
 0x7a8   :  { %v2923_v53 = vmul.f32 %v2922_v39, %v2907_v49  ;;  %v2932_v6 = vxor.u32 2147483648, %v2915_v63  ;;  %v2759_v19 = vmul.f32 %v2758_v13, %v2754_v56 }
 0x7a9   :  { %v2766_v3 = vmul.f32 %v2765_v0, %v2754_v56 }
 0x7aa   :  { %v2929_v47 = vxor.u32 2147483648, %v2923_v53  ;;  %v2760_v4 = vadd.f32 1.0, %v2759_v19  ;;  %v2933_v54 = vsel %vm2931_vm2, %v2932_v6, %v2923_v53 }
 0x7ab   :  { %v2767_v17 = vadd.f32 1.0, %v2766_v3 }
 0x7ac   :  { %v2930_v12 = vsel %vm2928_vm15, %v2915_v63, %v2929_v47  ;;  %v2777_v44 = vxor.u32 2147483648, %v2760_v4 }
 0x7ad   :  { %v2934_v58 = vsel %vm2927_vm4, %v2930_v12, %v2933_v54  ;;  %v2768_v36 = vmul.f32 %v2767_v17, %v2752_v22 }
 0x7ae   :  { %v2935_v62 = vsel %vm2924_vm0, nan, %v2934_v58 }
 0x7af   :  { %v2937_v20 = vmul.f32 %v2935_v62, %v2935_v62  ;;  %v2774_v49 = vxor.u32 2147483648, %v2768_v36  ;;  %v2778_v30 = vsel %vm2776_vm6, %v2777_v44, %v2768_v36 }
 0x7b1   :  { %v2949_v52 = vmul.f32 %v2946_v37, %v2937_v20  ;;  %v2775_v45 = vsel %vm2773_vm14, %v2760_v4, %v2774_v49 }
 0x7b2   :  { %v2779_v24 = vsel %vm2772_vm13, %v2775_v45, %v2778_v30 }
 0x7b3   :  { %v2951_v59 = vadd.f32 %v2949_v52, %v5160_v5  ;;  %v2780_v1 = vsel %vm2769_vm7, nan, %v2779_v24  ;;  %v2961_v5 = vpop.permute.xlu1 %2960 }
 0x7b4   :  { %v2936_v31 = vmul.f32 %v2780_v1, %v2780_v1 }
 0x7b5   :  { %2988 = vmatpush.msra.mxu3 %v2951_v59 }
 0x7b6   :  { %v2948_v29 = vmul.f32 %v2941_v51, %v2936_v31 }
 0x7b8   :  { %v2950_v23 = vadd.f32 %v2948_v29, %v5153_v61  ;;  %v3008_v61 = vpop.permute.xlu0 %3007 }
 0x7ba   :  { %2989 = vmatpush.msra.mxu3 %v2950_v23 }
 0x7bb   :  { %3755 = vmatmul.msk.f32.vlgmr.msra.gmra.mxu3 %vm418_vm9, %v3751_v10  ;;  %v3013_v7 = vpop.permute.xlu1 %3012 }
 0x7c3   :  { %3756 = vmatmul.msk.f32.gmra.mxu3 %vm418_vm9, %v3752_v60 }
 0x83e   :  { %v2991_v22 = vpop.f32.mrf.mxu3 }
 0x83f   :  { %v2992_v56 = vadd.f32 %v2991_v22, %v2961_v5 }
 0x841   :  { %v5358_v14 = vadd.f32 %v2992_v56, %v4908_v50 }
 0x843   :  { %v5361_v34 = vmul.f32 %v3008_v61, %v5358_v14 }
 0x845   :  { %v3017_v15 = vand.u32 2147483647, %v5361_v34  ;;  %v3020_v55 = vand.u32 2139095040, %v5361_v34 }
 0x846   :  { %v2994_v33 = vpop.f32.mrf.mxu3 }
 0x847   :  { %v3021_v48 = vshrl.u32 %v3020_v55, 23  ;;  %v3024_v25 = vand.u32 8388607, %v3017_v15  ;;  %v2995_v8 = vadd.f32 %v2994_v33, %v2966_v27 }
 0x849   :  { %v3761_v43 = vadd.s32 4294967169, %v3021_v48  ;;  %v3025_v18 = vor.u32 8388608, %v3024_v25  ;;  %v5368_v50 = vadd.f32 %v2995_v8, %v4918_v46 }
 0x84b   :  { %v3027_v21 = vadd.s32 1, %v3761_v43  ;;  %v5371_v9 = vmul.f32 %v3013_v7, %v5368_v50  ;;  %v5373_v57 = vshll.u32 %v3025_v18, 8 }
 0x84d   :  { %vm3028_vm8 = vcmp.gt.s32.totalorder %v3027_v21, 0  ;;  %v3172_v63 = vand.u32 2147483647, %v5371_v9  ;;  %v3175_v39 = vand.u32 2139095040, %v5371_v9  ;;  %v3066_v0 = vand.u32 65535, %v5373_v57 }
 0x84e   :  { %v3029_v42 = vsel %vm3028_vm8, %v3027_v21, 0  ;;  %v3067_v46 = vshrl.u32 %v5373_v57, 16 }
 0x84f   :  { %v3031_v11 = vand.u32 31, %v3029_v42  ;;  %v3176_v53 = vshrl.u32 %v3175_v39, 23  ;;  %v3030_v6 = vshrl.u32 %v3029_v42, 5  ;;  %v5383_v3 = vand.u32 8388607, %v3172_v63 }
 0x851   :  { %v3032_v13 = vsub.s32 32, %v3031_v11  ;;  %v3034_v40 = vshll.u32 %v3896_v26, %v3031_v11  ;;  %v3037_v19 = vshll.u32 %v3897_v28, %v3031_v11  ;;  %v3040_v17 = vshll.u32 %v3898_v32, %v3031_v11 }
 0x852   :  { %v3043_v54 = vshll.u32 %v3899_v35, %v3031_v11  ;;  %v3046_v58 = vshll.u32 %v3900_v38, %v3031_v11  ;;  %v3764_v49 = vadd.s32 4294967169, %v3176_v53  ;;  %vm3049_vm10 = vcmp.lt.s32.totalorder %v3030_v6, 1 }
 0x853   :  { %v3035_v47 = vshrl.u32 %v3897_v28, %v3032_v13  ;;  %v3038_v4 = vshrl.u32 %v3898_v32, %v3032_v13  ;;  %v3041_v12 = vshrl.u32 %v3899_v35, %v3032_v13  ;;  %v3044_v16 = vshrl.u32 %v3900_v38, %v3032_v13 }
 0x854   :  { %v3047_v36 = vshrl.u32 %v3901_v41, %v3032_v13  ;;  %vm3052_vm3 = vcmp.lt.s32.totalorder %v3030_v6, 4  ;;  %v3033_v45 = vshrl.u32 %v3896_v26, %v3032_v13  ;;  %vm3051_vm12 = vcmp.lt.s32.totalorder %v3030_v6, 3 }
 0x855   :  { %v3036_v44 = vor.u32 %v3035_v47, %v3034_v40  ;;  %v3039_v62 = vor.u32 %v3038_v4, %v3037_v19  ;;  %v3042_v20 = vor.u32 %v3041_v12, %v3040_v17  ;;  %v3045_v37 = vor.u32 %v3044_v16, %v3043_v54 }
 0x856   :  { %v3048_v52 = vor.u32 %v3047_v36, %v3046_v58  ;;  %v3182_v51 = vadd.s32 1, %v3764_v49  ;;  %vm3050_vm1 = vcmp.lt.s32.totalorder %v3030_v6, 2  ;;  %v3180_v33 = vor.u32 8388608, %v5383_v3 }
 0x857   :  { %v3054_v30 = vsel %vm3052_vm3, %v3042_v20, 2102212464  ;;  %v3057_v24 = vsel %vm3049_vm10, %v3036_v44, %v3039_v62  ;;  %v3061_v59 = vsel %vm3049_vm10, %v3039_v62, %v3042_v20  ;;  %v3058_v1 = vsel %vm3052_vm3, %v3045_v37, 920167782 }
 0x858   :  { %v3062_v31 = vsel %vm3052_vm3, %v3048_v52, 1326507024  ;;  %v3053_v29 = vsel %vm3049_vm10, %v3033_v45, %v3036_v44  ;;  %v3059_v23 = vsel %vm3051_vm12, %v3042_v20, %v3058_v1  ;;  %v3055_v60 = vsel %vm3051_vm12, %v3039_v62, %v3054_v30 }
 0x859   :  { %v3063_v10 = vsel %vm3051_vm12, %v3045_v37, %v3062_v31  ;;  %v3060_v5 = vsel %vm3050_vm1, %v3057_v24, %v3059_v23  ;;  %vm3183_vm15 = vcmp.gt.s32.totalorder %v3182_v51, 0  ;;  %v5395_v48 = vsel %vm3050_vm1, %v3053_v29, %v3055_v60 }
 0x85a   :  { %v3064_v22 = vsel %vm3050_vm1, %v3061_v59, %v3063_v10  ;;  %v3090_v55 = vand.u32 65535, %v3060_v5  ;;  %v3091_v27 = vshrl.u32 %v3060_v5, 16  ;;  %v3184_v43 = vsel %vm3183_vm15, %v3182_v51, 0 }
 0x85b   :  { %v3068_v56 = vand.u32 65535, %v3064_v22  ;;  %v3069_v61 = vshrl.u32 %v3064_v22, 16  ;;  %v3186_v17 = vand.u32 31, %v3184_v43  ;;  %v5402_v62 = vshrl.u32 %v3184_v43, 5 }
 0x85c   :  { %v3093_v21 = vmul.u32 %v3091_v27, %v3066_v0  ;;  %v3094_v42 = vmul.u32 %v3090_v55, %v3067_v46  ;;  %v3092_v13 = vmul.u32 %v3090_v55, %v3066_v0  ;;  %v3095_v53 = vmul.u32 %v3091_v27, %v3067_v46 }
 0x85d   :  { %v3071_v25 = vmul.u32 %v3069_v61, %v3066_v0  ;;  %v3072_v8 = vmul.u32 %v3068_v56, %v3067_v46  ;;  %v3070_v18 = vmul.u32 %v3068_v56, %v3066_v0  ;;  %v3073_v7 = vmul.u32 %v3069_v61, %v3067_v46 }
 0x85e   :  { %v3096_v19 = vshll.u32 %v3093_v21, 16  ;;  %v3097_v47 = vshrl.u32 %v3093_v21, 16  ;;  %v3098_v3 = vshll.u32 %v3094_v42, 16  ;;  %v3099_v54 = vshrl.u32 %v3094_v42, 16 }
 0x85f   :  { %v3074_v39 = vshll.u32 %v3071_v25, 16  ;;  %v3075_v11 = vshrl.u32 %v3071_v25, 16  ;;  %v3076_v6 = vshll.u32 %v3072_v8, 16  ;;  %v3077_v40 = vshrl.u32 %v3072_v8, 16 }
 0x860   :  { %vm3100_vm4 = vc.u32 %v3092_v13, %v3096_v19  ;;  %v3102_v16 = vadd.s32 %v3096_v19, %v3092_v13  ;;  %v5399_v44 = vsub.s32 32, %v3186_v17  ;;  %v3189_v52 = vshll.u32 %v3896_v26, %v3186_v17 }
 0x861   :  { %vm3078_vm2 = vc.u32 %v3070_v18, %v3074_v39  ;;  %v3080_v4 = vadd.s32 %v3074_v39, %v3070_v18  ;;  %v3101_v36 = vsel %vm3100_vm4, 1, %v3895_v2  ;;  %v3192_v24 = vshll.u32 %v3897_v28, %v3186_v17 }
 0x862   :  { %v3079_v12 = vsel %vm3078_vm2, 1, %v3895_v2  ;;  %v3103_v46 = vadd.s32 %v3101_v36, %v3095_v53  ;;  %vm3104_vm14 = vc.u32 %v3102_v16, %v3098_v3  ;;  %v5405_v37 = vadd.s32 %v3102_v16, %v3098_v3 }
 0x863   :  { %v3081_v58 = vadd.s32 %v3079_v12, %v3073_v7  ;;  %vm3082_vm0 = vc.u32 %v3080_v4, %v3076_v6  ;;  %v3105_v49 = vsel %vm3104_vm14, 1, %v3895_v2  ;;  %v3190_v30 = vshrl.u32 %v3897_v28, %v5399_v44 }
 0x864   :  { %v3083_v0 = vsel %vm3082_vm0, 1, %v3895_v2  ;;  %v3107_v45 = vadd.s32 %v3105_v49, %v3103_v46  ;;  %v3193_v59 = vshrl.u32 %v3898_v32, %v5399_v44  ;;  %v3195_v31 = vshll.u32 %v3898_v32, %v3186_v17 }
 0x865   :  { %v3085_v20 = vadd.s32 %v3083_v0, %v3081_v58  ;;  %v3196_v51 = vshrl.u32 %v3899_v35, %v5399_v44  ;;  %v3198_v29 = vshll.u32 %v3899_v35, %v3186_v17  ;;  %v5417_v10 = vor.u32 %v3190_v30, %v3189_v52 }
 0x866   :  { %v3108_v23 = vadd.s32 %v3107_v45, %v3097_v47  ;;  %v5419_v60 = vor.u32 %v3193_v59, %v3192_v24  ;;  %v3199_v5 = vshrl.u32 %v3900_v38, %v5399_v44  ;;  %v3201_v56 = vshll.u32 %v3900_v38, %v3186_v17 }
 0x867   :  { %v3086_v1 = vadd.s32 %v3085_v20, %v3075_v11  ;;  %v3197_v22 = vor.u32 %v3196_v51, %v3195_v31  ;;  %v3202_v32 = vshrl.u32 %v3901_v41, %v5399_v44  ;;  %vm3204_vm13 = vcmp.lt.s32.totalorder %v5402_v62, 1 }
 0x868   :  { %v3109_v61 = vadd.s32 %v3108_v23, %v3099_v54  ;;  %v3200_v55 = vor.u32 %v3199_v5, %v3198_v29  ;;  %v5431_v27 = vshll.u32 %v3180_v33, 8  ;;  %v3110_v25 = vmul.u32 %v5373_v57, %v5395_v48 }
 0x869   :  { %v5423_v28 = vadd.s32 %v3086_v1, %v3077_v40  ;;  %v3203_v35 = vor.u32 %v3202_v32, %v3201_v56  ;;  %vm3207_vm7 = vcmp.lt.s32.totalorder %v5402_v62, 4  ;;  %v3212_v38 = vsel %vm3204_vm13, %v5417_v10, %v5419_v60 }
 0x86a   :  { %v3113_v8 = vadd.s32 1, %v3109_v61  ;;  %vm3206_vm8 = vcmp.lt.s32.totalorder %v5402_v62, 3  ;;  %v3213_v41 = vsel %vm3207_vm7, %v3200_v55, 920167782  ;;  %v3216_v33 = vsel %vm3204_vm13, %v5419_v60, %v3197_v22 }
 0x86b   :  { %vm3112_vm6 = vc.u32 %v5423_v28, %v5405_v37  ;;  %v3217_v57 = vsel %vm3207_vm7, %v3203_v35, 1326507024  ;;  %vm3205_vm10 = vcmp.lt.s32.totalorder %v5402_v62, 2  ;;  %v3214_v43 = vsel %vm3206_vm8, %v3197_v22, %v3213_v41 }
 0x86c   :  { %v3114_v48 = vsel %vm3112_vm6, %v3113_v8, %v3109_v61  ;;  %v3218_v18 = vsel %vm3206_vm8, %v3200_v55, %v3217_v57  ;;  %v3215_v21 = vsel %vm3205_vm10, %v3212_v38, %v3214_v43  ;;  %v3221_v39 = vand.u32 65535, %v5431_v27 }
 0x86d   :  { %v3115_v7 = vadd.s32 %v3114_v48, %v3110_v25  ;;  %v3219_v42 = vsel %vm3205_vm10, %v3216_v33, %v3218_v18  ;;  %v3222_v11 = vshrl.u32 %v5431_v27, 16  ;;  %v3246_v6 = vshrl.u32 %v3215_v21, 16 }
 0x86e   :  { %v3223_v13 = vand.u32 65535, %v3219_v42  ;;  %v3224_v53 = vshrl.u32 %v3219_v42, 16  ;;  %v3245_v19 = vand.u32 65535, %v3215_v21  ;;  %v3209_v55 = vsel %vm3207_vm7, %v3197_v22, 2102212464 }
 0x86f   :  { %v3116_v40 = vadd.s32 536870912, %v3115_v7  ;;  %v3248_v17 = vmul.u32 %v3246_v6, %v3221_v39  ;;  %v3250_v31 = vmul.u32 %v3246_v6, %v3222_v11  ;;  %v3188_v25 = vshrl.u32 %v3896_v26, %v5399_v44 }
 0x870   :  { %v3226_v47 = vmul.u32 %v3224_v53, %v3221_v39  ;;  %v3227_v4 = vmul.u32 %v3223_v13, %v3222_v11  ;;  %v3225_v12 = vmul.u32 %v3223_v13, %v3221_v39  ;;  %v3228_v58 = vmul.u32 %v3224_v53, %v3222_v11 }
 0x871   :  { %v5459_v3 = vshrl.u32 %v3116_v40, 30  ;;  %v3247_v36 = vmul.u32 %v3245_v19, %v3221_v39  ;;  %v3251_v0 = vshll.u32 %v3248_v17, 16  ;;  %v3249_v49 = vmul.u32 %v3245_v19, %v3222_v11 }
 0x872   :  { %v3229_v54 = vshll.u32 %v3226_v47, 16  ;;  %v3231_v46 = vshll.u32 %v3227_v4, 16  ;;  %v3230_v30 = vshrl.u32 %v3226_v47, 16  ;;  %v3232_v8 = vshrl.u32 %v3227_v4, 16 }
 0x873   :  { %v3118_v16 = vshll.u32 %v5459_v3, 30  ;;  %vm3255_vm1 = vc.u32 %v3247_v36, %v3251_v0  ;;  %v3253_v29 = vshll.u32 %v3249_v49, 16  ;;  %v3257_v5 = vadd.s32 %v3251_v0, %v3247_v36 }
 0x874   :  { %vm3233_vm3 = vc.u32 %v3225_v12, %v3229_v54  ;;  %v3235_v20 = vadd.s32 %v3229_v54, %v3225_v12  ;;  %v3256_v23 = vsel %vm3255_vm1, 1, %v3895_v2  ;;  %v3252_v33 = vshrl.u32 %v3248_v17, 16 }
 0x875   :  { %v3119_v52 = vsub.s32 %v3115_v7, %v3118_v16  ;;  %v3234_v45 = vsel %vm3233_vm3, 1, %v3895_v2  ;;  %v3258_v32 = vadd.s32 %v3256_v23, %v3250_v31  ;;  %vm3259_vm2 = vc.u32 %v3257_v5, %v3253_v29 }
 0x876   :  { %v3236_v24 = vadd.s32 %v3234_v45, %v3228_v58  ;;  %vm3237_vm12 = vc.u32 %v3235_v20, %v3231_v46  ;;  %v3260_v38 = vsel %vm3259_vm2, 1, %v3895_v2  ;;  %v3208_v48 = vsel %vm3204_vm13, %v3188_v25, %v5417_v10 }
 0x877   :  { %vm3120_vm15 = vcmp.lt.s32.totalorder %v3119_v52, 0  ;;  %v3121_v59 = vsub.s32 0, %v3119_v52  ;;  %v3238_v1 = vsel %vm3237_vm12, 1, %v3895_v2  ;;  %v3262_v57 = vadd.s32 %v3260_v38, %v3258_v32 }
 0x878   :  { %v3240_v51 = vadd.s32 %v3238_v1, %v3236_v24  ;;  %v3210_v43 = vsel %vm3206_vm8, %v5419_v60, %v3209_v55  ;;  %v3254_v18 = vshrl.u32 %v3249_v49, 16  ;;  %v3111_v26 = vadd.s32 %v5405_v37, %v5423_v28 }
 0x879   :  { %v3122_v56 = vsel %vm3120_vm15, %v3121_v59, %v3119_v52  ;;  %v3263_v7 = vadd.s32 %v3262_v57, %v3252_v33  ;;  %v3261_v2 = vadd.s32 %v3257_v5, %v3253_v29  ;;  %v3211_v39 = vsel %vm3205_vm10, %v3208_v48, %v3210_v43 }
 0x87a   :  { %v3123_v61 = vclz %v3122_v56  ;;  %v3241_v35 = vadd.s32 %v3240_v51, %v3230_v30  ;;  %v3265_v6 = vmul.u32 %v5431_v27, %v3211_v39  ;;  %vm3019_vm14 = vcmp.lt.s32.totalorder %v5361_v34, 0 }
 0x87b   :  { %v3264_v11 = vadd.s32 %v3263_v7, %v3254_v18  ;;  %vm5487_vm6 = vcmp.le.f32.partialorder %v3017_v15, 0.7853982  ;;  %v3141_v46 = vsub.s32 4, %v5459_v3  ;;  %vm3160_vm12 = vweird.f32 %v5361_v34 }
 0x87c   :  { %v3762_v41 = vadd.s32 4294967294, %v3123_v61  ;;  %v3242_v22 = vadd.s32 %v3241_v35, %v3232_v8  ;;  %vm3174_vm1 = vcmp.lt.s32.totalorder %v5371_v9, 0  ;;  %vm5502_vm15 = vcmp.le.f32.partialorder %v3172_v63, 0.7853982 }
 0x87d   :  { %v3268_v60 = vadd.s32 1, %v3264_v11  ;;  %v3142_v1 = vsel %vm3019_vm14, %v3141_v46, %v5459_v3 }
 0x87e   :  { %vm3763_vm4 = vcmp.lt.s32.totalorder %v3762_v41, 0  ;;  %vm3267_vm0 = vc.u32 %v3242_v22, %v3261_v2  ;;  %v3144_v29 = vsel %vm5487_vm6, 0, %v3142_v1  ;;  %v3266_v55 = vadd.s32 %v3261_v2, %v3242_v22 }
 0x87f   :  { %v3126_v44 = vsel %vm3763_vm4, 0, %v3762_v41  ;;  %v3269_v47 = vsel %vm3267_vm0, %v3268_v60, %v3264_v11  ;;  %v3161_v25 = vadd.s32 3, %v3144_v29 }
 0x880   :  { %v3127_v21 = vsub.s32 32, %v3126_v44  ;;  %v3131_v42 = vsub.s32 4294967266, %v3126_v44  ;;  %v3128_v10 = vshll.u32 %v3119_v52, %v3126_v44  ;;  %v3270_v4 = vadd.s32 %v3269_v47, %v3265_v6 }
 0x881   :  { %v3162_v18 = vand.u32 3, %v3161_v25 }
 0x882   :  { %v3129_v13 = vshrl.u32 %v3111_v26, %v3127_v21  ;;  %v3132_v53 = vadd.s32 127, %v3131_v42  ;;  %v3271_v28 = vadd.s32 536870912, %v3270_v4 }
 0x883   :  { %vm3164_vm8 = vcmp.eq.s32.totalorder %v3162_v18, 0  ;;  %vm3167_vm10 = vcmp.eq.s32.totalorder %v3162_v18, 2  ;;  %vm3163_vm3 = vcmp.lt.s32.totalorder %v3162_v18, 2 }
 0x884   :  { %v3130_v40 = vor.u32 %v3129_v13, %v3128_v10  ;;  %v3133_v19 = vshll.u32 %v3132_v53, 23  ;;  %v5481_v54 = vshrl.u32 %v3271_v28, 30 }
 0x886   :  { %v3134_v37 = vor.u32 4788187, %v3133_v19  ;;  %v3137_v12 = vcvt.s32.f32 %v3130_v40  ;;  %v3273_v16 = vshll.u32 %v5481_v54, 30  ;;  %v3332_v19 = vpop.permute.xlu2 %3331  ;;  %v3296_v28 = vsub.s32 4, %v5481_v54 }
 0x888   :  { %v3135_v17 = vand.u32 2147483647, %v3134_v37  ;;  %v3274_v36 = vsub.s32 %v3270_v4, %v3273_v16 }
 0x88a   :  { %v3138_v62 = vmul.f32 %v3137_v12, %v3135_v17  ;;  %vm3275_vm13 = vcmp.lt.s32.totalorder %v3274_v36, 0  ;;  %v3276_v49 = vsub.s32 0, %v3274_v36 }
 0x88c   :  { %v3139_v58 = vxor.u32 2147483648, %v3138_v62  ;;  %v3277_v45 = vsel %vm3275_vm13, %v3276_v49, %v3274_v36 }
 0x88d   :  { %v3278_v59 = vclz %v3277_v45 }
 0x88e   :  { %v3140_v0 = vsel %vm3019_vm14, %v3139_v58, %v3138_v62  ;;  %vm3315_vm14 = vweird.f32 %v5371_v9 }
 0x88f   :  { %v3143_v20 = vsel %vm5487_vm6, %v5361_v34, %v3140_v0  ;;  %v3765_v51 = vadd.s32 4294967294, %v3278_v59 }
 0x890   :  { %v3145_v52 = vmul.f32 %v3143_v20, %v3143_v20 }
 0x891   :  { %vm3766_vm7 = vcmp.lt.s32.totalorder %v3765_v51, 0 }
 0x892   :  { %v3146_v30 = vmul.f32 -0.001358992, %v3145_v52  ;;  %v3153_v24 = vmul.f32 -0.00019511016, %v3145_v52  ;;  %v3281_v56 = vsel %vm3766_vm7, 0, %v3765_v51 }
 0x893   :  { %v3282_v35 = vsub.s32 32, %v3281_v56  ;;  %v3286_v8 = vsub.s32 4294967266, %v3281_v56  ;;  %v3283_v3 = vshll.u32 %v3274_v36, %v3281_v56  ;;  %v3297_v36 = vsel %vm3174_vm1, %v3296_v28, %v5481_v54 }
 0x894   :  { %v3147_v15 = vadd.f32 0.041655596, %v3146_v30  ;;  %v3154_v31 = vadd.f32 0.008332121, %v3153_v24  ;;  %v3299_v0 = vsel %vm5502_vm15, 0, %v3297_v36 }
 0x895   :  { %v3284_v33 = vshrl.u32 %v3266_v55, %v3282_v35  ;;  %v3287_v57 = vadd.s32 127, %v3286_v8  ;;  %v3316_v45 = vadd.s32 3, %v3299_v0 }
 0x896   :  { %v3148_v23 = vmul.f32 %v3147_v15, %v3145_v52  ;;  %v3155_v5 = vmul.f32 %v3154_v31, %v3145_v52 }
 0x897   :  { %v3285_v7 = vor.u32 %v3284_v33, %v3283_v3  ;;  %v3288_v26 = vshll.u32 %v3287_v57, 23  ;;  %v3317_v1 = vand.u32 3, %v3316_v45  ;;  %v3838_v57 = vld [vmem:[%s5549_s7 + $0x18] sm:$0xff] }
 0x898   :  { %v3149_v32 = vadd.f32 -0.4999988, %v3148_v23  ;;  %v3156_v61 = vadd.f32 -0.16666654, %v3155_v5 }
 0x899   :  { %v3289_v42 = vor.u32 4788187, %v3288_v26  ;;  %v3292_v2 = vcvt.s32.f32 %v3285_v7  ;;  %vm3319_vm2 = vcmp.eq.s32.totalorder %v3317_v1, 0  ;;  %vm3322_vm4 = vcmp.eq.s32.totalorder %v3317_v1, 2  ;;  %v3833_v7 = vld [vmem:[%s5549_s7] sm:$0xff]  ;;  %v3834_v26 = vld [vmem:[%s5549_s7 + $0x8] sm:$0xff] }
 0x89a   :  { %v3150_v38 = vmul.f32 %v3149_v32, %v3145_v52  ;;  %v3157_v41 = vmul.f32 %v3156_v61, %v3145_v52  ;;  %vm3318_vm0 = vcmp.lt.s32.totalorder %v3317_v1, 2  ;;  %v3337_v32 = vpop.permute.xlu0 %3336 }
 0x89b   :  { %v3290_v22 = vand.u32 2147483647, %v3289_v42 }
 0x89c   :  { %v3151_v48 = vadd.f32 1.0, %v3150_v38  ;;  %v3158_v43 = vadd.f32 1.0, %v3157_v41 }
 0x89d   :  { %v3293_v53 = vmul.f32 %v3292_v2, %v3290_v22 }
 0x89e   :  { %v3159_v44 = vmul.f32 %v3158_v43, %v3143_v20  ;;  %v3168_v21 = vxor.u32 2147483648, %v3151_v48 }
 0x89f   :  { %v3294_v40 = vxor.u32 2147483648, %v3293_v53 }
 0x8a0   :  { %v3165_v39 = vxor.u32 2147483648, %v3159_v44  ;;  %v3169_v10 = vsel %vm3167_vm10, %v3168_v21, %v3159_v44 }
 0x8a1   :  { %v3295_v37 = vsel %vm3174_vm1, %v3294_v40, %v3293_v53 }
 0x8a2   :  { %v3166_v11 = vsel %vm3164_vm8, %v3151_v48, %v3165_v39  ;;  %v3298_v34 = vsel %vm5502_vm15, %v5371_v9, %v3295_v37  ;;  %v3452_v9 = vld [vmem:[%s5550_s8 + $0x10] sm:$0xff]  ;;  %v3420_v48 = vpop.permute.xlu1 %3419  ;;  %v3457_v39 = vpop.permute.xlu0 %3456 }
 0x8a3   :  { %v3170_v13 = vsel %vm3163_vm3, %v3166_v11, %v3169_v10  ;;  %v3300_v12 = vmul.f32 %v3298_v34, %v3298_v34 }
 0x8a4   :  { %v3171_v60 = vsel %vm3160_vm12, nan, %v3170_v13 }
 0x8a5   :  { %v3327_v6 = vmul.f32 %v3171_v60, %v3171_v60  ;;  %v3301_v16 = vmul.f32 -0.001358992, %v3300_v12  ;;  %v3308_v58 = vmul.f32 -0.00019511016, %v3300_v12 }
 0x8a7   :  { %v3339_v47 = vmul.f32 %v3332_v19, %v3327_v6  ;;  %v3302_v63 = vadd.f32 0.041655596, %v3301_v16  ;;  %v3309_v27 = vadd.f32 0.008332121, %v3308_v58 }
 0x8a9   :  { %v3341_v17 = vadd.f32 %v3339_v47, %v5358_v14  ;;  %v3303_v46 = vmul.f32 %v3302_v63, %v3300_v12  ;;  %v3310_v20 = vmul.f32 %v3309_v27, %v3300_v12 }
 0x8aa   :  { %v3462_v13 = vpop.permute.xlu1 %3461 }
 0x8ab   :  { %v3343_v62 = vpack.c.bf16 %v3341_v17, %v3341_v17  ;;  %v3304_v49 = vadd.f32 -0.4999988, %v3303_v46  ;;  %v3311_v52 = vadd.f32 -0.16666654, %v3310_v20 }
 0x8ad   :  { %3345 = vst.msk [vmem:[#allocation2 + $0x4] sm:$0xf] %vm388_vm5, %v3343_v62  ;;  %v3305_v30 = vmul.f32 %v3304_v49, %v3300_v12  ;;  %v3312_v14 = vmul.f32 %v3311_v52, %v3300_v12 }
 0x8af   :  { %v3306_v24 = vadd.f32 1.0, %v3305_v30  ;;  %v3313_v59 = vadd.f32 1.0, %v3312_v14 }
 0x8b1   :  { %v3314_v15 = vmul.f32 %v3313_v59, %v3298_v34  ;;  %v3323_v31 = vxor.u32 2147483648, %v3306_v24  ;;  %v3472_v34 = vpop.permute.xlu0 %3471 }
 0x8b3   :  { %v3320_v54 = vxor.u32 2147483648, %v3314_v15  ;;  %v3324_v29 = vsel %vm3322_vm4, %v3323_v31, %v3314_v15 }
 0x8b4   :  { %v3781_v25 = vld [vmem:[#allocation2 + $0x4] sm:$0xf] }
 0x8b5   :  { %v3321_v51 = vsel %vm3319_vm2, %v3306_v24, %v3320_v54  ;;  %v3835_v38 = vld [vmem:[#allocation2 + $0x4] sm:$0xf] }
 0x8b6   :  { %v3325_v23 = vsel %vm3318_vm0, %v3321_v51, %v3324_v29 }
 0x8b7   :  { %v3326_v5 = vsel %vm3315_vm14, nan, %v3325_v23 }
 0x8b8   :  { %v3328_v56 = vmul.f32 %v3326_v5, %v3326_v5 }
 0x8ba   :  { %v3340_v61 = vmul.f32 %v3337_v32, %v3328_v56 }
 0x8bc   :  { %v3342_v55 = vadd.f32 %v3340_v61, %v5368_v50  ;;  %v3837_v50 = vld [vmem:[%s5549_s7 + $0x10] sm:$0xff]  ;;  %s3916_s7 = smov [#allocation3]  }
 0x8bd   :  { %s3487_s16 = sshll.u32 %s3916_s7, 4  ;;  %s3488_s16 = int_to_ptr.vmem [resolvable:$true] %s3487_s16 }
 0x8be   :  { %v3344_v35 = vpack.c.bf16 %v3342_v55, %v3342_v55 }
 0x8c0   :  { %3346 = vst.msk [vmem:[#allocation2 + $0x10] sm:$0xf] %vm388_vm5, %v3344_v35 }
 0x8c7   :  { %v3839_v8 = vld [vmem:[#allocation2 + $0xc] sm:$0xf0] }
 0x8c8   :  { %v3797_v41 = vld [vmem:[#allocation2 + $0xc] sm:$0xf0]  ;;  %v3782_v33 = vor.u32 %v3839_v8, %v3781_v25 }
 0x8c9   :  { %v3800_v3 = vor.u32 %v3835_v38, %v3797_v41 }
 0x8ca   :  { %3389 = vmatpush.bf16.msrb.mxu0 %v3782_v33 }
 0x8cb   :  { %3421 = vrot.lane.b32.xlu2 %v3800_v3, %s3904_s23 }
 0x8cd   :  { %3783 = vmatmul.msk.bf16.vlgmr.msrb.gmra.mxu0 %vm418_vm9, %v3837_v50 }
 0x8d3   :  { %3466 = vperm.xlu2 %3866, %v3452_v9  }
 0x8dd   :  { %3784 = vmatmul.msk.bf16.gmra.mxu0 %vm418_vm9, %v3838_v57 }
 0x925   :  { %v3422_v43 = vpop.permute.xlu2 %3421 }
 0x926   :  { %v3423_v18 = vsel %vm477_vm11, %v3420_v48, %v3422_v43 }
 0x927   :  { %3438 = vmatpush.bf16.msrb.mxu1 %v3423_v18 }
 0x92a   :  { %3801 = vmatmul.msk.bf16.vlgmr.msrb.gmra.mxu1 %vm418_vm9, %v3833_v7 }
 0x92d   :  { %v3467_v19 = vpop.permute.xlu2 %3466 }
 0x93a   :  { %3802 = vmatmul.msk.bf16.gmra.mxu1 %vm418_vm9, %v3834_v26 }
 0x94a   :  { %v3391_v44 = vpop.f32.mrf.mxu0 }
 0x952   :  { %v3393_v2 = vpop.f32.mrf.mxu0 }
 0x95a   :  { %v3396_v60 = vpop.f32.mrf.mxu0 }
 0x962   :  { %v3398_v4 = vpop.f32.mrf.mxu0 }
 0x9a7   :  { %v3440_v21 = vpop.f32.mrf.mxu1 }
 0x9a8   :  { %v3441_v42 = vadd.f32 %v3440_v21, %v3391_v44 }
 0x9aa   :  { %v3474_v22 = vadd.f32 %v3457_v39, %v3441_v42 }
 0x9ac   :  { %3478 = vst [vmem:[#allocation3] sm:$0xff] %v3474_v22 }
 0x9af   :  { %v3442_v11 = vpop.f32.mrf.mxu1 }
 0x9b0   :  { %v3443_v10 = vadd.f32 %v3442_v11, %v3393_v2 }
 0x9b2   :  { %v3475_v53 = vadd.f32 %v3462_v13, %v3443_v10 }
 0x9b4   :  { %3479 = vst [vmem:[#allocation3 + $0x8] sm:$0xff] %v3475_v53 }
 0x9b7   :  { %v3445_v6 = vpop.f32.mrf.mxu1 }
 0x9b8   :  { %v3446_v40 = vadd.f32 %v3445_v6, %v3396_v60 }
 0x9ba   :  { %v3476_v47 = vadd.f32 %v3467_v19, %v3446_v40 }
 0x9bc   :  { %3481 = vst [vmem:[#allocation3 + $0x10] sm:$0xff] %v3476_v47 }
 0x9bf   :  { %v3447_v37 = vpop.f32.mrf.mxu1 }
 0x9c0   :  { %v3448_v28 = vadd.f32 %v3447_v37, %v3398_v4 }
 0x9c2   :  { %v3477_v17 = vadd.f32 %v3472_v34, %v3448_v28 }
 0x9c4   :  { %3482 = vst [vmem:[#allocation3 + $0x18] sm:$0xff] %v3477_v17 }
 0x9c5   :  { %3495 = dma.vmem_to_hbm [thread:$0]  %s3488_s16, 512, %s3490_s2, [#allocation4], %s3917_s14, %s3917_s14, %s3918_s15  }
 0x9c6   :  { %3893 = dma.done.wait [#allocation4], 512  }
 0x9c7   :  { %3894 = vsyncadd [#allocation4], 4294966784 }
 0x9c8   :  { %3500 = vsyncpa [#allocation4], 1 }

</bundles_post_ra>
